<compile_context>
chip_gen: v7x
topology: tpu7x:2x2x1
jax: 0.10.0
libtpu: 0.0.40
codegen_flags: <defaults>
</compile_context>

<pallas_src>
import functools

import jax
import jax.numpy as jnp
from jax.experimental import pallas as pl
from jax.experimental.pallas import tpu as pltpu


# ------------------------------- Static config ------------------------------ #

IN_CHANNELS = 4
BASE_CHANNELS = 8
OUT_DIMS = 3
SEQ_LENGTH = 128
FC_STAGES = 2
KERNEL_SIZE = 9
PAD = KERNEL_SIZE // 2          # 4
HALO = 8                        # sublane-aligned zero halo on each side of scratch
FC_PAD = 128                    # lane-dense FC / output slab width
BB_CAP = 32                     # max samples per grid step (VMEM-safe on v5e/v6e/v7x)

# VGG-"A" (VGG11) stage config: (num conv layers, channel multiplier).
LAYER_CFGS = [(1, 1), (1, 2), (2, 4), (2, 8), (2, 8)]


def _build_conv_specs():
    specs = []
    c_in, length = IN_CHANNELS, SEQ_LENGTH
    for n_layers, mul in LAYER_CFGS:
        c_out = mul * BASE_CHANNELS
        for k in range(n_layers):
            stride = 2 if k == 0 else 1        # program_conv_filters: stride 2 / stage
            l_out = (length + 2 * PAD - KERNEL_SIZE) // stride + 1
            specs.append(dict(cin=c_in, cout=c_out, k=KERNEL_SIZE, stride=stride,
                              lin=length, lout=l_out))
            c_in, length = c_out, l_out
    return tuple(specs), c_in, length


CONV_SPECS, FEAT_C, FEAT_L = _build_conv_specs()     # FEAT_C=64, FEAT_L=4
N_CONV = len(CONV_SPECS)                             # 8 conv layers
assert 4 <= FEAT_L <= 8                              # program_conv_filters bounds

CMAX = max(s["cout"] for s in CONV_SPECS)            # 64 (conv weight pack width)

# Row offsets of each conv layer's (9*cin, cout) block inside the packed slab.
CONV_ROW_OFF = []
_r = 0
for _s in CONV_SPECS:
    CONV_ROW_OFF.append(_r)
    _r += _s["k"] * _s["cin"]
CONV_W_ROWS = _r                                     # 2556

# FC stage dims: 64 -> 32 -> 3 (fc_stages=2).
FC_DIMS = []
_c = FEAT_C
for _ in range(FC_STAGES - 1):
    FC_DIMS.append((_c, _c // 2))
    _c //= 2
FC_DIMS.append((_c, OUT_DIMS))
N_FC = len(FC_DIMS)
assert FEAT_C <= FC_PAD and all(d <= FC_PAD for dd in FC_DIMS for d in dd)

# FC pack layout: [weight rows..., bias row] per layer; layers > 0 take FC_PAD
# input rows (previous activation is a 128-wide zero-padded slab).
FC_ROW_OFF = []                                      # (row_start, n_weight_rows)
_r = 0
for _fi, (_din, _dout) in enumerate(FC_DIMS):
    _nrows = _din if _fi == 0 else FC_PAD
    FC_ROW_OFF.append((_r, _nrows))
    _r += _nrows + 1
FC_PACK_ROWS = _r                                    # 194


# ------------------------------- Fused kernel ------------------------------- #

def _vgg1d_kernel(bb, x_ref, cw_ref, cb_ref, fc_ref, out_ref, *scratch):
    """Full VGG1D forward for a block of `bb` samples (one grid step)."""
    pad_bufs = scratch[:N_CONV]           # (bb, lin + 2*HALO, cin) per layer
    im_bufs = scratch[N_CONV:2 * N_CONV]  # (bb, lout, 9*cin) im2col per layer

    x = x_ref[...]                                       # (bb, 128, 4) channels-last

    for li, spec in enumerate(CONV_SPECS):
        lin, lout = spec["lin"], spec["lout"]
        cin, cout = spec["cin"], spec["cout"]
        stride, ksz = spec["stride"], spec["k"]
        buf, im = pad_bufs[li], im_bufs[li]

        # Zero ONLY the halo rows; interior rows are fully overwritten each step.
        halo_zeros = jnp.zeros((bb, HALO, cin), jnp.float32)
        buf[:, :HALO, :] = halo_zeros
        buf[:, HALO + lin:, :] = halo_zeros
        buf[:, HALO:HALO + lin, :] = x

        # Build im2col: 9 shifted copies of the padded activation. Stride-2
        # layers are de-interleaved once into even/odd row planes so every tap
        # is a contiguous sublane slice (no per-tap strided reads).
        if stride == 1:
            planes = None
        else:
            half = (lin + 2 * HALO) // 2
            planes = (buf[:, pl.ds(0, half, stride=2), :],
                      buf[:, pl.ds(1, half, stride=2), :])
        for k in range(ksz):
            r0 = HALO - PAD + k              # padded-buffer row of output l=0, tap k
            if stride == 1:
                tap = buf[:, r0:r0 + lout, :]
            else:
                tap = planes[r0 % 2][:, r0 // 2:r0 // 2 + lout, :]
            im[:, :, k * cin:(k + 1) * cin] = tap

        # ONE MXU matmul per conv layer: (bb*lout, 9*cin) @ (9*cin, CMAX),
        # bias folded into the epilogue, then ReLU.
        m = im[...].reshape(bb * lout, ksz * cin)
        off = CONV_ROW_OFF[li]
        w = cw_ref[off:off + ksz * cin, :]                # (9*cin, CMAX)
        y = jnp.dot(m, w, preferred_element_type=jnp.float32) + cb_ref[li:li + 1, :]
        y = jnp.maximum(y, 0.0)                           # ReLU
        x = y.reshape(bb, lout, CMAX)[:, :, :cout]        # keep real channels only

    # AdaptiveAvgPool1d(1) + flatten -> (bb, FEAT_C).
    h = jnp.mean(x, axis=1)

    # FC stage (Dropout == identity at inference). All widths zero-padded to a
    # 128-lane slab so every matmul/store stays lane-dense.
    for fi in range(N_FC):
        row, nrows = FC_ROW_OFF[fi]
        h = (jnp.dot(h, fc_ref[row:row + nrows, :],
                     preferred_element_type=jnp.float32)
             + fc_ref[row + nrows:row + nrows + 1, :])
        if fi < N_FC - 1:
            h = jnp.maximum(h, 0.0)

    out_ref[...] = h.reshape(out_ref.shape).astype(out_ref.dtype)


def _fused_forward(x_nlc, conv_w_pack, conv_b_pack, fc_pack):
    n = x_nlc.shape[0]
    # Batch block per grid step; keep >= 2 grid steps so v7x megacore can shard.
    bb = 1 if n <= 1 else min(BB_CAP, (n + 1) // 2)
    steps = -(-n // bb)
    n_pad = steps * bb
    if n_pad != n:
        x_nlc = jnp.pad(x_nlc, ((0, n_pad - n), (0, 0), (0, 0)))

    in_specs = [
        pl.BlockSpec((bb, SEQ_LENGTH, IN_CHANNELS), lambda i: (i, 0, 0)),
        pl.BlockSpec(conv_w_pack.shape, lambda i: (0, 0)),   # fetched once, resident
        pl.BlockSpec(conv_b_pack.shape, lambda i: (0, 0)),
        pl.BlockSpec(fc_pack.shape, lambda i: (0, 0)),
    ]
    # Lane-dense output: full (1, bb, 128) block per step; wrapper slices to 3.
    out_spec = pl.BlockSpec((1, bb, FC_PAD), lambda i: (i, 0, 0))

    scratch_shapes = (
        [pltpu.VMEM((bb, s["lin"] + 2 * HALO, s["cin"]), jnp.float32)
         for s in CONV_SPECS]
        + [pltpu.VMEM((bb, s["lout"], s["k"] * s["cin"]), jnp.float32)
           for s in CONV_SPECS]
    )

    flops = 0
    for s in CONV_SPECS:
        flops += 2 * n_pad * s["lout"] * s["cout"] * s["cin"] * s["k"]
    for din, dout in FC_DIMS:
        flops += 2 * n_pad * din * dout
    bytes_accessed = 4 * (n_pad * SEQ_LENGTH * IN_CHANNELS + n_pad * FC_PAD
                          + int(conv_w_pack.size) + int(conv_b_pack.size)
                          + int(fc_pack.size))

    out = pl.pallas_call(
        functools.partial(_vgg1d_kernel, bb),
        out_shape=jax.ShapeDtypeStruct((steps, bb, FC_PAD), jnp.float32),
        grid_spec=pltpu.PrefetchScalarGridSpec(
            num_scalar_prefetch=0,
            grid=(steps,),
            in_specs=in_specs,
            out_specs=out_spec,
            scratch_shapes=scratch_shapes,
        ),
        compiler_params=pltpu.CompilerParams(
            dimension_semantics=("parallel",),
            vmem_limit_bytes=48 * 1024 * 1024,
        ),
        cost_estimate=pl.CostEstimate(flops=int(flops), transcendentals=0,
                                      bytes_accessed=int(bytes_accessed)),
    )(x_nlc, conv_w_pack, conv_b_pack, fc_pack)

    return out.reshape(n_pad, FC_PAD)[:n, :OUT_DIMS]


# ------------------------------ Params & forward ----------------------------- #

def init_params(key):
    """Deterministic init mimicking VGG1D.reset_weights(); weights stored packed
    for the kernel: conv as one (sum_i 9*cin_i, CMAX) slab of (9*cin, cout)
    blocks, conv biases as one (N_CONV, CMAX) slab, FC as one (rows, 128) slab."""
    conv_w_pack = jnp.zeros((CONV_W_ROWS, CMAX), jnp.float32)
    conv_b_pack = jnp.zeros((N_CONV, CMAX), jnp.float32)      # Conv1d bias -> 0
    for li, spec in enumerate(CONV_SPECS):
        key, sub = jax.random.split(key)
        fan_out = spec["cout"] * spec["k"]
        std = (2.0 / fan_out) ** 0.5                          # kaiming_normal fan_out relu
        w = std * jax.random.normal(
            sub, (spec["cout"], spec["cin"], spec["k"]), jnp.float32)   # torch layout
        w2 = jnp.transpose(w, (2, 1, 0)).reshape(spec["k"] * spec["cin"],
                                                 spec["cout"])
        off = CONV_ROW_OFF[li]
        conv_w_pack = conv_w_pack.at[off:off + spec["k"] * spec["cin"],
                                     :spec["cout"]].set(w2)

    fc_pack = jnp.zeros((FC_PACK_ROWS, FC_PAD), jnp.float32)  # Linear bias -> 0
    for fi, (din, dout) in enumerate(FC_DIMS):
        key, sub = jax.random.split(key)
        w = 0.01 * jax.random.normal(sub, (dout, din), jnp.float32)     # torch (out,in)
        row, _nrows = FC_ROW_OFF[fi]
        fc_pack = fc_pack.at[row:row + din, :dout].set(jnp.transpose(w))

    return {"conv_w": conv_w_pack, "conv_b": conv_b_pack, "fc": fc_pack}


@jax.jit
def vgg1d_forward(params, x_ncl, age):
    """x_ncl: (N, C, L) PyTorch layout; age unused (use_age='no')."""
    del age
    x_nlc = jnp.transpose(x_ncl, (0, 2, 1)).astype(jnp.float32)   # NCL -> NLC
    return _fused_forward(x_nlc, params["conv_w"], params["conv_b"], params["fc"])


def _reference_forward(params, x_ncl):
    """Pure-JAX/XLA reference (same math, no Pallas) for a correctness check."""
    x = jnp.transpose(x_ncl, (0, 2, 1)).astype(jnp.float32)
    for li, spec in enumerate(CONV_SPECS):
        cin, cout, ksz = spec["cin"], spec["cout"], spec["k"]
        s, lout = spec["stride"], spec["lout"]
        off = CONV_ROW_OFF[li]
        w = params["conv_w"][off:off + ksz * cin, :cout].reshape(ksz, cin, cout)
        b = params["conv_b"][li, :cout]
        xp = jnp.pad(x, ((0, 0), (PAD, PAD), (0, 0)))
        y = jnp.zeros((x.shape[0], lout, cout), jnp.float32) + b
        for k in range(ksz):
            xs = xp[:, k:k + s * (lout - 1) + 1:s, :]
            y = y + jnp.einsum("nlc,cd->nld", xs, w[k])
        x = jnp.maximum(y, 0.0)
    h = jnp.mean(x, axis=1)
    for fi, (din, dout) in enumerate(FC_DIMS):
        row, nrows = FC_ROW_OFF[fi]
        w = params["fc"][row:row + din, :dout]
        b = params["fc"][row + nrows, :dout]
        h = h @ w + b
        if fi < N_FC - 1:
            h = jnp.maximum(h, 0.0)
    return h


# ----------------------------------- Main ------------------------------------ #

if __name__ == "__main__":
    key = jax.random.PRNGKey(0)
    pkey, xkey, akey = jax.random.split(key, 3)

    params = init_params(pkey)
    x = jax.random.normal(xkey, (2, IN_CHANNELS, SEQ_LENGTH), jnp.float32)
    age = jax.random.uniform(akey, (2,), jnp.float32)   # unused (use_age='no')

    out = jax.block_until_ready(vgg1d_forward(params, x, age))
    assert out.shape == (2, OUT_DIMS), out.shape
    assert bool(jnp.all(jnp.isfinite(out)))

    ref = _reference_forward(params, x)
    max_err = float(jnp.max(jnp.abs(out - ref)))
    assert max_err < 1e-3, f"Pallas/XLA mismatch: max |diff| = {max_err}"

    print("KERNEL_OK")
</pallas_src>

<mosaic_0001>
module attributes {stable_mosaic.version = 11 : i64} {
  func.func @_vgg1d_kernel(%arg0: i32, %arg1: memref<1x128x4xf32, #tpu.memory_space<vmem>>, %arg2: memref<2556x64xf32, #tpu.memory_space<vmem>>, %arg3: memref<8x64xf32, #tpu.memory_space<vmem>>, %arg4: memref<194x128xf32, #tpu.memory_space<vmem>>, %arg5: memref<1x1x128xf32, #tpu.memory_space<vmem>>, %arg6: memref<1x144x4xf32, #tpu.memory_space<vmem>>, %arg7: memref<1x80x8xf32, #tpu.memory_space<vmem>>, %arg8: memref<1x48x16xf32, #tpu.memory_space<vmem>>, %arg9: memref<1x32x32xf32, #tpu.memory_space<vmem>>, %arg10: memref<1x32x32xf32, #tpu.memory_space<vmem>>, %arg11: memref<1x24x64xf32, #tpu.memory_space<vmem>>, %arg12: memref<1x24x64xf32, #tpu.memory_space<vmem>>, %arg13: memref<1x20x64xf32, #tpu.memory_space<vmem>>, %arg14: memref<1x64x36xf32, #tpu.memory_space<vmem>>, %arg15: memref<1x32x72xf32, #tpu.memory_space<vmem>>, %arg16: memref<1x16x144xf32, #tpu.memory_space<vmem>>, %arg17: memref<1x16x288xf32, #tpu.memory_space<vmem>>, %arg18: memref<1x8x288xf32, #tpu.memory_space<vmem>>, %arg19: memref<1x8x576xf32, #tpu.memory_space<vmem>>, %arg20: memref<1x4x576xf32, #tpu.memory_space<vmem>>, %arg21: memref<1x4x576xf32, #tpu.memory_space<vmem>>) attributes {dimension_semantics = [#tpu.dimension_semantics<parallel>], iteration_bounds = array<i64: 2>, scalar_prefetch = 0 : i64, scratch_operands = 16 : i64, tpu.core_type = #tpu.core_type<tc>, window_params = [{transform_indices = @transform_0, window_bounds = array<i64: 1, 128, 4>}, {pipeline_mode = #tpu.pipeline_mode<synchronous>, transform_indices = @transform_1, window_bounds = array<i64: 2556, 64>}, {pipeline_mode = #tpu.pipeline_mode<synchronous>, transform_indices = @transform_2, window_bounds = array<i64: 8, 64>}, {pipeline_mode = #tpu.pipeline_mode<synchronous>, transform_indices = @transform_3, window_bounds = array<i64: 194, 128>}, {transform_indices = @transform_4, window_bounds = array<i64: 1, 1, 128>}]} {
    %c0 = arith.constant 0 : index
    %c0_0 = arith.constant 0 : index
    %c0_1 = arith.constant 0 : index
    %0 = vector.load %arg1[%c0, %c0_0, %c0_1] : memref<1x128x4xf32, #tpu.memory_space<vmem>>, vector<1x128x4xf32>
    %cst = arith.constant 0.000000e+00 : f32
    %1 = vector.broadcast %cst : f32 to vector<1x8x4xf32>
    %c0_2 = arith.constant 0 : index
    %c0_3 = arith.constant 0 : index
    %c0_4 = arith.constant 0 : index
    %2 = vector.load %arg6[%c0_2, %c0_3, %c0_4] : memref<1x144x4xf32, #tpu.memory_space<vmem>>, vector<1x8x4xf32>
    tpu.vector_store %arg6[%c0_2, %c0_3, %c0_4], %1 {strides = array<i32>} : memref<1x144x4xf32, #tpu.memory_space<vmem>>, vector<1x8x4xf32>,
    %c0_5 = arith.constant 0 : index
    %c136 = arith.constant 136 : index
    %c0_6 = arith.constant 0 : index
    %3 = vector.load %arg6[%c0_5, %c136, %c0_6] : memref<1x144x4xf32, #tpu.memory_space<vmem>>, vector<1x8x4xf32>
    tpu.vector_store %arg6[%c0_5, %c136, %c0_6], %1 {strides = array<i32>} : memref<1x144x4xf32, #tpu.memory_space<vmem>>, vector<1x8x4xf32>,
    %c0_7 = arith.constant 0 : index
    %c8 = arith.constant 8 : index
    %c0_8 = arith.constant 0 : index
    %4 = vector.load %arg6[%c0_7, %c8, %c0_8] : memref<1x144x4xf32, #tpu.memory_space<vmem>>, vector<1x128x4xf32>
    tpu.vector_store %arg6[%c0_7, %c8, %c0_8], %0 {strides = array<i32>} : memref<1x144x4xf32, #tpu.memory_space<vmem>>, vector<1x128x4xf32>,
    %c0_9 = arith.constant 0 : index
    %c0_10 = arith.constant 0 : index
    %c0_11 = arith.constant 0 : index
    %5 = tpu.strided_load %arg6[%c0_9, %c0_10, %c0_11] {strides = array<i32: 1, 2, 1>} : memref<1x144x4xf32, #tpu.memory_space<vmem>>, vector<1x72x4xf32>
    %c0_12 = arith.constant 0 : index
    %c1 = arith.constant 1 : index
    %c0_13 = arith.constant 0 : index
    %6 = tpu.strided_load %arg6[%c0_12, %c1, %c0_13] {strides = array<i32: 1, 2, 1>} : memref<1x144x4xf32, #tpu.memory_space<vmem>>, vector<1x72x4xf32>
    %7 = vector.extract_strided_slice %5 {offsets = [0, 2, 0], sizes = [1, 64, 4], strides = [1, 1, 1]} : vector<1x72x4xf32> to vector<1x64x4xf32>
    %c0_14 = arith.constant 0 : index
    %c0_15 = arith.constant 0 : index
    %c0_16 = arith.constant 0 : index
    %8 = vector.load %arg14[%c0_14, %c0_15, %c0_16] : memref<1x64x36xf32, #tpu.memory_space<vmem>>, vector<1x64x4xf32>
    tpu.vector_store %arg14[%c0_14, %c0_15, %c0_16], %7 {strides = array<i32>} : memref<1x64x36xf32, #tpu.memory_space<vmem>>, vector<1x64x4xf32>,
    %9 = vector.extract_strided_slice %6 {offsets = [0, 2, 0], sizes = [1, 64, 4], strides = [1, 1, 1]} : vector<1x72x4xf32> to vector<1x64x4xf32>
    %c0_17 = arith.constant 0 : index
    %c0_18 = arith.constant 0 : index
    %c4 = arith.constant 4 : index
    %10 = vector.load %arg14[%c0_17, %c0_18, %c4] : memref<1x64x36xf32, #tpu.memory_space<vmem>>, vector<1x64x4xf32>
    tpu.vector_store %arg14[%c0_17, %c0_18, %c4], %9 {strides = array<i32>} : memref<1x64x36xf32, #tpu.memory_space<vmem>>, vector<1x64x4xf32>,
    %11 = vector.extract_strided_slice %5 {offsets = [0, 3, 0], sizes = [1, 64, 4], strides = [1, 1, 1]} : vector<1x72x4xf32> to vector<1x64x4xf32>
    %c0_19 = arith.constant 0 : index
    %c0_20 = arith.constant 0 : index
    %c8_21 = arith.constant 8 : index
    %12 = vector.load %arg14[%c0_19, %c0_20, %c8_21] : memref<1x64x36xf32, #tpu.memory_space<vmem>>, vector<1x64x4xf32>
    tpu.vector_store %arg14[%c0_19, %c0_20, %c8_21], %11 {strides = array<i32>} : memref<1x64x36xf32, #tpu.memory_space<vmem>>, vector<1x64x4xf32>,
    %13 = vector.extract_strided_slice %6 {offsets = [0, 3, 0], sizes = [1, 64, 4], strides = [1, 1, 1]} : vector<1x72x4xf32> to vector<1x64x4xf32>
    %c0_22 = arith.constant 0 : index
    %c0_23 = arith.constant 0 : index
    %c12 = arith.constant 12 : index
    %14 = vector.load %arg14[%c0_22, %c0_23, %c12] : memref<1x64x36xf32, #tpu.memory_space<vmem>>, vector<1x64x4xf32>
    tpu.vector_store %arg14[%c0_22, %c0_23, %c12], %13 {strides = array<i32>} : memref<1x64x36xf32, #tpu.memory_space<vmem>>, vector<1x64x4xf32>,
    %15 = vector.extract_strided_slice %5 {offsets = [0, 4, 0], sizes = [1, 64, 4], strides = [1, 1, 1]} : vector<1x72x4xf32> to vector<1x64x4xf32>
    %c0_24 = arith.constant 0 : index
    %c0_25 = arith.constant 0 : index
    %c16 = arith.constant 16 : index
    %16 = vector.load %arg14[%c0_24, %c0_25, %c16] : memref<1x64x36xf32, #tpu.memory_space<vmem>>, vector<1x64x4xf32>
    tpu.vector_store %arg14[%c0_24, %c0_25, %c16], %15 {strides = array<i32>} : memref<1x64x36xf32, #tpu.memory_space<vmem>>, vector<1x64x4xf32>,
    %17 = vector.extract_strided_slice %6 {offsets = [0, 4, 0], sizes = [1, 64, 4], strides = [1, 1, 1]} : vector<1x72x4xf32> to vector<1x64x4xf32>
    %c0_26 = arith.constant 0 : index
    %c0_27 = arith.constant 0 : index
    %c20 = arith.constant 20 : index
    %18 = vector.load %arg14[%c0_26, %c0_27, %c20] : memref<1x64x36xf32, #tpu.memory_space<vmem>>, vector<1x64x4xf32>
    tpu.vector_store %arg14[%c0_26, %c0_27, %c20], %17 {strides = array<i32>} : memref<1x64x36xf32, #tpu.memory_space<vmem>>, vector<1x64x4xf32>,
    %19 = vector.extract_strided_slice %5 {offsets = [0, 5, 0], sizes = [1, 64, 4], strides = [1, 1, 1]} : vector<1x72x4xf32> to vector<1x64x4xf32>
    %c0_28 = arith.constant 0 : index
    %c0_29 = arith.constant 0 : index
    %c24 = arith.constant 24 : index
    %20 = vector.load %arg14[%c0_28, %c0_29, %c24] : memref<1x64x36xf32, #tpu.memory_space<vmem>>, vector<1x64x4xf32>
    tpu.vector_store %arg14[%c0_28, %c0_29, %c24], %19 {strides = array<i32>} : memref<1x64x36xf32, #tpu.memory_space<vmem>>, vector<1x64x4xf32>,
    %21 = vector.extract_strided_slice %6 {offsets = [0, 5, 0], sizes = [1, 64, 4], strides = [1, 1, 1]} : vector<1x72x4xf32> to vector<1x64x4xf32>
    %c0_30 = arith.constant 0 : index
    %c0_31 = arith.constant 0 : index
    %c28 = arith.constant 28 : index
    %22 = vector.load %arg14[%c0_30, %c0_31, %c28] : memref<1x64x36xf32, #tpu.memory_space<vmem>>, vector<1x64x4xf32>
    tpu.vector_store %arg14[%c0_30, %c0_31, %c28], %21 {strides = array<i32>} : memref<1x64x36xf32, #tpu.memory_space<vmem>>, vector<1x64x4xf32>,
    %23 = vector.extract_strided_slice %5 {offsets = [0, 6, 0], sizes = [1, 64, 4], strides = [1, 1, 1]} : vector<1x72x4xf32> to vector<1x64x4xf32>
    %c0_32 = arith.constant 0 : index
    %c0_33 = arith.constant 0 : index
    %c32 = arith.constant 32 : index
    %24 = vector.load %arg14[%c0_32, %c0_33, %c32] : memref<1x64x36xf32, #tpu.memory_space<vmem>>, vector<1x64x4xf32>
    tpu.vector_store %arg14[%c0_32, %c0_33, %c32], %23 {strides = array<i32>} : memref<1x64x36xf32, #tpu.memory_space<vmem>>, vector<1x64x4xf32>,
    %c0_34 = arith.constant 0 : index
    %c0_35 = arith.constant 0 : index
    %c0_36 = arith.constant 0 : index
    %25 = vector.load %arg14[%c0_34, %c0_35, %c0_36] : memref<1x64x36xf32, #tpu.memory_space<vmem>>, vector<1x64x36xf32>
    %26 = vector.shape_cast %25 : vector<1x64x36xf32> to vector<64x36xf32>
    %c0_37 = arith.constant 0 : index
    %c0_38 = arith.constant 0 : index
    %27 = vector.load %arg2[%c0_37, %c0_38] : memref<2556x64xf32, #tpu.memory_space<vmem>>, vector<36x64xf32>
    %cst_39 = arith.constant dense<0.000000e+00> : vector<64x64xf32>
    %28 = tpu.matmul %26, %27, %cst_39 {dimension_numbers = #tpu.dot_dimension_numbers<[1], [0], [0], [1], [0, 0, 1, 1], [], []>} : vector<64x36xf32>, vector<36x64xf32>, vector<64x64xf32> -> vector<64x64xf32>
    %c0_40 = arith.constant 0 : index
    %c0_41 = arith.constant 0 : index
    %29 = vector.load %arg3[%c0_40, %c0_41] : memref<8x64xf32, #tpu.memory_space<vmem>>, vector<1x64xf32>
    %30 = vector.broadcast %29 : vector<1x64xf32> to vector<64x64xf32>
    %31 = arith.addf %28, %30 : vector<64x64xf32>
    %cst_42 = arith.constant 0.000000e+00 : f32
    %32 = vector.broadcast %cst_42 : f32 to vector<64x64xf32>
    %33 = arith.maximumf %31, %32 : vector<64x64xf32>
    %34 = vector.shape_cast %33 : vector<64x64xf32> to vector<1x64x64xf32>
    %35 = vector.extract_strided_slice %34 {offsets = [0, 0, 0], sizes = [1, 64, 8], strides = [1, 1, 1]} : vector<1x64x64xf32> to vector<1x64x8xf32>
    %cst_43 = arith.constant 0.000000e+00 : f32
    %36 = vector.broadcast %cst_43 : f32 to vector<1x8x8xf32>
    %c0_44 = arith.constant 0 : index
    %c0_45 = arith.constant 0 : index
    %c0_46 = arith.constant 0 : index
    %37 = vector.load %arg7[%c0_44, %c0_45, %c0_46] : memref<1x80x8xf32, #tpu.memory_space<vmem>>, vector<1x8x8xf32>
    tpu.vector_store %arg7[%c0_44, %c0_45, %c0_46], %36 {strides = array<i32>} : memref<1x80x8xf32, #tpu.memory_space<vmem>>, vector<1x8x8xf32>,
    %c0_47 = arith.constant 0 : index
    %c72 = arith.constant 72 : index
    %c0_48 = arith.constant 0 : index
    %38 = vector.load %arg7[%c0_47, %c72, %c0_48] : memref<1x80x8xf32, #tpu.memory_space<vmem>>, vector<1x8x8xf32>
    tpu.vector_store %arg7[%c0_47, %c72, %c0_48], %36 {strides = array<i32>} : memref<1x80x8xf32, #tpu.memory_space<vmem>>, vector<1x8x8xf32>,
    %c0_49 = arith.constant 0 : index
    %c8_50 = arith.constant 8 : index
    %c0_51 = arith.constant 0 : index
    %39 = vector.load %arg7[%c0_49, %c8_50, %c0_51] : memref<1x80x8xf32, #tpu.memory_space<vmem>>, vector<1x64x8xf32>
    tpu.vector_store %arg7[%c0_49, %c8_50, %c0_51], %35 {strides = array<i32>} : memref<1x80x8xf32, #tpu.memory_space<vmem>>, vector<1x64x8xf32>,
    %c0_52 = arith.constant 0 : index
    %c0_53 = arith.constant 0 : index
    %c0_54 = arith.constant 0 : index
    %40 = tpu.strided_load %arg7[%c0_52, %c0_53, %c0_54] {strides = array<i32: 1, 2, 1>} : memref<1x80x8xf32, #tpu.memory_space<vmem>>, vector<1x40x8xf32>
    %c0_55 = arith.constant 0 : index
    %c1_56 = arith.constant 1 : index
    %c0_57 = arith.constant 0 : index
    %41 = tpu.strided_load %arg7[%c0_55, %c1_56, %c0_57] {strides = array<i32: 1, 2, 1>} : memref<1x80x8xf32, #tpu.memory_space<vmem>>, vector<1x40x8xf32>
    %42 = vector.extract_strided_slice %40 {offsets = [0, 2, 0], sizes = [1, 32, 8], strides = [1, 1, 1]} : vector<1x40x8xf32> to vector<1x32x8xf32>
    %c0_58 = arith.constant 0 : index
    %c0_59 = arith.constant 0 : index
    %c0_60 = arith.constant 0 : index
    %43 = vector.load %arg15[%c0_58, %c0_59, %c0_60] : memref<1x32x72xf32, #tpu.memory_space<vmem>>, vector<1x32x8xf32>
    tpu.vector_store %arg15[%c0_58, %c0_59, %c0_60], %42 {strides = array<i32>} : memref<1x32x72xf32, #tpu.memory_space<vmem>>, vector<1x32x8xf32>,
    %44 = vector.extract_strided_slice %41 {offsets = [0, 2, 0], sizes = [1, 32, 8], strides = [1, 1, 1]} : vector<1x40x8xf32> to vector<1x32x8xf32>
    %c0_61 = arith.constant 0 : index
    %c0_62 = arith.constant 0 : index
    %c8_63 = arith.constant 8 : index
    %45 = vector.load %arg15[%c0_61, %c0_62, %c8_63] : memref<1x32x72xf32, #tpu.memory_space<vmem>>, vector<1x32x8xf32>
    tpu.vector_store %arg15[%c0_61, %c0_62, %c8_63], %44 {strides = array<i32>} : memref<1x32x72xf32, #tpu.memory_space<vmem>>, vector<1x32x8xf32>,
    %46 = vector.extract_strided_slice %40 {offsets = [0, 3, 0], sizes = [1, 32, 8], strides = [1, 1, 1]} : vector<1x40x8xf32> to vector<1x32x8xf32>
    %c0_64 = arith.constant 0 : index
    %c0_65 = arith.constant 0 : index
    %c16_66 = arith.constant 16 : index
    %47 = vector.load %arg15[%c0_64, %c0_65, %c16_66] : memref<1x32x72xf32, #tpu.memory_space<vmem>>, vector<1x32x8xf32>
    tpu.vector_store %arg15[%c0_64, %c0_65, %c16_66], %46 {strides = array<i32>} : memref<1x32x72xf32, #tpu.memory_space<vmem>>, vector<1x32x8xf32>,
    %48 = vector.extract_strided_slice %41 {offsets = [0, 3, 0], sizes = [1, 32, 8], strides = [1, 1, 1]} : vector<1x40x8xf32> to vector<1x32x8xf32>
    %c0_67 = arith.constant 0 : index
    %c0_68 = arith.constant 0 : index
    %c24_69 = arith.constant 24 : index
    %49 = vector.load %arg15[%c0_67, %c0_68, %c24_69] : memref<1x32x72xf32, #tpu.memory_space<vmem>>, vector<1x32x8xf32>
    tpu.vector_store %arg15[%c0_67, %c0_68, %c24_69], %48 {strides = array<i32>} : memref<1x32x72xf32, #tpu.memory_space<vmem>>, vector<1x32x8xf32>,
    %50 = vector.extract_strided_slice %40 {offsets = [0, 4, 0], sizes = [1, 32, 8], strides = [1, 1, 1]} : vector<1x40x8xf32> to vector<1x32x8xf32>
    %c0_70 = arith.constant 0 : index
    %c0_71 = arith.constant 0 : index
    %c32_72 = arith.constant 32 : index
    %51 = vector.load %arg15[%c0_70, %c0_71, %c32_72] : memref<1x32x72xf32, #tpu.memory_space<vmem>>, vector<1x32x8xf32>
    tpu.vector_store %arg15[%c0_70, %c0_71, %c32_72], %50 {strides = array<i32>} : memref<1x32x72xf32, #tpu.memory_space<vmem>>, vector<1x32x8xf32>,
    %52 = vector.extract_strided_slice %41 {offsets = [0, 4, 0], sizes = [1, 32, 8], strides = [1, 1, 1]} : vector<1x40x8xf32> to vector<1x32x8xf32>
    %c0_73 = arith.constant 0 : index
    %c0_74 = arith.constant 0 : index
    %c40 = arith.constant 40 : index
    %53 = vector.load %arg15[%c0_73, %c0_74, %c40] : memref<1x32x72xf32, #tpu.memory_space<vmem>>, vector<1x32x8xf32>
    tpu.vector_store %arg15[%c0_73, %c0_74, %c40], %52 {strides = array<i32>} : memref<1x32x72xf32, #tpu.memory_space<vmem>>, vector<1x32x8xf32>,
    %54 = vector.extract_strided_slice %40 {offsets = [0, 5, 0], sizes = [1, 32, 8], strides = [1, 1, 1]} : vector<1x40x8xf32> to vector<1x32x8xf32>
    %c0_75 = arith.constant 0 : index
    %c0_76 = arith.constant 0 : index
    %c48 = arith.constant 48 : index
    %55 = vector.load %arg15[%c0_75, %c0_76, %c48] : memref<1x32x72xf32, #tpu.memory_space<vmem>>, vector<1x32x8xf32>
    tpu.vector_store %arg15[%c0_75, %c0_76, %c48], %54 {strides = array<i32>} : memref<1x32x72xf32, #tpu.memory_space<vmem>>, vector<1x32x8xf32>,
    %56 = vector.extract_strided_slice %41 {offsets = [0, 5, 0], sizes = [1, 32, 8], strides = [1, 1, 1]} : vector<1x40x8xf32> to vector<1x32x8xf32>
    %c0_77 = arith.constant 0 : index
    %c0_78 = arith.constant 0 : index
    %c56 = arith.constant 56 : index
    %57 = vector.load %arg15[%c0_77, %c0_78, %c56] : memref<1x32x72xf32, #tpu.memory_space<vmem>>, vector<1x32x8xf32>
    tpu.vector_store %arg15[%c0_77, %c0_78, %c56], %56 {strides = array<i32>} : memref<1x32x72xf32, #tpu.memory_space<vmem>>, vector<1x32x8xf32>,
    %58 = vector.extract_strided_slice %40 {offsets = [0, 6, 0], sizes = [1, 32, 8], strides = [1, 1, 1]} : vector<1x40x8xf32> to vector<1x32x8xf32>
    %c0_79 = arith.constant 0 : index
    %c0_80 = arith.constant 0 : index
    %c64 = arith.constant 64 : index
    %59 = vector.load %arg15[%c0_79, %c0_80, %c64] : memref<1x32x72xf32, #tpu.memory_space<vmem>>, vector<1x32x8xf32>
    tpu.vector_store %arg15[%c0_79, %c0_80, %c64], %58 {strides = array<i32>} : memref<1x32x72xf32, #tpu.memory_space<vmem>>, vector<1x32x8xf32>,
    %c0_81 = arith.constant 0 : index
    %c0_82 = arith.constant 0 : index
    %c0_83 = arith.constant 0 : index
    %60 = vector.load %arg15[%c0_81, %c0_82, %c0_83] : memref<1x32x72xf32, #tpu.memory_space<vmem>>, vector<1x32x72xf32>
    %61 = vector.shape_cast %60 : vector<1x32x72xf32> to vector<32x72xf32>
    %c36 = arith.constant 36 : index
    %c0_84 = arith.constant 0 : index
    %62 = vector.load %arg2[%c36, %c0_84] : memref<2556x64xf32, #tpu.memory_space<vmem>>, vector<72x64xf32>
    %cst_85 = arith.constant dense<0.000000e+00> : vector<32x64xf32>
    %63 = tpu.matmul %61, %62, %cst_85 {dimension_numbers = #tpu.dot_dimension_numbers<[1], [0], [0], [1], [0, 0, 1, 1], [], []>} : vector<32x72xf32>, vector<72x64xf32>, vector<32x64xf32> -> vector<32x64xf32>
    %c1_86 = arith.constant 1 : index
    %c0_87 = arith.constant 0 : index
    %64 = vector.load %arg3[%c1_86, %c0_87] : memref<8x64xf32, #tpu.memory_space<vmem>>, vector<1x64xf32>
    %65 = vector.broadcast %64 : vector<1x64xf32> to vector<32x64xf32>
    %66 = arith.addf %63, %65 : vector<32x64xf32>
    %cst_88 = arith.constant 0.000000e+00 : f32
    %67 = vector.broadcast %cst_88 : f32 to vector<32x64xf32>
    %68 = arith.maximumf %66, %67 : vector<32x64xf32>
    %69 = vector.shape_cast %68 : vector<32x64xf32> to vector<1x32x64xf32>
    %70 = vector.extract_strided_slice %69 {offsets = [0, 0, 0], sizes = [1, 32, 16], strides = [1, 1, 1]} : vector<1x32x64xf32> to vector<1x32x16xf32>
    %cst_89 = arith.constant 0.000000e+00 : f32
    %71 = vector.broadcast %cst_89 : f32 to vector<1x8x16xf32>
    %c0_90 = arith.constant 0 : index
    %c0_91 = arith.constant 0 : index
    %c0_92 = arith.constant 0 : index
    %72 = vector.load %arg8[%c0_90, %c0_91, %c0_92] : memref<1x48x16xf32, #tpu.memory_space<vmem>>, vector<1x8x16xf32>
    tpu.vector_store %arg8[%c0_90, %c0_91, %c0_92], %71 {strides = array<i32>} : memref<1x48x16xf32, #tpu.memory_space<vmem>>, vector<1x8x16xf32>,
    %c0_93 = arith.constant 0 : index
    %c40_94 = arith.constant 40 : index
    %c0_95 = arith.constant 0 : index
    %73 = vector.load %arg8[%c0_93, %c40_94, %c0_95] : memref<1x48x16xf32, #tpu.memory_space<vmem>>, vector<1x8x16xf32>
    tpu.vector_store %arg8[%c0_93, %c40_94, %c0_95], %71 {strides = array<i32>} : memref<1x48x16xf32, #tpu.memory_space<vmem>>, vector<1x8x16xf32>,
    %c0_96 = arith.constant 0 : index
    %c8_97 = arith.constant 8 : index
    %c0_98 = arith.constant 0 : index
    %74 = vector.load %arg8[%c0_96, %c8_97, %c0_98] : memref<1x48x16xf32, #tpu.memory_space<vmem>>, vector<1x32x16xf32>
    tpu.vector_store %arg8[%c0_96, %c8_97, %c0_98], %70 {strides = array<i32>} : memref<1x48x16xf32, #tpu.memory_space<vmem>>, vector<1x32x16xf32>,
    %c0_99 = arith.constant 0 : index
    %c0_100 = arith.constant 0 : index
    %c0_101 = arith.constant 0 : index
    %75 = tpu.strided_load %arg8[%c0_99, %c0_100, %c0_101] {strides = array<i32: 1, 2, 1>} : memref<1x48x16xf32, #tpu.memory_space<vmem>>, vector<1x24x16xf32>
    %c0_102 = arith.constant 0 : index
    %c1_103 = arith.constant 1 : index
    %c0_104 = arith.constant 0 : index
    %76 = tpu.strided_load %arg8[%c0_102, %c1_103, %c0_104] {strides = array<i32: 1, 2, 1>} : memref<1x48x16xf32, #tpu.memory_space<vmem>>, vector<1x24x16xf32>
    %77 = vector.extract_strided_slice %75 {offsets = [0, 2, 0], sizes = [1, 16, 16], strides = [1, 1, 1]} : vector<1x24x16xf32> to vector<1x16x16xf32>
    %c0_105 = arith.constant 0 : index
    %c0_106 = arith.constant 0 : index
    %c0_107 = arith.constant 0 : index
    %78 = vector.load %arg16[%c0_105, %c0_106, %c0_107] : memref<1x16x144xf32, #tpu.memory_space<vmem>>, vector<1x16x16xf32>
    tpu.vector_store %arg16[%c0_105, %c0_106, %c0_107], %77 {strides = array<i32>} : memref<1x16x144xf32, #tpu.memory_space<vmem>>, vector<1x16x16xf32>,
    %79 = vector.extract_strided_slice %76 {offsets = [0, 2, 0], sizes = [1, 16, 16], strides = [1, 1, 1]} : vector<1x24x16xf32> to vector<1x16x16xf32>
    %c0_108 = arith.constant 0 : index
    %c0_109 = arith.constant 0 : index
    %c16_110 = arith.constant 16 : index
    %80 = vector.load %arg16[%c0_108, %c0_109, %c16_110] : memref<1x16x144xf32, #tpu.memory_space<vmem>>, vector<1x16x16xf32>
    tpu.vector_store %arg16[%c0_108, %c0_109, %c16_110], %79 {strides = array<i32>} : memref<1x16x144xf32, #tpu.memory_space<vmem>>, vector<1x16x16xf32>,
    %81 = vector.extract_strided_slice %75 {offsets = [0, 3, 0], sizes = [1, 16, 16], strides = [1, 1, 1]} : vector<1x24x16xf32> to vector<1x16x16xf32>
    %c0_111 = arith.constant 0 : index
    %c0_112 = arith.constant 0 : index
    %c32_113 = arith.constant 32 : index
    %82 = vector.load %arg16[%c0_111, %c0_112, %c32_113] : memref<1x16x144xf32, #tpu.memory_space<vmem>>, vector<1x16x16xf32>
    tpu.vector_store %arg16[%c0_111, %c0_112, %c32_113], %81 {strides = array<i32>} : memref<1x16x144xf32, #tpu.memory_space<vmem>>, vector<1x16x16xf32>,
    %83 = vector.extract_strided_slice %76 {offsets = [0, 3, 0], sizes = [1, 16, 16], strides = [1, 1, 1]} : vector<1x24x16xf32> to vector<1x16x16xf32>
    %c0_114 = arith.constant 0 : index
    %c0_115 = arith.constant 0 : index
    %c48_116 = arith.constant 48 : index
    %84 = vector.load %arg16[%c0_114, %c0_115, %c48_116] : memref<1x16x144xf32, #tpu.memory_space<vmem>>, vector<1x16x16xf32>
    tpu.vector_store %arg16[%c0_114, %c0_115, %c48_116], %83 {strides = array<i32>} : memref<1x16x144xf32, #tpu.memory_space<vmem>>, vector<1x16x16xf32>,
    %85 = vector.extract_strided_slice %75 {offsets = [0, 4, 0], sizes = [1, 16, 16], strides = [1, 1, 1]} : vector<1x24x16xf32> to vector<1x16x16xf32>
    %c0_117 = arith.constant 0 : index
    %c0_118 = arith.constant 0 : index
    %c64_119 = arith.constant 64 : index
    %86 = vector.load %arg16[%c0_117, %c0_118, %c64_119] : memref<1x16x144xf32, #tpu.memory_space<vmem>>, vector<1x16x16xf32>
    tpu.vector_store %arg16[%c0_117, %c0_118, %c64_119], %85 {strides = array<i32>} : memref<1x16x144xf32, #tpu.memory_space<vmem>>, vector<1x16x16xf32>,
    %87 = vector.extract_strided_slice %76 {offsets = [0, 4, 0], sizes = [1, 16, 16], strides = [1, 1, 1]} : vector<1x24x16xf32> to vector<1x16x16xf32>
    %c0_120 = arith.constant 0 : index
    %c0_121 = arith.constant 0 : index
    %c80 = arith.constant 80 : index
    %88 = vector.load %arg16[%c0_120, %c0_121, %c80] : memref<1x16x144xf32, #tpu.memory_space<vmem>>, vector<1x16x16xf32>
    tpu.vector_store %arg16[%c0_120, %c0_121, %c80], %87 {strides = array<i32>} : memref<1x16x144xf32, #tpu.memory_space<vmem>>, vector<1x16x16xf32>,
    %89 = vector.extract_strided_slice %75 {offsets = [0, 5, 0], sizes = [1, 16, 16], strides = [1, 1, 1]} : vector<1x24x16xf32> to vector<1x16x16xf32>
    %c0_122 = arith.constant 0 : index
    %c0_123 = arith.constant 0 : index
    %c96 = arith.constant 96 : index
    %90 = vector.load %arg16[%c0_122, %c0_123, %c96] : memref<1x16x144xf32, #tpu.memory_space<vmem>>, vector<1x16x16xf32>
    tpu.vector_store %arg16[%c0_122, %c0_123, %c96], %89 {strides = array<i32>} : memref<1x16x144xf32, #tpu.memory_space<vmem>>, vector<1x16x16xf32>,
    %91 = vector.extract_strided_slice %76 {offsets = [0, 5, 0], sizes = [1, 16, 16], strides = [1, 1, 1]} : vector<1x24x16xf32> to vector<1x16x16xf32>
    %c0_124 = arith.constant 0 : index
    %c0_125 = arith.constant 0 : index
    %c112 = arith.constant 112 : index
    %92 = vector.load %arg16[%c0_124, %c0_125, %c112] : memref<1x16x144xf32, #tpu.memory_space<vmem>>, vector<1x16x16xf32>
    tpu.vector_store %arg16[%c0_124, %c0_125, %c112], %91 {strides = array<i32>} : memref<1x16x144xf32, #tpu.memory_space<vmem>>, vector<1x16x16xf32>,
    %93 = vector.extract_strided_slice %75 {offsets = [0, 6, 0], sizes = [1, 16, 16], strides = [1, 1, 1]} : vector<1x24x16xf32> to vector<1x16x16xf32>
    %c0_126 = arith.constant 0 : index
    %c0_127 = arith.constant 0 : index
    %c128 = arith.constant 128 : index
    %94 = vector.load %arg16[%c0_126, %c0_127, %c128] : memref<1x16x144xf32, #tpu.memory_space<vmem>>, vector<1x16x16xf32>
    tpu.vector_store %arg16[%c0_126, %c0_127, %c128], %93 {strides = array<i32>} : memref<1x16x144xf32, #tpu.memory_space<vmem>>, vector<1x16x16xf32>,
    %c0_128 = arith.constant 0 : index
    %c0_129 = arith.constant 0 : index
    %c0_130 = arith.constant 0 : index
    %95 = vector.load %arg16[%c0_128, %c0_129, %c0_130] : memref<1x16x144xf32, #tpu.memory_space<vmem>>, vector<1x16x144xf32>
    %96 = vector.shape_cast %95 : vector<1x16x144xf32> to vector<16x144xf32>
    %c108 = arith.constant 108 : index
    %c0_131 = arith.constant 0 : index
    %97 = vector.load %arg2[%c108, %c0_131] : memref<2556x64xf32, #tpu.memory_space<vmem>>, vector<144x64xf32>
    %cst_132 = arith.constant dense<0.000000e+00> : vector<16x64xf32>
    %98 = tpu.matmul %96, %97, %cst_132 {dimension_numbers = #tpu.dot_dimension_numbers<[1], [0], [0], [1], [0, 0, 1, 1], [], []>} : vector<16x144xf32>, vector<144x64xf32>, vector<16x64xf32> -> vector<16x64xf32>
    %c2 = arith.constant 2 : index
    %c0_133 = arith.constant 0 : index
    %99 = vector.load %arg3[%c2, %c0_133] : memref<8x64xf32, #tpu.memory_space<vmem>>, vector<1x64xf32>
    %100 = vector.broadcast %99 : vector<1x64xf32> to vector<16x64xf32>
    %101 = arith.addf %98, %100 : vector<16x64xf32>
    %cst_134 = arith.constant 0.000000e+00 : f32
    %102 = vector.broadcast %cst_134 : f32 to vector<16x64xf32>
    %103 = arith.maximumf %101, %102 : vector<16x64xf32>
    %104 = vector.shape_cast %103 : vector<16x64xf32> to vector<1x16x64xf32>
    %105 = vector.extract_strided_slice %104 {offsets = [0, 0, 0], sizes = [1, 16, 32], strides = [1, 1, 1]} : vector<1x16x64xf32> to vector<1x16x32xf32>
    %cst_135 = arith.constant 0.000000e+00 : f32
    %106 = vector.broadcast %cst_135 : f32 to vector<1x8x32xf32>
    %c0_136 = arith.constant 0 : index
    %c0_137 = arith.constant 0 : index
    %c0_138 = arith.constant 0 : index
    %107 = vector.load %arg9[%c0_136, %c0_137, %c0_138] : memref<1x32x32xf32, #tpu.memory_space<vmem>>, vector<1x8x32xf32>
    tpu.vector_store %arg9[%c0_136, %c0_137, %c0_138], %106 {strides = array<i32>} : memref<1x32x32xf32, #tpu.memory_space<vmem>>, vector<1x8x32xf32>,
    %c0_139 = arith.constant 0 : index
    %c24_140 = arith.constant 24 : index
    %c0_141 = arith.constant 0 : index
    %108 = vector.load %arg9[%c0_139, %c24_140, %c0_141] : memref<1x32x32xf32, #tpu.memory_space<vmem>>, vector<1x8x32xf32>
    tpu.vector_store %arg9[%c0_139, %c24_140, %c0_141], %106 {strides = array<i32>} : memref<1x32x32xf32, #tpu.memory_space<vmem>>, vector<1x8x32xf32>,
    %c0_142 = arith.constant 0 : index
    %c8_143 = arith.constant 8 : index
    %c0_144 = arith.constant 0 : index
    %109 = vector.load %arg9[%c0_142, %c8_143, %c0_144] : memref<1x32x32xf32, #tpu.memory_space<vmem>>, vector<1x16x32xf32>
    tpu.vector_store %arg9[%c0_142, %c8_143, %c0_144], %105 {strides = array<i32>} : memref<1x32x32xf32, #tpu.memory_space<vmem>>, vector<1x16x32xf32>,
    %c0_145 = arith.constant 0 : index
    %c4_146 = arith.constant 4 : index
    %c0_147 = arith.constant 0 : index
    %110 = vector.load %arg9[%c0_145, %c4_146, %c0_147] : memref<1x32x32xf32, #tpu.memory_space<vmem>>, vector<1x16x32xf32>
    %c0_148 = arith.constant 0 : index
    %c0_149 = arith.constant 0 : index
    %c0_150 = arith.constant 0 : index
    %111 = vector.load %arg17[%c0_148, %c0_149, %c0_150] : memref<1x16x288xf32, #tpu.memory_space<vmem>>, vector<1x16x32xf32>
    tpu.vector_store %arg17[%c0_148, %c0_149, %c0_150], %110 {strides = array<i32>} : memref<1x16x288xf32, #tpu.memory_space<vmem>>, vector<1x16x32xf32>,
    %c0_151 = arith.constant 0 : index
    %c5 = arith.constant 5 : index
    %c0_152 = arith.constant 0 : index
    %112 = vector.load %arg9[%c0_151, %c5, %c0_152] : memref<1x32x32xf32, #tpu.memory_space<vmem>>, vector<1x16x32xf32>
    %c0_153 = arith.constant 0 : index
    %c0_154 = arith.constant 0 : index
    %c32_155 = arith.constant 32 : index
    %113 = vector.load %arg17[%c0_153, %c0_154, %c32_155] : memref<1x16x288xf32, #tpu.memory_space<vmem>>, vector<1x16x32xf32>
    tpu.vector_store %arg17[%c0_153, %c0_154, %c32_155], %112 {strides = array<i32>} : memref<1x16x288xf32, #tpu.memory_space<vmem>>, vector<1x16x32xf32>,
    %c0_156 = arith.constant 0 : index
    %c6 = arith.constant 6 : index
    %c0_157 = arith.constant 0 : index
    %114 = vector.load %arg9[%c0_156, %c6, %c0_157] : memref<1x32x32xf32, #tpu.memory_space<vmem>>, vector<1x16x32xf32>
    %c0_158 = arith.constant 0 : index
    %c0_159 = arith.constant 0 : index
    %c64_160 = arith.constant 64 : index
    %115 = vector.load %arg17[%c0_158, %c0_159, %c64_160] : memref<1x16x288xf32, #tpu.memory_space<vmem>>, vector<1x16x32xf32>
    tpu.vector_store %arg17[%c0_158, %c0_159, %c64_160], %114 {strides = array<i32>} : memref<1x16x288xf32, #tpu.memory_space<vmem>>, vector<1x16x32xf32>,
    %c0_161 = arith.constant 0 : index
    %c7 = arith.constant 7 : index
    %c0_162 = arith.constant 0 : index
    %116 = vector.load %arg9[%c0_161, %c7, %c0_162] : memref<1x32x32xf32, #tpu.memory_space<vmem>>, vector<1x16x32xf32>
    %c0_163 = arith.constant 0 : index
    %c0_164 = arith.constant 0 : index
    %c96_165 = arith.constant 96 : index
    %117 = vector.load %arg17[%c0_163, %c0_164, %c96_165] : memref<1x16x288xf32, #tpu.memory_space<vmem>>, vector<1x16x32xf32>
    tpu.vector_store %arg17[%c0_163, %c0_164, %c96_165], %116 {strides = array<i32>} : memref<1x16x288xf32, #tpu.memory_space<vmem>>, vector<1x16x32xf32>,
    %c0_166 = arith.constant 0 : index
    %c8_167 = arith.constant 8 : index
    %c0_168 = arith.constant 0 : index
    %118 = vector.load %arg9[%c0_166, %c8_167, %c0_168] : memref<1x32x32xf32, #tpu.memory_space<vmem>>, vector<1x16x32xf32>
    %c0_169 = arith.constant 0 : index
    %c0_170 = arith.constant 0 : index
    %c128_171 = arith.constant 128 : index
    %119 = vector.load %arg17[%c0_169, %c0_170, %c128_171] : memref<1x16x288xf32, #tpu.memory_space<vmem>>, vector<1x16x32xf32>
    tpu.vector_store %arg17[%c0_169, %c0_170, %c128_171], %118 {strides = array<i32>} : memref<1x16x288xf32, #tpu.memory_space<vmem>>, vector<1x16x32xf32>,
    %c0_172 = arith.constant 0 : index
    %c9 = arith.constant 9 : index
    %c0_173 = arith.constant 0 : index
    %120 = vector.load %arg9[%c0_172, %c9, %c0_173] : memref<1x32x32xf32, #tpu.memory_space<vmem>>, vector<1x16x32xf32>
    %c0_174 = arith.constant 0 : index
    %c0_175 = arith.constant 0 : index
    %c160 = arith.constant 160 : index
    %121 = vector.load %arg17[%c0_174, %c0_175, %c160] : memref<1x16x288xf32, #tpu.memory_space<vmem>>, vector<1x16x32xf32>
    tpu.vector_store %arg17[%c0_174, %c0_175, %c160], %120 {strides = array<i32>} : memref<1x16x288xf32, #tpu.memory_space<vmem>>, vector<1x16x32xf32>,
    %c0_176 = arith.constant 0 : index
    %c10 = arith.constant 10 : index
    %c0_177 = arith.constant 0 : index
    %122 = vector.load %arg9[%c0_176, %c10, %c0_177] : memref<1x32x32xf32, #tpu.memory_space<vmem>>, vector<1x16x32xf32>
    %c0_178 = arith.constant 0 : index
    %c0_179 = arith.constant 0 : index
    %c192 = arith.constant 192 : index
    %123 = vector.load %arg17[%c0_178, %c0_179, %c192] : memref<1x16x288xf32, #tpu.memory_space<vmem>>, vector<1x16x32xf32>
    tpu.vector_store %arg17[%c0_178, %c0_179, %c192], %122 {strides = array<i32>} : memref<1x16x288xf32, #tpu.memory_space<vmem>>, vector<1x16x32xf32>,
    %c0_180 = arith.constant 0 : index
    %c11 = arith.constant 11 : index
    %c0_181 = arith.constant 0 : index
    %124 = vector.load %arg9[%c0_180, %c11, %c0_181] : memref<1x32x32xf32, #tpu.memory_space<vmem>>, vector<1x16x32xf32>
    %c0_182 = arith.constant 0 : index
    %c0_183 = arith.constant 0 : index
    %c224 = arith.constant 224 : index
    %125 = vector.load %arg17[%c0_182, %c0_183, %c224] : memref<1x16x288xf32, #tpu.memory_space<vmem>>, vector<1x16x32xf32>
    tpu.vector_store %arg17[%c0_182, %c0_183, %c224], %124 {strides = array<i32>} : memref<1x16x288xf32, #tpu.memory_space<vmem>>, vector<1x16x32xf32>,
    %c0_184 = arith.constant 0 : index
    %c12_185 = arith.constant 12 : index
    %c0_186 = arith.constant 0 : index
    %126 = vector.load %arg9[%c0_184, %c12_185, %c0_186] : memref<1x32x32xf32, #tpu.memory_space<vmem>>, vector<1x16x32xf32>
    %c0_187 = arith.constant 0 : index
    %c0_188 = arith.constant 0 : index
    %c256 = arith.constant 256 : index
    %127 = vector.load %arg17[%c0_187, %c0_188, %c256] : memref<1x16x288xf32, #tpu.memory_space<vmem>>, vector<1x16x32xf32>
    tpu.vector_store %arg17[%c0_187, %c0_188, %c256], %126 {strides = array<i32>} : memref<1x16x288xf32, #tpu.memory_space<vmem>>, vector<1x16x32xf32>,
    %c0_189 = arith.constant 0 : index
    %c0_190 = arith.constant 0 : index
    %c0_191 = arith.constant 0 : index
    %128 = vector.load %arg17[%c0_189, %c0_190, %c0_191] : memref<1x16x288xf32, #tpu.memory_space<vmem>>, vector<1x16x288xf32>
    %129 = vector.shape_cast %128 : vector<1x16x288xf32> to vector<16x288xf32>
    %c252 = arith.constant 252 : index
    %c0_192 = arith.constant 0 : index
    %130 = vector.load %arg2[%c252, %c0_192] : memref<2556x64xf32, #tpu.memory_space<vmem>>, vector<288x64xf32>
    %cst_193 = arith.constant dense<0.000000e+00> : vector<16x64xf32>
    %131 = tpu.matmul %129, %130, %cst_193 {dimension_numbers = #tpu.dot_dimension_numbers<[1], [0], [0], [1], [0, 0, 1, 1], [], []>} : vector<16x288xf32>, vector<288x64xf32>, vector<16x64xf32> -> vector<16x64xf32>
    %c3 = arith.constant 3 : index
    %c0_194 = arith.constant 0 : index
    %132 = vector.load %arg3[%c3, %c0_194] : memref<8x64xf32, #tpu.memory_space<vmem>>, vector<1x64xf32>
    %133 = vector.broadcast %132 : vector<1x64xf32> to vector<16x64xf32>
    %134 = arith.addf %131, %133 : vector<16x64xf32>
    %cst_195 = arith.constant 0.000000e+00 : f32
    %135 = vector.broadcast %cst_195 : f32 to vector<16x64xf32>
    %136 = arith.maximumf %134, %135 : vector<16x64xf32>
    %137 = vector.shape_cast %136 : vector<16x64xf32> to vector<1x16x64xf32>
    %138 = vector.extract_strided_slice %137 {offsets = [0, 0, 0], sizes = [1, 16, 32], strides = [1, 1, 1]} : vector<1x16x64xf32> to vector<1x16x32xf32>
    %cst_196 = arith.constant 0.000000e+00 : f32
    %139 = vector.broadcast %cst_196 : f32 to vector<1x8x32xf32>
    %c0_197 = arith.constant 0 : index
    %c0_198 = arith.constant 0 : index
    %c0_199 = arith.constant 0 : index
    %140 = vector.load %arg10[%c0_197, %c0_198, %c0_199] : memref<1x32x32xf32, #tpu.memory_space<vmem>>, vector<1x8x32xf32>
    tpu.vector_store %arg10[%c0_197, %c0_198, %c0_199], %139 {strides = array<i32>} : memref<1x32x32xf32, #tpu.memory_space<vmem>>, vector<1x8x32xf32>,
    %c0_200 = arith.constant 0 : index
    %c24_201 = arith.constant 24 : index
    %c0_202 = arith.constant 0 : index
    %141 = vector.load %arg10[%c0_200, %c24_201, %c0_202] : memref<1x32x32xf32, #tpu.memory_space<vmem>>, vector<1x8x32xf32>
    tpu.vector_store %arg10[%c0_200, %c24_201, %c0_202], %139 {strides = array<i32>} : memref<1x32x32xf32, #tpu.memory_space<vmem>>, vector<1x8x32xf32>,
    %c0_203 = arith.constant 0 : index
    %c8_204 = arith.constant 8 : index
    %c0_205 = arith.constant 0 : index
    %142 = vector.load %arg10[%c0_203, %c8_204, %c0_205] : memref<1x32x32xf32, #tpu.memory_space<vmem>>, vector<1x16x32xf32>
    tpu.vector_store %arg10[%c0_203, %c8_204, %c0_205], %138 {strides = array<i32>} : memref<1x32x32xf32, #tpu.memory_space<vmem>>, vector<1x16x32xf32>,
    %c0_206 = arith.constant 0 : index
    %c0_207 = arith.constant 0 : index
    %c0_208 = arith.constant 0 : index
    %143 = tpu.strided_load %arg10[%c0_206, %c0_207, %c0_208] {strides = array<i32: 1, 2, 1>} : memref<1x32x32xf32, #tpu.memory_space<vmem>>, vector<1x16x32xf32>
    %c0_209 = arith.constant 0 : index
    %c1_210 = arith.constant 1 : index
    %c0_211 = arith.constant 0 : index
    %144 = tpu.strided_load %arg10[%c0_209, %c1_210, %c0_211] {strides = array<i32: 1, 2, 1>} : memref<1x32x32xf32, #tpu.memory_space<vmem>>, vector<1x16x32xf32>
    %145 = vector.extract_strided_slice %143 {offsets = [0, 2, 0], sizes = [1, 8, 32], strides = [1, 1, 1]} : vector<1x16x32xf32> to vector<1x8x32xf32>
    %c0_212 = arith.constant 0 : index
    %c0_213 = arith.constant 0 : index
    %c0_214 = arith.constant 0 : index
    %146 = vector.load %arg18[%c0_212, %c0_213, %c0_214] : memref<1x8x288xf32, #tpu.memory_space<vmem>>, vector<1x8x32xf32>
    tpu.vector_store %arg18[%c0_212, %c0_213, %c0_214], %145 {strides = array<i32>} : memref<1x8x288xf32, #tpu.memory_space<vmem>>, vector<1x8x32xf32>,
    %147 = vector.extract_strided_slice %144 {offsets = [0, 2, 0], sizes = [1, 8, 32], strides = [1, 1, 1]} : vector<1x16x32xf32> to vector<1x8x32xf32>
    %c0_215 = arith.constant 0 : index
    %c0_216 = arith.constant 0 : index
    %c32_217 = arith.constant 32 : index
    %148 = vector.load %arg18[%c0_215, %c0_216, %c32_217] : memref<1x8x288xf32, #tpu.memory_space<vmem>>, vector<1x8x32xf32>
    tpu.vector_store %arg18[%c0_215, %c0_216, %c32_217], %147 {strides = array<i32>} : memref<1x8x288xf32, #tpu.memory_space<vmem>>, vector<1x8x32xf32>,
    %149 = vector.extract_strided_slice %143 {offsets = [0, 3, 0], sizes = [1, 8, 32], strides = [1, 1, 1]} : vector<1x16x32xf32> to vector<1x8x32xf32>
    %c0_218 = arith.constant 0 : index
    %c0_219 = arith.constant 0 : index
    %c64_220 = arith.constant 64 : index
    %150 = vector.load %arg18[%c0_218, %c0_219, %c64_220] : memref<1x8x288xf32, #tpu.memory_space<vmem>>, vector<1x8x32xf32>
    tpu.vector_store %arg18[%c0_218, %c0_219, %c64_220], %149 {strides = array<i32>} : memref<1x8x288xf32, #tpu.memory_space<vmem>>, vector<1x8x32xf32>,
    %151 = vector.extract_strided_slice %144 {offsets = [0, 3, 0], sizes = [1, 8, 32], strides = [1, 1, 1]} : vector<1x16x32xf32> to vector<1x8x32xf32>
    %c0_221 = arith.constant 0 : index
    %c0_222 = arith.constant 0 : index
    %c96_223 = arith.constant 96 : index
    %152 = vector.load %arg18[%c0_221, %c0_222, %c96_223] : memref<1x8x288xf32, #tpu.memory_space<vmem>>, vector<1x8x32xf32>
    tpu.vector_store %arg18[%c0_221, %c0_222, %c96_223], %151 {strides = array<i32>} : memref<1x8x288xf32, #tpu.memory_space<vmem>>, vector<1x8x32xf32>,
    %153 = vector.extract_strided_slice %143 {offsets = [0, 4, 0], sizes = [1, 8, 32], strides = [1, 1, 1]} : vector<1x16x32xf32> to vector<1x8x32xf32>
    %c0_224 = arith.constant 0 : index
    %c0_225 = arith.constant 0 : index
    %c128_226 = arith.constant 128 : index
    %154 = vector.load %arg18[%c0_224, %c0_225, %c128_226] : memref<1x8x288xf32, #tpu.memory_space<vmem>>, vector<1x8x32xf32>
    tpu.vector_store %arg18[%c0_224, %c0_225, %c128_226], %153 {strides = array<i32>} : memref<1x8x288xf32, #tpu.memory_space<vmem>>, vector<1x8x32xf32>,
    %155 = vector.extract_strided_slice %144 {offsets = [0, 4, 0], sizes = [1, 8, 32], strides = [1, 1, 1]} : vector<1x16x32xf32> to vector<1x8x32xf32>
    %c0_227 = arith.constant 0 : index
    %c0_228 = arith.constant 0 : index
    %c160_229 = arith.constant 160 : index
    %156 = vector.load %arg18[%c0_227, %c0_228, %c160_229] : memref<1x8x288xf32, #tpu.memory_space<vmem>>, vector<1x8x32xf32>
    tpu.vector_store %arg18[%c0_227, %c0_228, %c160_229], %155 {strides = array<i32>} : memref<1x8x288xf32, #tpu.memory_space<vmem>>, vector<1x8x32xf32>,
    %157 = vector.extract_strided_slice %143 {offsets = [0, 5, 0], sizes = [1, 8, 32], strides = [1, 1, 1]} : vector<1x16x32xf32> to vector<1x8x32xf32>
    %c0_230 = arith.constant 0 : index
    %c0_231 = arith.constant 0 : index
    %c192_232 = arith.constant 192 : index
    %158 = vector.load %arg18[%c0_230, %c0_231, %c192_232] : memref<1x8x288xf32, #tpu.memory_space<vmem>>, vector<1x8x32xf32>
    tpu.vector_store %arg18[%c0_230, %c0_231, %c192_232], %157 {strides = array<i32>} : memref<1x8x288xf32, #tpu.memory_space<vmem>>, vector<1x8x32xf32>,
    %159 = vector.extract_strided_slice %144 {offsets = [0, 5, 0], sizes = [1, 8, 32], strides = [1, 1, 1]} : vector<1x16x32xf32> to vector<1x8x32xf32>
    %c0_233 = arith.constant 0 : index
    %c0_234 = arith.constant 0 : index
    %c224_235 = arith.constant 224 : index
    %160 = vector.load %arg18[%c0_233, %c0_234, %c224_235] : memref<1x8x288xf32, #tpu.memory_space<vmem>>, vector<1x8x32xf32>
    tpu.vector_store %arg18[%c0_233, %c0_234, %c224_235], %159 {strides = array<i32>} : memref<1x8x288xf32, #tpu.memory_space<vmem>>, vector<1x8x32xf32>,
    %161 = vector.extract_strided_slice %143 {offsets = [0, 6, 0], sizes = [1, 8, 32], strides = [1, 1, 1]} : vector<1x16x32xf32> to vector<1x8x32xf32>
    %c0_236 = arith.constant 0 : index
    %c0_237 = arith.constant 0 : index
    %c256_238 = arith.constant 256 : index
    %162 = vector.load %arg18[%c0_236, %c0_237, %c256_238] : memref<1x8x288xf32, #tpu.memory_space<vmem>>, vector<1x8x32xf32>
    tpu.vector_store %arg18[%c0_236, %c0_237, %c256_238], %161 {strides = array<i32>} : memref<1x8x288xf32, #tpu.memory_space<vmem>>, vector<1x8x32xf32>,
    %c0_239 = arith.constant 0 : index
    %c0_240 = arith.constant 0 : index
    %c0_241 = arith.constant 0 : index
    %163 = vector.load %arg18[%c0_239, %c0_240, %c0_241] : memref<1x8x288xf32, #tpu.memory_space<vmem>>, vector<1x8x288xf32>
    %164 = vector.shape_cast %163 : vector<1x8x288xf32> to vector<8x288xf32>
    %c540 = arith.constant 540 : index
    %c0_242 = arith.constant 0 : index
    %165 = vector.load %arg2[%c540, %c0_242] : memref<2556x64xf32, #tpu.memory_space<vmem>>, vector<288x64xf32>
    %cst_243 = arith.constant dense<0.000000e+00> : vector<8x64xf32>
    %166 = tpu.matmul %164, %165, %cst_243 {dimension_numbers = #tpu.dot_dimension_numbers<[1], [0], [0], [1], [0, 0, 1, 1], [], []>} : vector<8x288xf32>, vector<288x64xf32>, vector<8x64xf32> -> vector<8x64xf32>
    %c4_244 = arith.constant 4 : index
    %c0_245 = arith.constant 0 : index
    %167 = vector.load %arg3[%c4_244, %c0_245] : memref<8x64xf32, #tpu.memory_space<vmem>>, vector<1x64xf32>
    %168 = vector.broadcast %167 : vector<1x64xf32> to vector<8x64xf32>
    %169 = arith.addf %166, %168 : vector<8x64xf32>
    %cst_246 = arith.constant 0.000000e+00 : f32
    %170 = vector.broadcast %cst_246 : f32 to vector<8x64xf32>
    %171 = arith.maximumf %169, %170 : vector<8x64xf32>
    %172 = vector.shape_cast %171 : vector<8x64xf32> to vector<1x8x64xf32>
    %cst_247 = arith.constant 0.000000e+00 : f32
    %173 = vector.broadcast %cst_247 : f32 to vector<1x8x64xf32>
    %c0_248 = arith.constant 0 : index
    %c0_249 = arith.constant 0 : index
    %c0_250 = arith.constant 0 : index
    %174 = vector.load %arg11[%c0_248, %c0_249, %c0_250] : memref<1x24x64xf32, #tpu.memory_space<vmem>>, vector<1x8x64xf32>
    tpu.vector_store %arg11[%c0_248, %c0_249, %c0_250], %173 {strides = array<i32>} : memref<1x24x64xf32, #tpu.memory_space<vmem>>, vector<1x8x64xf32>,
    %c0_251 = arith.constant 0 : index
    %c16_252 = arith.constant 16 : index
    %c0_253 = arith.constant 0 : index
    %175 = vector.load %arg11[%c0_251, %c16_252, %c0_253] : memref<1x24x64xf32, #tpu.memory_space<vmem>>, vector<1x8x64xf32>
    tpu.vector_store %arg11[%c0_251, %c16_252, %c0_253], %173 {strides = array<i32>} : memref<1x24x64xf32, #tpu.memory_space<vmem>>, vector<1x8x64xf32>,
    %c0_254 = arith.constant 0 : index
    %c8_255 = arith.constant 8 : index
    %c0_256 = arith.constant 0 : index
    %176 = vector.load %arg11[%c0_254, %c8_255, %c0_256] : memref<1x24x64xf32, #tpu.memory_space<vmem>>, vector<1x8x64xf32>
    tpu.vector_store %arg11[%c0_254, %c8_255, %c0_256], %172 {strides = array<i32>} : memref<1x24x64xf32, #tpu.memory_space<vmem>>, vector<1x8x64xf32>,
    %c0_257 = arith.constant 0 : index
    %c4_258 = arith.constant 4 : index
    %c0_259 = arith.constant 0 : index
    %177 = vector.load %arg11[%c0_257, %c4_258, %c0_259] : memref<1x24x64xf32, #tpu.memory_space<vmem>>, vector<1x8x64xf32>
    %c0_260 = arith.constant 0 : index
    %c0_261 = arith.constant 0 : index
    %c0_262 = arith.constant 0 : index
    %178 = vector.load %arg19[%c0_260, %c0_261, %c0_262] : memref<1x8x576xf32, #tpu.memory_space<vmem>>, vector<1x8x64xf32>
    tpu.vector_store %arg19[%c0_260, %c0_261, %c0_262], %177 {strides = array<i32>} : memref<1x8x576xf32, #tpu.memory_space<vmem>>, vector<1x8x64xf32>,
    %c0_263 = arith.constant 0 : index
    %c5_264 = arith.constant 5 : index
    %c0_265 = arith.constant 0 : index
    %179 = vector.load %arg11[%c0_263, %c5_264, %c0_265] : memref<1x24x64xf32, #tpu.memory_space<vmem>>, vector<1x8x64xf32>
    %c0_266 = arith.constant 0 : index
    %c0_267 = arith.constant 0 : index
    %c64_268 = arith.constant 64 : index
    %180 = vector.load %arg19[%c0_266, %c0_267, %c64_268] : memref<1x8x576xf32, #tpu.memory_space<vmem>>, vector<1x8x64xf32>
    tpu.vector_store %arg19[%c0_266, %c0_267, %c64_268], %179 {strides = array<i32>} : memref<1x8x576xf32, #tpu.memory_space<vmem>>, vector<1x8x64xf32>,
    %c0_269 = arith.constant 0 : index
    %c6_270 = arith.constant 6 : index
    %c0_271 = arith.constant 0 : index
    %181 = vector.load %arg11[%c0_269, %c6_270, %c0_271] : memref<1x24x64xf32, #tpu.memory_space<vmem>>, vector<1x8x64xf32>
    %c0_272 = arith.constant 0 : index
    %c0_273 = arith.constant 0 : index
    %c128_274 = arith.constant 128 : index
    %182 = vector.load %arg19[%c0_272, %c0_273, %c128_274] : memref<1x8x576xf32, #tpu.memory_space<vmem>>, vector<1x8x64xf32>
    tpu.vector_store %arg19[%c0_272, %c0_273, %c128_274], %181 {strides = array<i32>} : memref<1x8x576xf32, #tpu.memory_space<vmem>>, vector<1x8x64xf32>,
    %c0_275 = arith.constant 0 : index
    %c7_276 = arith.constant 7 : index
    %c0_277 = arith.constant 0 : index
    %183 = vector.load %arg11[%c0_275, %c7_276, %c0_277] : memref<1x24x64xf32, #tpu.memory_space<vmem>>, vector<1x8x64xf32>
    %c0_278 = arith.constant 0 : index
    %c0_279 = arith.constant 0 : index
    %c192_280 = arith.constant 192 : index
    %184 = vector.load %arg19[%c0_278, %c0_279, %c192_280] : memref<1x8x576xf32, #tpu.memory_space<vmem>>, vector<1x8x64xf32>
    tpu.vector_store %arg19[%c0_278, %c0_279, %c192_280], %183 {strides = array<i32>} : memref<1x8x576xf32, #tpu.memory_space<vmem>>, vector<1x8x64xf32>,
    %c0_281 = arith.constant 0 : index
    %c8_282 = arith.constant 8 : index
    %c0_283 = arith.constant 0 : index
    %185 = vector.load %arg11[%c0_281, %c8_282, %c0_283] : memref<1x24x64xf32, #tpu.memory_space<vmem>>, vector<1x8x64xf32>
    %c0_284 = arith.constant 0 : index
    %c0_285 = arith.constant 0 : index
    %c256_286 = arith.constant 256 : index
    %186 = vector.load %arg19[%c0_284, %c0_285, %c256_286] : memref<1x8x576xf32, #tpu.memory_space<vmem>>, vector<1x8x64xf32>
    tpu.vector_store %arg19[%c0_284, %c0_285, %c256_286], %185 {strides = array<i32>} : memref<1x8x576xf32, #tpu.memory_space<vmem>>, vector<1x8x64xf32>,
    %c0_287 = arith.constant 0 : index
    %c9_288 = arith.constant 9 : index
    %c0_289 = arith.constant 0 : index
    %187 = vector.load %arg11[%c0_287, %c9_288, %c0_289] : memref<1x24x64xf32, #tpu.memory_space<vmem>>, vector<1x8x64xf32>
    %c0_290 = arith.constant 0 : index
    %c0_291 = arith.constant 0 : index
    %c320 = arith.constant 320 : index
    %188 = vector.load %arg19[%c0_290, %c0_291, %c320] : memref<1x8x576xf32, #tpu.memory_space<vmem>>, vector<1x8x64xf32>
    tpu.vector_store %arg19[%c0_290, %c0_291, %c320], %187 {strides = array<i32>} : memref<1x8x576xf32, #tpu.memory_space<vmem>>, vector<1x8x64xf32>,
    %c0_292 = arith.constant 0 : index
    %c10_293 = arith.constant 10 : index
    %c0_294 = arith.constant 0 : index
    %189 = vector.load %arg11[%c0_292, %c10_293, %c0_294] : memref<1x24x64xf32, #tpu.memory_space<vmem>>, vector<1x8x64xf32>
    %c0_295 = arith.constant 0 : index
    %c0_296 = arith.constant 0 : index
    %c384 = arith.constant 384 : index
    %190 = vector.load %arg19[%c0_295, %c0_296, %c384] : memref<1x8x576xf32, #tpu.memory_space<vmem>>, vector<1x8x64xf32>
    tpu.vector_store %arg19[%c0_295, %c0_296, %c384], %189 {strides = array<i32>} : memref<1x8x576xf32, #tpu.memory_space<vmem>>, vector<1x8x64xf32>,
    %c0_297 = arith.constant 0 : index
    %c11_298 = arith.constant 11 : index
    %c0_299 = arith.constant 0 : index
    %191 = vector.load %arg11[%c0_297, %c11_298, %c0_299] : memref<1x24x64xf32, #tpu.memory_space<vmem>>, vector<1x8x64xf32>
    %c0_300 = arith.constant 0 : index
    %c0_301 = arith.constant 0 : index
    %c448 = arith.constant 448 : index
    %192 = vector.load %arg19[%c0_300, %c0_301, %c448] : memref<1x8x576xf32, #tpu.memory_space<vmem>>, vector<1x8x64xf32>
    tpu.vector_store %arg19[%c0_300, %c0_301, %c448], %191 {strides = array<i32>} : memref<1x8x576xf32, #tpu.memory_space<vmem>>, vector<1x8x64xf32>,
    %c0_302 = arith.constant 0 : index
    %c12_303 = arith.constant 12 : index
    %c0_304 = arith.constant 0 : index
    %193 = vector.load %arg11[%c0_302, %c12_303, %c0_304] : memref<1x24x64xf32, #tpu.memory_space<vmem>>, vector<1x8x64xf32>
    %c0_305 = arith.constant 0 : index
    %c0_306 = arith.constant 0 : index
    %c512 = arith.constant 512 : index
    %194 = vector.load %arg19[%c0_305, %c0_306, %c512] : memref<1x8x576xf32, #tpu.memory_space<vmem>>, vector<1x8x64xf32>
    tpu.vector_store %arg19[%c0_305, %c0_306, %c512], %193 {strides = array<i32>} : memref<1x8x576xf32, #tpu.memory_space<vmem>>, vector<1x8x64xf32>,
    %c0_307 = arith.constant 0 : index
    %c0_308 = arith.constant 0 : index
    %c0_309 = arith.constant 0 : index
    %195 = vector.load %arg19[%c0_307, %c0_308, %c0_309] : memref<1x8x576xf32, #tpu.memory_space<vmem>>, vector<1x8x576xf32>
    %196 = vector.shape_cast %195 : vector<1x8x576xf32> to vector<8x576xf32>
    %c828 = arith.constant 828 : index
    %c0_310 = arith.constant 0 : index
    %197 = vector.load %arg2[%c828, %c0_310] : memref<2556x64xf32, #tpu.memory_space<vmem>>, vector<576x64xf32>
    %cst_311 = arith.constant dense<0.000000e+00> : vector<8x64xf32>
    %198 = tpu.matmul %196, %197, %cst_311 {dimension_numbers = #tpu.dot_dimension_numbers<[1], [0], [0], [1], [0, 0, 1, 1], [], []>} : vector<8x576xf32>, vector<576x64xf32>, vector<8x64xf32> -> vector<8x64xf32>
    %c5_312 = arith.constant 5 : index
    %c0_313 = arith.constant 0 : index
    %199 = vector.load %arg3[%c5_312, %c0_313] : memref<8x64xf32, #tpu.memory_space<vmem>>, vector<1x64xf32>
    %200 = vector.broadcast %199 : vector<1x64xf32> to vector<8x64xf32>
    %201 = arith.addf %198, %200 : vector<8x64xf32>
    %cst_314 = arith.constant 0.000000e+00 : f32
    %202 = vector.broadcast %cst_314 : f32 to vector<8x64xf32>
    %203 = arith.maximumf %201, %202 : vector<8x64xf32>
    %204 = vector.shape_cast %203 : vector<8x64xf32> to vector<1x8x64xf32>
    %cst_315 = arith.constant 0.000000e+00 : f32
    %205 = vector.broadcast %cst_315 : f32 to vector<1x8x64xf32>
    %c0_316 = arith.constant 0 : index
    %c0_317 = arith.constant 0 : index
    %c0_318 = arith.constant 0 : index
    %206 = vector.load %arg12[%c0_316, %c0_317, %c0_318] : memref<1x24x64xf32, #tpu.memory_space<vmem>>, vector<1x8x64xf32>
    tpu.vector_store %arg12[%c0_316, %c0_317, %c0_318], %205 {strides = array<i32>} : memref<1x24x64xf32, #tpu.memory_space<vmem>>, vector<1x8x64xf32>,
    %c0_319 = arith.constant 0 : index
    %c16_320 = arith.constant 16 : index
    %c0_321 = arith.constant 0 : index
    %207 = vector.load %arg12[%c0_319, %c16_320, %c0_321] : memref<1x24x64xf32, #tpu.memory_space<vmem>>, vector<1x8x64xf32>
    tpu.vector_store %arg12[%c0_319, %c16_320, %c0_321], %205 {strides = array<i32>} : memref<1x24x64xf32, #tpu.memory_space<vmem>>, vector<1x8x64xf32>,
    %c0_322 = arith.constant 0 : index
    %c8_323 = arith.constant 8 : index
    %c0_324 = arith.constant 0 : index
    %208 = vector.load %arg12[%c0_322, %c8_323, %c0_324] : memref<1x24x64xf32, #tpu.memory_space<vmem>>, vector<1x8x64xf32>
    tpu.vector_store %arg12[%c0_322, %c8_323, %c0_324], %204 {strides = array<i32>} : memref<1x24x64xf32, #tpu.memory_space<vmem>>, vector<1x8x64xf32>,
    %c0_325 = arith.constant 0 : index
    %c0_326 = arith.constant 0 : index
    %c0_327 = arith.constant 0 : index
    %209 = tpu.strided_load %arg12[%c0_325, %c0_326, %c0_327] {strides = array<i32: 1, 2, 1>} : memref<1x24x64xf32, #tpu.memory_space<vmem>>, vector<1x12x64xf32>
    %c0_328 = arith.constant 0 : index
    %c1_329 = arith.constant 1 : index
    %c0_330 = arith.constant 0 : index
    %210 = tpu.strided_load %arg12[%c0_328, %c1_329, %c0_330] {strides = array<i32: 1, 2, 1>} : memref<1x24x64xf32, #tpu.memory_space<vmem>>, vector<1x12x64xf32>
    %211 = vector.extract_strided_slice %209 {offsets = [0, 2, 0], sizes = [1, 4, 64], strides = [1, 1, 1]} : vector<1x12x64xf32> to vector<1x4x64xf32>
    %c0_331 = arith.constant 0 : index
    %c0_332 = arith.constant 0 : index
    %c0_333 = arith.constant 0 : index
    %212 = vector.load %arg20[%c0_331, %c0_332, %c0_333] : memref<1x4x576xf32, #tpu.memory_space<vmem>>, vector<1x4x64xf32>
    tpu.vector_store %arg20[%c0_331, %c0_332, %c0_333], %211 {strides = array<i32>} : memref<1x4x576xf32, #tpu.memory_space<vmem>>, vector<1x4x64xf32>,
    %213 = vector.extract_strided_slice %210 {offsets = [0, 2, 0], sizes = [1, 4, 64], strides = [1, 1, 1]} : vector<1x12x64xf32> to vector<1x4x64xf32>
    %c0_334 = arith.constant 0 : index
    %c0_335 = arith.constant 0 : index
    %c64_336 = arith.constant 64 : index
    %214 = vector.load %arg20[%c0_334, %c0_335, %c64_336] : memref<1x4x576xf32, #tpu.memory_space<vmem>>, vector<1x4x64xf32>
    tpu.vector_store %arg20[%c0_334, %c0_335, %c64_336], %213 {strides = array<i32>} : memref<1x4x576xf32, #tpu.memory_space<vmem>>, vector<1x4x64xf32>,
    %215 = vector.extract_strided_slice %209 {offsets = [0, 3, 0], sizes = [1, 4, 64], strides = [1, 1, 1]} : vector<1x12x64xf32> to vector<1x4x64xf32>
    %c0_337 = arith.constant 0 : index
    %c0_338 = arith.constant 0 : index
    %c128_339 = arith.constant 128 : index
    %216 = vector.load %arg20[%c0_337, %c0_338, %c128_339] : memref<1x4x576xf32, #tpu.memory_space<vmem>>, vector<1x4x64xf32>
    tpu.vector_store %arg20[%c0_337, %c0_338, %c128_339], %215 {strides = array<i32>} : memref<1x4x576xf32, #tpu.memory_space<vmem>>, vector<1x4x64xf32>,
    %217 = vector.extract_strided_slice %210 {offsets = [0, 3, 0], sizes = [1, 4, 64], strides = [1, 1, 1]} : vector<1x12x64xf32> to vector<1x4x64xf32>
    %c0_340 = arith.constant 0 : index
    %c0_341 = arith.constant 0 : index
    %c192_342 = arith.constant 192 : index
    %218 = vector.load %arg20[%c0_340, %c0_341, %c192_342] : memref<1x4x576xf32, #tpu.memory_space<vmem>>, vector<1x4x64xf32>
    tpu.vector_store %arg20[%c0_340, %c0_341, %c192_342], %217 {strides = array<i32>} : memref<1x4x576xf32, #tpu.memory_space<vmem>>, vector<1x4x64xf32>,
    %219 = vector.extract_strided_slice %209 {offsets = [0, 4, 0], sizes = [1, 4, 64], strides = [1, 1, 1]} : vector<1x12x64xf32> to vector<1x4x64xf32>
    %c0_343 = arith.constant 0 : index
    %c0_344 = arith.constant 0 : index
    %c256_345 = arith.constant 256 : index
    %220 = vector.load %arg20[%c0_343, %c0_344, %c256_345] : memref<1x4x576xf32, #tpu.memory_space<vmem>>, vector<1x4x64xf32>
    tpu.vector_store %arg20[%c0_343, %c0_344, %c256_345], %219 {strides = array<i32>} : memref<1x4x576xf32, #tpu.memory_space<vmem>>, vector<1x4x64xf32>,
    %221 = vector.extract_strided_slice %210 {offsets = [0, 4, 0], sizes = [1, 4, 64], strides = [1, 1, 1]} : vector<1x12x64xf32> to vector<1x4x64xf32>
    %c0_346 = arith.constant 0 : index
    %c0_347 = arith.constant 0 : index
    %c320_348 = arith.constant 320 : index
    %222 = vector.load %arg20[%c0_346, %c0_347, %c320_348] : memref<1x4x576xf32, #tpu.memory_space<vmem>>, vector<1x4x64xf32>
    tpu.vector_store %arg20[%c0_346, %c0_347, %c320_348], %221 {strides = array<i32>} : memref<1x4x576xf32, #tpu.memory_space<vmem>>, vector<1x4x64xf32>,
    %223 = vector.extract_strided_slice %209 {offsets = [0, 5, 0], sizes = [1, 4, 64], strides = [1, 1, 1]} : vector<1x12x64xf32> to vector<1x4x64xf32>
    %c0_349 = arith.constant 0 : index
    %c0_350 = arith.constant 0 : index
    %c384_351 = arith.constant 384 : index
    %224 = vector.load %arg20[%c0_349, %c0_350, %c384_351] : memref<1x4x576xf32, #tpu.memory_space<vmem>>, vector<1x4x64xf32>
    tpu.vector_store %arg20[%c0_349, %c0_350, %c384_351], %223 {strides = array<i32>} : memref<1x4x576xf32, #tpu.memory_space<vmem>>, vector<1x4x64xf32>,
    %225 = vector.extract_strided_slice %210 {offsets = [0, 5, 0], sizes = [1, 4, 64], strides = [1, 1, 1]} : vector<1x12x64xf32> to vector<1x4x64xf32>
    %c0_352 = arith.constant 0 : index
    %c0_353 = arith.constant 0 : index
    %c448_354 = arith.constant 448 : index
    %226 = vector.load %arg20[%c0_352, %c0_353, %c448_354] : memref<1x4x576xf32, #tpu.memory_space<vmem>>, vector<1x4x64xf32>
    tpu.vector_store %arg20[%c0_352, %c0_353, %c448_354], %225 {strides = array<i32>} : memref<1x4x576xf32, #tpu.memory_space<vmem>>, vector<1x4x64xf32>,
    %227 = vector.extract_strided_slice %209 {offsets = [0, 6, 0], sizes = [1, 4, 64], strides = [1, 1, 1]} : vector<1x12x64xf32> to vector<1x4x64xf32>
    %c0_355 = arith.constant 0 : index
    %c0_356 = arith.constant 0 : index
    %c512_357 = arith.constant 512 : index
    %228 = vector.load %arg20[%c0_355, %c0_356, %c512_357] : memref<1x4x576xf32, #tpu.memory_space<vmem>>, vector<1x4x64xf32>
    tpu.vector_store %arg20[%c0_355, %c0_356, %c512_357], %227 {strides = array<i32>} : memref<1x4x576xf32, #tpu.memory_space<vmem>>, vector<1x4x64xf32>,
    %c0_358 = arith.constant 0 : index
    %c0_359 = arith.constant 0 : index
    %c0_360 = arith.constant 0 : index
    %229 = vector.load %arg20[%c0_358, %c0_359, %c0_360] : memref<1x4x576xf32, #tpu.memory_space<vmem>>, vector<1x4x576xf32>
    %230 = vector.shape_cast %229 : vector<1x4x576xf32> to vector<4x576xf32>
    %c1404 = arith.constant 1404 : index
    %c0_361 = arith.constant 0 : index
    %231 = vector.load %arg2[%c1404, %c0_361] : memref<2556x64xf32, #tpu.memory_space<vmem>>, vector<576x64xf32>
    %cst_362 = arith.constant dense<0.000000e+00> : vector<4x64xf32>
    %232 = tpu.matmul %230, %231, %cst_362 {dimension_numbers = #tpu.dot_dimension_numbers<[1], [0], [0], [1], [0, 0, 1, 1], [], []>} : vector<4x576xf32>, vector<576x64xf32>, vector<4x64xf32> -> vector<4x64xf32>
    %c6_363 = arith.constant 6 : index
    %c0_364 = arith.constant 0 : index
    %233 = vector.load %arg3[%c6_363, %c0_364] : memref<8x64xf32, #tpu.memory_space<vmem>>, vector<1x64xf32>
    %234 = vector.broadcast %233 : vector<1x64xf32> to vector<4x64xf32>
    %235 = arith.addf %232, %234 : vector<4x64xf32>
    %cst_365 = arith.constant 0.000000e+00 : f32
    %236 = vector.broadcast %cst_365 : f32 to vector<4x64xf32>
    %237 = arith.maximumf %235, %236 : vector<4x64xf32>
    %238 = vector.shape_cast %237 : vector<4x64xf32> to vector<1x4x64xf32>
    %cst_366 = arith.constant 0.000000e+00 : f32
    %239 = vector.broadcast %cst_366 : f32 to vector<1x8x64xf32>
    %c0_367 = arith.constant 0 : index
    %c0_368 = arith.constant 0 : index
    %c0_369 = arith.constant 0 : index
    %240 = vector.load %arg13[%c0_367, %c0_368, %c0_369] : memref<1x20x64xf32, #tpu.memory_space<vmem>>, vector<1x8x64xf32>
    tpu.vector_store %arg13[%c0_367, %c0_368, %c0_369], %239 {strides = array<i32>} : memref<1x20x64xf32, #tpu.memory_space<vmem>>, vector<1x8x64xf32>,
    %c0_370 = arith.constant 0 : index
    %c12_371 = arith.constant 12 : index
    %c0_372 = arith.constant 0 : index
    %241 = vector.load %arg13[%c0_370, %c12_371, %c0_372] : memref<1x20x64xf32, #tpu.memory_space<vmem>>, vector<1x8x64xf32>
    tpu.vector_store %arg13[%c0_370, %c12_371, %c0_372], %239 {strides = array<i32>} : memref<1x20x64xf32, #tpu.memory_space<vmem>>, vector<1x8x64xf32>,
    %c0_373 = arith.constant 0 : index
    %c8_374 = arith.constant 8 : index
    %c0_375 = arith.constant 0 : index
    %242 = vector.load %arg13[%c0_373, %c8_374, %c0_375] : memref<1x20x64xf32, #tpu.memory_space<vmem>>, vector<1x4x64xf32>
    tpu.vector_store %arg13[%c0_373, %c8_374, %c0_375], %238 {strides = array<i32>} : memref<1x20x64xf32, #tpu.memory_space<vmem>>, vector<1x4x64xf32>,
    %c0_376 = arith.constant 0 : index
    %c4_377 = arith.constant 4 : index
    %c0_378 = arith.constant 0 : index
    %243 = vector.load %arg13[%c0_376, %c4_377, %c0_378] : memref<1x20x64xf32, #tpu.memory_space<vmem>>, vector<1x4x64xf32>
    %c0_379 = arith.constant 0 : index
    %c0_380 = arith.constant 0 : index
    %c0_381 = arith.constant 0 : index
    %244 = vector.load %arg21[%c0_379, %c0_380, %c0_381] : memref<1x4x576xf32, #tpu.memory_space<vmem>>, vector<1x4x64xf32>
    tpu.vector_store %arg21[%c0_379, %c0_380, %c0_381], %243 {strides = array<i32>} : memref<1x4x576xf32, #tpu.memory_space<vmem>>, vector<1x4x64xf32>,
    %c0_382 = arith.constant 0 : index
    %c5_383 = arith.constant 5 : index
    %c0_384 = arith.constant 0 : index
    %245 = vector.load %arg13[%c0_382, %c5_383, %c0_384] : memref<1x20x64xf32, #tpu.memory_space<vmem>>, vector<1x4x64xf32>
    %c0_385 = arith.constant 0 : index
    %c0_386 = arith.constant 0 : index
    %c64_387 = arith.constant 64 : index
    %246 = vector.load %arg21[%c0_385, %c0_386, %c64_387] : memref<1x4x576xf32, #tpu.memory_space<vmem>>, vector<1x4x64xf32>
    tpu.vector_store %arg21[%c0_385, %c0_386, %c64_387], %245 {strides = array<i32>} : memref<1x4x576xf32, #tpu.memory_space<vmem>>, vector<1x4x64xf32>,
    %c0_388 = arith.constant 0 : index
    %c6_389 = arith.constant 6 : index
    %c0_390 = arith.constant 0 : index
    %247 = vector.load %arg13[%c0_388, %c6_389, %c0_390] : memref<1x20x64xf32, #tpu.memory_space<vmem>>, vector<1x4x64xf32>
    %c0_391 = arith.constant 0 : index
    %c0_392 = arith.constant 0 : index
    %c128_393 = arith.constant 128 : index
    %248 = vector.load %arg21[%c0_391, %c0_392, %c128_393] : memref<1x4x576xf32, #tpu.memory_space<vmem>>, vector<1x4x64xf32>
    tpu.vector_store %arg21[%c0_391, %c0_392, %c128_393], %247 {strides = array<i32>} : memref<1x4x576xf32, #tpu.memory_space<vmem>>, vector<1x4x64xf32>,
    %c0_394 = arith.constant 0 : index
    %c7_395 = arith.constant 7 : index
    %c0_396 = arith.constant 0 : index
    %249 = vector.load %arg13[%c0_394, %c7_395, %c0_396] : memref<1x20x64xf32, #tpu.memory_space<vmem>>, vector<1x4x64xf32>
    %c0_397 = arith.constant 0 : index
    %c0_398 = arith.constant 0 : index
    %c192_399 = arith.constant 192 : index
    %250 = vector.load %arg21[%c0_397, %c0_398, %c192_399] : memref<1x4x576xf32, #tpu.memory_space<vmem>>, vector<1x4x64xf32>
    tpu.vector_store %arg21[%c0_397, %c0_398, %c192_399], %249 {strides = array<i32>} : memref<1x4x576xf32, #tpu.memory_space<vmem>>, vector<1x4x64xf32>,
    %c0_400 = arith.constant 0 : index
    %c8_401 = arith.constant 8 : index
    %c0_402 = arith.constant 0 : index
    %251 = vector.load %arg13[%c0_400, %c8_401, %c0_402] : memref<1x20x64xf32, #tpu.memory_space<vmem>>, vector<1x4x64xf32>
    %c0_403 = arith.constant 0 : index
    %c0_404 = arith.constant 0 : index
    %c256_405 = arith.constant 256 : index
    %252 = vector.load %arg21[%c0_403, %c0_404, %c256_405] : memref<1x4x576xf32, #tpu.memory_space<vmem>>, vector<1x4x64xf32>
    tpu.vector_store %arg21[%c0_403, %c0_404, %c256_405], %251 {strides = array<i32>} : memref<1x4x576xf32, #tpu.memory_space<vmem>>, vector<1x4x64xf32>,
    %c0_406 = arith.constant 0 : index
    %c9_407 = arith.constant 9 : index
    %c0_408 = arith.constant 0 : index
    %253 = vector.load %arg13[%c0_406, %c9_407, %c0_408] : memref<1x20x64xf32, #tpu.memory_space<vmem>>, vector<1x4x64xf32>
    %c0_409 = arith.constant 0 : index
    %c0_410 = arith.constant 0 : index
    %c320_411 = arith.constant 320 : index
    %254 = vector.load %arg21[%c0_409, %c0_410, %c320_411] : memref<1x4x576xf32, #tpu.memory_space<vmem>>, vector<1x4x64xf32>
    tpu.vector_store %arg21[%c0_409, %c0_410, %c320_411], %253 {strides = array<i32>} : memref<1x4x576xf32, #tpu.memory_space<vmem>>, vector<1x4x64xf32>,
    %c0_412 = arith.constant 0 : index
    %c10_413 = arith.constant 10 : index
    %c0_414 = arith.constant 0 : index
    %255 = vector.load %arg13[%c0_412, %c10_413, %c0_414] : memref<1x20x64xf32, #tpu.memory_space<vmem>>, vector<1x4x64xf32>
    %c0_415 = arith.constant 0 : index
    %c0_416 = arith.constant 0 : index
    %c384_417 = arith.constant 384 : index
    %256 = vector.load %arg21[%c0_415, %c0_416, %c384_417] : memref<1x4x576xf32, #tpu.memory_space<vmem>>, vector<1x4x64xf32>
    tpu.vector_store %arg21[%c0_415, %c0_416, %c384_417], %255 {strides = array<i32>} : memref<1x4x576xf32, #tpu.memory_space<vmem>>, vector<1x4x64xf32>,
    %c0_418 = arith.constant 0 : index
    %c11_419 = arith.constant 11 : index
    %c0_420 = arith.constant 0 : index
    %257 = vector.load %arg13[%c0_418, %c11_419, %c0_420] : memref<1x20x64xf32, #tpu.memory_space<vmem>>, vector<1x4x64xf32>
    %c0_421 = arith.constant 0 : index
    %c0_422 = arith.constant 0 : index
    %c448_423 = arith.constant 448 : index
    %258 = vector.load %arg21[%c0_421, %c0_422, %c448_423] : memref<1x4x576xf32, #tpu.memory_space<vmem>>, vector<1x4x64xf32>
    tpu.vector_store %arg21[%c0_421, %c0_422, %c448_423], %257 {strides = array<i32>} : memref<1x4x576xf32, #tpu.memory_space<vmem>>, vector<1x4x64xf32>,
    %c0_424 = arith.constant 0 : index
    %c12_425 = arith.constant 12 : index
    %c0_426 = arith.constant 0 : index
    %259 = vector.load %arg13[%c0_424, %c12_425, %c0_426] : memref<1x20x64xf32, #tpu.memory_space<vmem>>, vector<1x4x64xf32>
    %c0_427 = arith.constant 0 : index
    %c0_428 = arith.constant 0 : index
    %c512_429 = arith.constant 512 : index
    %260 = vector.load %arg21[%c0_427, %c0_428, %c512_429] : memref<1x4x576xf32, #tpu.memory_space<vmem>>, vector<1x4x64xf32>
    tpu.vector_store %arg21[%c0_427, %c0_428, %c512_429], %259 {strides = array<i32>} : memref<1x4x576xf32, #tpu.memory_space<vmem>>, vector<1x4x64xf32>,
    %c0_430 = arith.constant 0 : index
    %c0_431 = arith.constant 0 : index
    %c0_432 = arith.constant 0 : index
    %261 = vector.load %arg21[%c0_430, %c0_431, %c0_432] : memref<1x4x576xf32, #tpu.memory_space<vmem>>, vector<1x4x576xf32>
    %262 = vector.shape_cast %261 : vector<1x4x576xf32> to vector<4x576xf32>
    %c1980 = arith.constant 1980 : index
    %c0_433 = arith.constant 0 : index
    %263 = vector.load %arg2[%c1980, %c0_433] : memref<2556x64xf32, #tpu.memory_space<vmem>>, vector<576x64xf32>
    %cst_434 = arith.constant dense<0.000000e+00> : vector<4x64xf32>
    %264 = tpu.matmul %262, %263, %cst_434 {dimension_numbers = #tpu.dot_dimension_numbers<[1], [0], [0], [1], [0, 0, 1, 1], [], []>} : vector<4x576xf32>, vector<576x64xf32>, vector<4x64xf32> -> vector<4x64xf32>
    %c7_435 = arith.constant 7 : index
    %c0_436 = arith.constant 0 : index
    %265 = vector.load %arg3[%c7_435, %c0_436] : memref<8x64xf32, #tpu.memory_space<vmem>>, vector<1x64xf32>
    %266 = vector.broadcast %265 : vector<1x64xf32> to vector<4x64xf32>
    %267 = arith.addf %264, %266 : vector<4x64xf32>
    %cst_437 = arith.constant 0.000000e+00 : f32
    %268 = vector.broadcast %cst_437 : f32 to vector<4x64xf32>
    %269 = arith.maximumf %267, %268 : vector<4x64xf32>
    %270 = vector.shape_cast %269 : vector<4x64xf32> to vector<1x4x64xf32>
    %cst_438 = arith.constant dense<0.000000e+00> : vector<1x64xf32>
    %271 = vector.multi_reduction <add>, %270, %cst_438 [1] : vector<1x4x64xf32> to vector<1x64xf32>
    %cst_439 = arith.constant 4.000000e+00 : f32
    %272 = vector.broadcast %cst_439 : f32 to vector<1x64xf32>
    %273 = arith.divf %271, %272 : vector<1x64xf32>
    %c0_440 = arith.constant 0 : index
    %c0_441 = arith.constant 0 : index
    %274 = vector.load %arg4[%c0_440, %c0_441] : memref<194x128xf32, #tpu.memory_space<vmem>>, vector<64x128xf32>
    %cst_442 = arith.constant dense<0.000000e+00> : vector<1x128xf32>
    %275 = tpu.matmul %273, %274, %cst_442 {dimension_numbers = #tpu.dot_dimension_numbers<[1], [0], [0], [1], [0, 0, 1, 1], [], []>} : vector<1x64xf32>, vector<64x128xf32>, vector<1x128xf32> -> vector<1x128xf32>
    %c64_443 = arith.constant 64 : index
    %c0_444 = arith.constant 0 : index
    %276 = vector.load %arg4[%c64_443, %c0_444] : memref<194x128xf32, #tpu.memory_space<vmem>>, vector<1x128xf32>
    %277 = arith.addf %275, %276 : vector<1x128xf32>
    %cst_445 = arith.constant 0.000000e+00 : f32
    %278 = vector.broadcast %cst_445 : f32 to vector<1x128xf32>
    %279 = arith.maximumf %277, %278 : vector<1x128xf32>
    %c65 = arith.constant 65 : index
    %c0_446 = arith.constant 0 : index
    %280 = vector.load %arg4[%c65, %c0_446] : memref<194x128xf32, #tpu.memory_space<vmem>>, vector<128x128xf32>
    %cst_447 = arith.constant dense<0.000000e+00> : vector<1x128xf32>
    %281 = tpu.matmul %279, %280, %cst_447 {dimension_numbers = #tpu.dot_dimension_numbers<[1], [0], [0], [1], [0, 0, 1, 1], [], []>} : vector<1x128xf32>, vector<128x128xf32>, vector<1x128xf32> -> vector<1x128xf32>
    %c193 = arith.constant 193 : index
    %c0_448 = arith.constant 0 : index
    %282 = vector.load %arg4[%c193, %c0_448] : memref<194x128xf32, #tpu.memory_space<vmem>>, vector<1x128xf32>
    %283 = arith.addf %281, %282 : vector<1x128xf32>
    %284 = vector.shape_cast %283 : vector<1x128xf32> to vector<1x1x128xf32>
    %c0_449 = arith.constant 0 : index
    %c0_450 = arith.constant 0 : index
    %c0_451 = arith.constant 0 : index
    %285 = vector.load %arg5[%c0_449, %c0_450, %c0_451] : memref<1x1x128xf32, #tpu.memory_space<vmem>>, vector<1x1x128xf32>
    tpu.vector_store %arg5[%c0_449, %c0_450, %c0_451], %284 {strides = array<i32>} : memref<1x1x128xf32, #tpu.memory_space<vmem>>, vector<1x1x128xf32>,
    return
  }
  func.func @transform_0(%arg0: i32) -> (i32, i32, i32) {
    %c0_i32 = arith.constant 0 : i32
    %c0_i32_0 = arith.constant 0 : i32
    %c0_i32_1 = arith.constant 0 : i32
    return %arg0, %c0_i32, %c0_i32_0 : i32, i32, i32
  }
  func.func @transform_1(%arg0: i32) -> (i32, i32) {
    %c0_i32 = arith.constant 0 : i32
    %c0_i32_0 = arith.constant 0 : i32
    %c0_i32_1 = arith.constant 0 : i32
    return %c0_i32, %c0_i32_0 : i32, i32
  }
  func.func @transform_2(%arg0: i32) -> (i32, i32) {
    %c0_i32 = arith.constant 0 : i32
    %c0_i32_0 = arith.constant 0 : i32
    %c0_i32_1 = arith.constant 0 : i32
    return %c0_i32, %c0_i32_0 : i32, i32
  }
  func.func @transform_3(%arg0: i32) -> (i32, i32) {
    %c0_i32 = arith.constant 0 : i32
    %c0_i32_0 = arith.constant 0 : i32
    %c0_i32_1 = arith.constant 0 : i32
    return %c0_i32, %c0_i32_0 : i32, i32
  }
  func.func @transform_4(%arg0: i32) -> (i32, i32, i32) {
    %c0_i32 = arith.constant 0 : i32
    %c0_i32_0 = arith.constant 0 : i32
    %c0_i32_1 = arith.constant 0 : i32
    return %arg0, %c0_i32, %c0_i32_0 : i32, i32, i32
  }
}

</mosaic_0001>

<bundles_post_ra>
// kernel: vgg1d_forward.1
= control target key start
LH: loop header
LB: loop body
LE: loop exit
PB: predicated region body
PF: predicated region fallthrough
CT: control target
= control target key end

     0   :  { %9 = vsyncpa [#allocation19], 0  ;;  %s6199_s0 = inlined_call_operand.vmem [shape: f32[2,128,4], index: 0, kind: input, shape index: {}]   ;;  %s6200_s1 = inlined_call_operand.vmem [shape: f32[2556,64], index: 1, kind: input, shape index: {}]   ;;  %s6201_s2 = inlined_call_operand.vmem [shape: f32[8,64], index: 2, kind: input, shape index: {}]   ;;  %s6202_s3 = inlined_call_operand.vmem [shape: f32[194,128], index: 3, kind: input, shape index: {}]   ;;  %s6203_s4 = inlined_call_operand.hbm [shape: f32[2,1,128], index: 4, kind: output, shape index: {}]  }
   0x1   :  { %11 = vsyncpa [#allocation19 + $0x1], 0  ;;  %s4386_s15 = smov 0   ;;  %s4388_s16 = smov 0  }
   0x2   :  { %s4390_s17 = smov 0   ;;  %s4392_s18 = smov 0  }
   0x3 LB: > { %s4407_s19 = sadd.s32 4294967295, %s4340_s18   ;;  %s3226_s20 = sadd.s32 4294967294, %s4340_s18   ;;  %s4340_s18 = sphi %s4392_s18, %s6215_s18   ;;  %s4336_s17 = sphi %s4390_s17, %s6214_s17   ;;  %s4332_s16 = sphi %s4388_s16, %s6213_s16   ;;  %s4328_s15 = sphi %s4386_s15, %s6212_s15  }
   0x4   : > { %s4411_s21 = sadd.s32 1, %s4340_s18   ;;  %s113_s22 = sadd.s32 1, %s4336_s17 }
   0x5   : > { %s110_s23 = ssub.s32 %s4340_s18, %s4411_s21  ;;  %p123_p0 = scmp.ne.s32.totalorder %s4336_s17, %s4332_s16 }
   0x6   : > { %p111_p1 = scmp.eq.s32.totalorder %s110_s23, 0  ;;  %p124_p2 = scmp.eq.s32.totalorder %s4407_s19, 1 }
   0x7   : > { %p129_p3 = scmp.ne.s32.totalorder %s4332_s16, %s4328_s15  ;;  %p130_p4 = scmp.eq.s32.totalorder %s3226_s20, 1 }
   0x8   : > { %s4422_s24 = scalar_select %p111_p1, %s4336_s17, %s113_s22  }
   0x9   : > { %p4424_p5 = por %p124_p2, %p123_p0  ;;  %p4428_p6 = por %p130_p4, %p129_p3 }
   0xa   : > { %p3229_p7 = scmp.ge.s32.totalorder %s4340_s18, 1  ;;  %p165_p8 = scmp.lt.s32.totalorder %s4340_s18, 3 }
   0xc   : > { %p166_p9 = pnand %p3229_p7, %p165_p8 }
   0xd   : > { %p190_p10 = scmp.lt.s32.totalorder (!%p166_p9), %s4407_s19, 1  ;;  %vm211_vm0 = vcmask (!%p166_p9), 31744   ;;  %v4342_v0 = vmov (!%p166_p9), 0.0   ;;  %vm265_vm1 = vcmask (!%p166_p9), 31746   ;;  %s4343_s6 = smov (!%p166_p9), 4   ;;  %v614_v30 = vld [vmem:[%s6200_s1] sm:$0xff] (!%p166_p9) }
   0xe   : > { %169 = sbr.rel (%p166_p9) target bundleno = 3571 (0xdf3), region = 36  ;;  %212 = vst.msk [vmem:[#allocation2] sm:$0xff] (!%p166_p9), %vm211_vm0, %v4342_v0  ;;  %213 = vst.msk [vmem:[#allocation2 + $0x88] sm:$0xff] (!%p166_p9), %vm211_vm0, %v4342_v0  ;;  %s4344_s7 = smov (!%p166_p9), 8   ;;  %v615_v31 = vld [vmem:[%s6200_s1 + $0x8] sm:$0xff] (!%p166_p9)  ;;  %v616_v33 = vld [vmem:[%s6200_s1 + $0x10] sm:$0xff] (!%p166_p9) }
   0xf   : > { %s4345_s8 = smov (!%p166_p9), 12   ;;  %s4346_s9 = smov (!%p166_p9), 16   ;;  %v3824_v32 = vpack.c.bf16 (!%p166_p9), %v615_v31, %v614_v30  ;;  %v617_v34 = vld [vmem:[%s6200_s1 + $0x18] sm:$0xff] (!%p166_p9)  ;;  %v618_v36 = vld [vmem:[%s6200_s1 + $0x20] sm:$0xf] (!%p166_p9)  ;;  %vm649_vm2 = vcmask (!%p166_p9), 1043456  }
  0x10   : > { %s4347_s10 = smov (!%p166_p9), 20   ;;  %s4348_s11 = smov (!%p166_p9), 24   ;;  %v3828_v35 = vpack.c.bf16 (!%p166_p9), %v617_v34, %v616_v33  ;;  %vm274_vm3 = vcmask (!%p166_p9), 25600   ;;  %vm314_vm4 = vcmask (!%p166_p9), 64544   ;;  %vm312_vm5 = vcmask (!%p166_p9), 64546  }
  0x11   : > { %s4349_s12 = smov (!%p166_p9), 28   ;;  %3825 = vmatprep.subr.bf16.mxu0 (!%p166_p9), %v3824_v32  ;;  %s4350_s13 = smov (!%p166_p9), 32   ;;  %vm360_vm6 = vcmask (!%p166_p9), 97347   ;;  %vm362_vm7 = vcmask (!%p166_p9), 97344   ;;  %vm399_vm8 = vcmask (!%p166_p9), 130147   ;;  %vm401_vm9 = vcmask (!%p166_p9), 130144  }
  0x12   : > { %3827 = vmatpush3.bf16.msra.mxu0 (!%p166_p9), %v3824_v32  ;;  %vm438_vm10 = vcmask (!%p166_p9), 162948   ;;  %vm440_vm11 = vcmask (!%p166_p9), 162944   ;;  %vm477_vm12 = vcmask (!%p166_p9), 195748   ;;  %vm479_vm13 = vcmask (!%p166_p9), 195744   ;;  %s4353_s14 = smov (!%p166_p9), 64   ;;  %s4354_s20 = smov (!%p166_p9), 56  }
  0x13   : > { %3829 = vmatprep.subr.bf16.mxu0 (!%p166_p9), %v3828_v35  ;;  %vm516_vm14 = vcmask (!%p166_p9), 228549   ;;  %vm518_vm15 = vcmask (!%p166_p9), 228544   ;;  %s4356_s29 = smov (!%p166_p9), 80  }
  0x15   : > { %s191_s27 = scalar_select %p190_p10, %s4407_s19, 1 }
  0x16   : > { %3831 = vmatpush3.bf16.msra.mxu0 %v3828_v35 }
  0x17   : > { %s3271_s28 = sshll.u32 %s191_s27, 7  ;;  %3653 = vmatprep.subr.msk.mxu0 %vm649_vm2, %v618_v36 }
  0x18   : > { %s4443_s5 = scalar_lea.vmem %s6199_s0, %s3271_s28 }
  0x19   : > { %v198_v1 = vld [vmem:[%s4443_s5 + $0x18] sm:$0xff]  ;;  %v199_v2 = vld [vmem:[%s4443_s5 + $0x20] sm:$0xff]  ;;  %v196_v4 = vld [vmem:[%s4443_s5 + $0x8] sm:$0xff] }
  0x1a   : > { %v195_v3 = vld [vmem:[%s4443_s5] sm:$0xff]  ;;  %217 = vst.msk [vmem:[#allocation2 + $0x20] sm:$0xff] %vm211_vm0, %v198_v1  ;;  %218 = vst.msk [vmem:[#allocation2 + $0x28] sm:$0xff] %vm211_vm0, %v199_v2  ;;  %v197_v5 = vld [vmem:[%s4443_s5 + $0x10] sm:$0xff]  ;;  %3654 = vmatpush3.msk.msra.mxu0 %vm649_vm2, %v618_v36 }
  0x1b   : > { %214 = vst.msk [vmem:[#allocation2 + $0x8] sm:$0xff] %vm211_vm0, %v195_v3  ;;  %v200_v6 = vld [vmem:[%s4443_s5 + $0x28] sm:$0xff]  ;;  %215 = vst.msk [vmem:[#allocation2 + $0x10] sm:$0xff] %vm211_vm0, %v196_v4  ;;  %v201_v7 = vld [vmem:[%s4443_s5 + $0x30] sm:$0xff] }
  0x1c   : > { %216 = vst.msk [vmem:[#allocation2 + $0x18] sm:$0xff] %vm211_vm0, %v197_v5  ;;  %219 = vst.msk [vmem:[#allocation2 + $0x30] sm:$0xff] %vm211_vm0, %v200_v6  ;;  %v202_v8 = vld [vmem:[%s4443_s5 + $0x38] sm:$0xff]  ;;  %v203_v9 = vld [vmem:[%s4443_s5 + $0x40] sm:$0xff] }
  0x1d   : > { %220 = vst.msk [vmem:[#allocation2 + $0x38] sm:$0xff] %vm211_vm0, %v201_v7  ;;  %221 = vst.msk [vmem:[#allocation2 + $0x40] sm:$0xff] %vm211_vm0, %v202_v8  ;;  %v204_v10 = vld [vmem:[%s4443_s5 + $0x48] sm:$0xff]  ;;  %v205_v11 = vld [vmem:[%s4443_s5 + $0x50] sm:$0xff] }
  0x1e   : > { %222 = vst.msk [vmem:[#allocation2 + $0x48] sm:$0xff] %vm211_vm0, %v203_v9  ;;  %v206_v12 = vld [vmem:[%s4443_s5 + $0x58] sm:$0xff]  ;;  %223 = vst.msk [vmem:[#allocation2 + $0x50] sm:$0xff] %vm211_vm0, %v204_v10  ;;  %v207_v13 = vld [vmem:[%s4443_s5 + $0x60] sm:$0xff] }
  0x1f   : > { %224 = vst.msk [vmem:[#allocation2 + $0x58] sm:$0xff] %vm211_vm0, %v205_v11  ;;  %225 = vst.msk [vmem:[#allocation2 + $0x60] sm:$0xff] %vm211_vm0, %v206_v12  ;;  %v208_v14 = vld [vmem:[%s4443_s5 + $0x68] sm:$0xff]  ;;  %v209_v15 = vld [vmem:[%s4443_s5 + $0x70] sm:$0xff] }
  0x20   : > { %226 = vst.msk [vmem:[#allocation2 + $0x68] sm:$0xff] %vm211_vm0, %v207_v13  ;;  %227 = vst.msk [vmem:[#allocation2 + $0x70] sm:$0xff] %vm211_vm0, %v208_v14  ;;  %v210_v16 = vld [vmem:[%s4443_s5 + $0x78] sm:$0xff] }
  0x21   : > { %228 = vst.msk [vmem:[#allocation2 + $0x78] sm:$0xff] %vm211_vm0, %v209_v15  ;;  %229 = vst.msk [vmem:[#allocation2 + $0x80] sm:$0xff] %vm211_vm0, %v210_v16  ;;  %v252_v17 = vld [vmem:[#allocation2 + $0x21] ss:$2 sm:$0xff]  ;;  %v4483_v21 = vld [vmem:[#allocation2 + $0x20] ss:$2 sm:$0xff] }
  0x22   : > { %v248_v18 = vld [vmem:[#allocation2 + $0x1] ss:$2 sm:$0xff]  ;;  %v4477_v19 = vld [vmem:[#allocation2] ss:$2 sm:$0xff]  ;;  %289 = vrot.lane.b32.xlu1 %v252_v17, %s4343_s6  ;;  %268 = vst.msk [vmem:[#allocation10 + $0xe] sm:$0xff] %vm211_vm0, %v4483_v21 }
  0x23   : > { %285 = vrot.lane.b32.xlu0 %v248_v18, %s4343_s6  ;;  %v4481_v20 = vld [vmem:[#allocation2 + $0x10] ss:$2 sm:$0xff]  ;;  %266 = vst.msk [vmem:[#allocation10 - $0x2] sm:$0xfc] %vm265_vm1, %v4477_v19  ;;  %v250_v22 = vld [vmem:[#allocation2 + $0x11] ss:$2 sm:$0xff] }
  0x24   : > { %267 = vst.msk [vmem:[#allocation10 + $0x6] sm:$0xff] %vm211_vm0, %v4481_v20  ;;  %v4490_v23 = vld [vmem:[#allocation2 + $0x30] ss:$2 sm:$0xff]  ;;  %v254_v28 = vld [vmem:[#allocation2 + $0x31] ss:$2 sm:$0xff]  ;;  %vm557_vm1 = vcmask 261344  }
  0x25   : > { %269 = vst.msk [vmem:[#allocation10 + $0x16] sm:$0xff] %vm211_vm0, %v4490_v23  ;;  %v4494_v24 = vld [vmem:[#allocation2 + $0x40] ss:$2 sm:$0xff]  ;;  %v256_v29 = vld [vmem:[#allocation2 + $0x41] ss:$2 sm:$0xff] }
  0x26   : > { %v4496_v25 = vld [vmem:[#allocation2 + $0x50] ss:$2 sm:$0xff]  ;;  %270 = vst.msk [vmem:[#allocation10 + $0x1e] sm:$0xff] %vm211_vm0, %v4494_v24  ;;  %333 = vrot.lane.b32.xlu1 %v4477_v19, %s4344_s7  ;;  %v258_v37 = vld [vmem:[#allocation2 + $0x51] ss:$2 sm:$0xff] }
  0x27   : > { %271 = vst.msk [vmem:[#allocation10 + $0x26] sm:$0xff] %vm211_vm0, %v4496_v25  ;;  %v4502_v26 = vld [vmem:[#allocation2 + $0x60] ss:$2 sm:$0xff]  ;;  %287 = vrot.lane.b32.xlu0 %v250_v22, %s4343_s6  ;;  %v260_v38 = vld [vmem:[#allocation2 + $0x61] ss:$2 sm:$0xff] }
  0x28   : > { %272 = vst.msk [vmem:[#allocation10 + $0x2e] sm:$0xff] %vm211_vm0, %v4502_v26  ;;  %v4509_v27 = vld [vmem:[#allocation2 + $0x70] ss:$2 sm:$0xff]  ;;  %v4587_v39 = vld [vmem:[#allocation2 + $0x80] ss:$2 sm:$0xff] }
  0x29   : > { %273 = vst.msk [vmem:[#allocation10 + $0x36] sm:$0xff] %vm211_vm0, %v4509_v27  ;;  %v262_v40 = vld [vmem:[#allocation2 + $0x71] ss:$2 sm:$0xff]  ;;  %v264_v41 = vld [vmem:[#allocation2 + $0x81] ss:$2 sm:$0xff]  ;;  %vm555_vm0 = vcmask 261349  }
  0x2a   : > { %337 = vrot.lane.b32.xlu1 %v4483_v21, %s4344_s7  ;;  %275 = vst.msk [vmem:[#allocation10 + $0x3e] sm:$0x3] %vm274_vm3, %v4587_v39  ;;  %vm594_vm3 = vcmask 294150  }
  0x2b   : > { %335 = vrot.lane.b32.xlu0 %v4481_v20, %s4344_s7 }
  0x2e   : > { %374 = vrot.lane.b32.xlu1 %v250_v22, %s4345_s8 }
  0x2f   : > { %372 = vrot.lane.b32.xlu0 %v248_v18, %s4345_s8 }
  0x32   : > { %411 = vrot.lane.b32.xlu1 %v4477_v19, %s4346_s9 }
  0x33   : > { %376 = vrot.lane.b32.xlu0 %v252_v17, %s4345_s8 }
  0x36   : > { %291 = vrot.lane.b32.xlu1 %v254_v28, %s4343_s6 }
  0x37   : > { %413 = vrot.lane.b32.xlu0 %v4481_v20, %s4346_s9 }
  0x3a   : > { %450 = vrot.lane.b32.xlu1 %v248_v18, %s4347_s10 }
  0x3b   : > { %415 = vrot.lane.b32.xlu0 %v4483_v21, %s4346_s9 }
  0x3e   : > { %293 = vrot.lane.b32.xlu1 %v256_v29, %s4343_s6 }
  0x3f   : > { %452 = vrot.lane.b32.xlu0 %v250_v22, %s4347_s10 }
  0x42   : > { %454 = vrot.lane.b32.xlu1 %v252_v17, %s4347_s10 }
  0x43   : > { %339 = vrot.lane.b32.xlu0 %v4490_v23, %s4344_s7 }
  0x46   : > { %491 = vrot.lane.b32.xlu1 %v4481_v20, %s4348_s11 }
  0x47   : > { %489 = vrot.lane.b32.xlu0 %v4477_v19, %s4348_s11 }
  0x4a   : > { %378 = vrot.lane.b32.xlu1 %v254_v28, %s4345_s8 }
  0x4b   : > { %341 = vrot.lane.b32.xlu0 %v4494_v24, %s4344_s7 }
  0x4e   : > { %528 = vrot.lane.b32.xlu1 %v248_v18, %s4349_s12 }
  0x4f   : > { %493 = vrot.lane.b32.xlu0 %v4483_v21, %s4348_s11 }
  0x52   : > { %380 = vrot.lane.b32.xlu1 %v256_v29, %s4345_s8 }
  0x53   : > { %530 = vrot.lane.b32.xlu0 %v250_v22, %s4349_s12 }
  0x56   : > { %532 = vrot.lane.b32.xlu1 %v252_v17, %s4349_s12 }
  0x57   : > { %417 = vrot.lane.b32.xlu0 %v4490_v23, %s4346_s9 }
  0x5a   : > { %569 = vrot.lane.b32.xlu1 %v4481_v20, %s4350_s13 }
  0x5b   : > { %567 = vrot.lane.b32.xlu0 %v4477_v19, %s4350_s13 }
  0x5e   : > { %419 = vrot.lane.b32.xlu1 %v4494_v24, %s4346_s9 }
  0x5f   : > { %295 = vrot.lane.b32.xlu0 %v258_v37, %s4343_s6 }
  0x62   : > { %571 = vrot.lane.b32.xlu1 %v4483_v21, %s4350_s13 }
  0x63   : > { %456 = vrot.lane.b32.xlu0 %v254_v28, %s4347_s10 }
  0x66   : > { %343 = vrot.lane.b32.xlu1 %v4496_v25, %s4344_s7 }
  0x67   : > { %297 = vrot.lane.b32.xlu0 %v260_v38, %s4343_s6 }
  0x6a   : > { %495 = vrot.lane.b32.xlu1 %v4490_v23, %s4348_s11 }
  0x6b   : > { %458 = vrot.lane.b32.xlu0 %v256_v29, %s4347_s10 }
  0x6e   : > { %382 = vrot.lane.b32.xlu1 %v258_v37, %s4345_s8 }
  0x6f   : > { %345 = vrot.lane.b32.xlu0 %v4502_v26, %s4344_s7 }
  0x72   : > { %534 = vrot.lane.b32.xlu1 %v254_v28, %s4349_s12 }
  0x73   : > { %497 = vrot.lane.b32.xlu0 %v4494_v24, %s4348_s11 }
  0x76   : > { %421 = vrot.lane.b32.xlu1 %v4496_v25, %s4346_s9 }
  0x77   : > { %384 = vrot.lane.b32.xlu0 %v260_v38, %s4345_s8 }
  0x7a   : > { %573 = vrot.lane.b32.xlu1 %v4490_v23, %s4350_s13 }
  0x7b   : > { %536 = vrot.lane.b32.xlu0 %v256_v29, %s4349_s12 }
  0x7e   : > { %423 = vrot.lane.b32.xlu1 %v4502_v26, %s4346_s9 }
  0x7f   : > { %299 = vrot.lane.b32.xlu0 %v262_v40, %s4343_s6 }
  0x82   : > { %575 = vrot.lane.b32.xlu1 %v4494_v24, %s4350_s13 }
  0x83   : > { %460 = vrot.lane.b32.xlu0 %v258_v37, %s4347_s10 }
  0x86   : > { %347 = vrot.lane.b32.xlu1 %v4509_v27, %s4344_s7 }
  0x87   : > { %301 = vrot.lane.b32.xlu0 %v264_v41, %s4343_s6  ;;  %s188_s6 = sand.u32 1, %s4332_s16  }
  0x88   : > { %s3159_s23 = scalar_lea.sflag [#allocation19], %s188_s6 }
  0x8a   : > { %499 = vrot.lane.b32.xlu1 %v4496_v25, %s4348_s11 }
  0x8b   : > { %462 = vrot.lane.b32.xlu0 %v260_v38, %s4347_s10 }
  0x8e   : > { %386 = vrot.lane.b32.xlu1 %v262_v40, %s4345_s8 }
  0x8f   : > { %349 = vrot.lane.b32.xlu0 %v4587_v39, %s4344_s7 }
  0x92   : > { %538 = vrot.lane.b32.xlu1 %v258_v37, %s4349_s12 }
  0x93   : > { %501 = vrot.lane.b32.xlu0 %v4502_v26, %s4348_s11 }
  0x94   : > { %v290_v42 = vpop.permute.xlu1 %289 }
  0x95   : > { %v286_v43 = vpop.permute.xlu0 %285  ;;  %316 = vst.msk [vmem:[#allocation10 + $0xe] sm:$0xff] %vm314_vm4, %v290_v42 }
  0x96   : > { %313 = vst.msk [vmem:[#allocation10 - $0x2] sm:$0xfc] %vm312_vm5, %v286_v43  ;;  %425 = vrot.lane.b32.xlu1 %v4509_v27, %s4346_s9  ;;  %vm596_vm5 = vcmask 294144  }
  0x97   : > { %388 = vrot.lane.b32.xlu0 %v264_v41, %s4345_s8  ;;  %s4357_s8 = smov 96  }
  0x98   : > { %v334_v45 = vpop.permute.xlu1 %333 }
  0x99   : > { %v288_v44 = vpop.permute.xlu0 %287  ;;  %361 = vst.msk [vmem:[#allocation10 - $0x3] sm:$0xf8] %vm360_vm6, %v334_v45  ;;  %vm624_vm6 = vcmask 293888  }
  0x9a   : > { %315 = vst.msk [vmem:[#allocation10 + $0x6] sm:$0xff] %vm314_vm4, %v288_v44  ;;  %577 = vrot.lane.b32.xlu1 %v4496_v25, %s4350_s13 }
  0x9b   : > { %540 = vrot.lane.b32.xlu0 %v260_v38, %s4349_s12 }
  0x9c   : > { %v338_v47 = vpop.permute.xlu1 %337 }
  0x9d   : > { %v336_v46 = vpop.permute.xlu0 %335  ;;  %364 = vst.msk [vmem:[#allocation10 + $0xd] sm:$0xff] %vm362_vm7, %v338_v47 }
  0x9e   : > { %363 = vst.msk [vmem:[#allocation10 + $0x5] sm:$0xff] %vm362_vm7, %v336_v46  ;;  %464 = vrot.lane.b32.xlu1 %v262_v40, %s4347_s10 }
  0x9f   : > { %427 = vrot.lane.b32.xlu0 %v4587_v39, %s4346_s9 }
  0xa0   : > { %v375_v49 = vpop.permute.xlu1 %374 }
  0xa1   : > { %v373_v48 = vpop.permute.xlu0 %372  ;;  %402 = vst.msk [vmem:[#allocation10 + $0x5] sm:$0xff] %vm401_vm9, %v375_v49 }
  0xa2   : > { %400 = vst.msk [vmem:[#allocation10 - $0x3] sm:$0xf8] %vm399_vm8, %v373_v48  ;;  %466 = vrot.lane.b32.xlu1 %v264_v41, %s4347_s10  ;;  %vm322_vm8 = vcmask 58400   ;;  %s4351_s10 = smov 48  }
  0xa3   : > { %579 = vrot.lane.b32.xlu0 %v4502_v26, %s4350_s13 }
  0xa4   : > { %v412_v51 = vpop.permute.xlu1 %411 }
  0xa5   : > { %v377_v50 = vpop.permute.xlu0 %376  ;;  %439 = vst.msk [vmem:[#allocation10 - $0x4] sm:$0xf0] %vm438_vm10, %v412_v51  ;;  %vm448_vm10 = vcmask 158848  }
  0xa6   : > { %403 = vst.msk [vmem:[#allocation10 + $0xd] sm:$0xff] %vm401_vm9, %v377_v50  ;;  %505 = vrot.lane.b32.xlu1 %v4587_v39, %s4348_s11 }
  0xa7   : > { %503 = vrot.lane.b32.xlu0 %v4509_v27, %s4348_s11 }
  0xa8   : > { %v292_v53 = vpop.permute.xlu1 %291 }
  0xa9   : > { %v414_v52 = vpop.permute.xlu0 %413  ;;  %317 = vst.msk [vmem:[#allocation10 + $0x16] sm:$0xff] %vm314_vm4, %v292_v53 }
  0xaa   : > { %441 = vst.msk [vmem:[#allocation10 + $0x4] sm:$0xff] %vm440_vm11, %v414_v52  ;;  %544 = vrot.lane.b32.xlu1 %v264_v41, %s4349_s12 }
  0xab   : > { %542 = vrot.lane.b32.xlu0 %v262_v40, %s4349_s12  ;;  %s4352_s12 = smov 40  }
  0xac   : > { %v451_v55 = vpop.permute.xlu1 %450 }
  0xad   : > { %v416_v54 = vpop.permute.xlu0 %415  ;;  %478 = vst.msk [vmem:[#allocation10 - $0x4] sm:$0xf0] %vm477_vm12, %v451_v55  ;;  %vm565_vm12 = vcmask 258272  }
  0xae   : > { %442 = vst.msk [vmem:[#allocation10 + $0xc] sm:$0xff] %vm440_vm11, %v416_v54  ;;  %583 = vrot.lane.b32.xlu1 %v4587_v39, %s4350_s13 }
  0xaf   : > { %581 = vrot.lane.b32.xlu0 %v4509_v27, %s4350_s13 }
  0xb0   : > { %v294_v57 = vpop.permute.xlu1 %293 }
  0xb1   : > { %v453_v56 = vpop.permute.xlu0 %452  ;;  %318 = vst.msk [vmem:[#allocation10 + $0x1e] sm:$0xff] %vm314_vm4, %v294_v57 }
  0xb2   : > { %480 = vst.msk [vmem:[#allocation10 + $0x4] sm:$0xff] %vm479_vm13, %v453_v56 }
  0xb4   : > { %v455_v59 = vpop.permute.xlu1 %454 }
  0xb5   : > { %v340_v58 = vpop.permute.xlu0 %339  ;;  %481 = vst.msk [vmem:[#allocation10 + $0xc] sm:$0xff] %vm479_vm13, %v455_v59  ;;  %v4707_v59 = vld [vmem:[%s6201_s2] ss:$0 sm:$0xff] }
  0xb6   : > { %365 = vst.msk [vmem:[#allocation10 + $0x15] sm:$0xff] %vm362_vm7, %v340_v58 }
  0xb8   : > { %v492_v61 = vpop.permute.xlu1 %491 }
  0xb9   : > { %v490_v60 = vpop.permute.xlu0 %489  ;;  %519 = vst.msk [vmem:[#allocation10 + $0x3] sm:$0xff] %vm518_vm15, %v492_v61 }
  0xba   : > { %517 = vst.msk [vmem:[#allocation10 - $0x5] sm:$0xe0] %vm516_vm14, %v490_v60  ;;  %vm766_vm14 = vcmask 64512  }
  0xbb   : > { %767 = vst.msk [vmem:[#allocation3] sm:$0xff] %vm766_vm14, %v4342_v0  ;;  %768 = vst.msk [vmem:[#allocation3 + $0x48] sm:$0xff] %vm766_vm14, %v4342_v0 }
  0xbc   : > { %v379_v63 = vpop.permute.xlu1 %378 }
  0xbd   : > { %v342_v62 = vpop.permute.xlu0 %341  ;;  %404 = vst.msk [vmem:[#allocation10 + $0x15] sm:$0xff] %vm401_vm9, %v379_v63 }
  0xbe   : > { %366 = vst.msk [vmem:[#allocation10 + $0x1d] sm:$0xff] %vm362_vm7, %v342_v62 }
  0xc0   : > { %v529_v2 = vpop.permute.xlu1 %528 }
  0xc1   : > { %v494_v1 = vpop.permute.xlu0 %493  ;;  %556 = vst.msk [vmem:[#allocation10 - $0x5] sm:$0xe0] %vm555_vm0, %v529_v2  ;;  %vm801_vm0 = vcmask 58368  }
  0xc2   : > { %520 = vst.msk [vmem:[#allocation10 + $0xb] sm:$0xff] %vm518_vm15, %v494_v1 }
  0xc4   : > { %v381_v4 = vpop.permute.xlu1 %380 }
  0xc5   : > { %v531_v3 = vpop.permute.xlu0 %530  ;;  %405 = vst.msk [vmem:[#allocation10 + $0x1d] sm:$0xff] %vm401_vm9, %v381_v4 }
  0xc6   : > { %558 = vst.msk [vmem:[#allocation10 + $0x3] sm:$0xff] %vm557_vm1, %v531_v3 }
  0xc8   : > { %v533_v6 = vpop.permute.xlu1 %532 }
  0xc9   : > { %v418_v5 = vpop.permute.xlu0 %417  ;;  %559 = vst.msk [vmem:[#allocation10 + $0xb] sm:$0xff] %vm557_vm1, %v533_v6 }
  0xca   : > { %443 = vst.msk [vmem:[#allocation10 + $0x14] sm:$0xff] %vm440_vm11, %v418_v5 }
  0xcc   : > { %v570_v8 = vpop.permute.xlu1 %569 }
  0xcd   : > { %v568_v7 = vpop.permute.xlu0 %567  ;;  %597 = vst.msk [vmem:[#allocation10 + $0x2] sm:$0xff] %vm596_vm5, %v570_v8 }
  0xce   : > { %595 = vst.msk [vmem:[#allocation10 - $0x6] sm:$0xc0] %vm594_vm3, %v568_v7  ;;  %vm851_vm3 = vcmask 195715  }
  0xd0   : > { %v420_v10 = vpop.permute.xlu1 %419 }
  0xd1   : > { %v296_v9 = vpop.permute.xlu0 %295  ;;  %444 = vst.msk [vmem:[#allocation10 + $0x1c] sm:$0xff] %vm440_vm11, %v420_v10 }
  0xd2   : > { %319 = vst.msk [vmem:[#allocation10 + $0x26] sm:$0xff] %vm314_vm4, %v296_v9 }
  0xd4   : > { %v572_v12 = vpop.permute.xlu1 %571 }
  0xd5   : > { %v457_v11 = vpop.permute.xlu0 %456  ;;  %v606_v13 = vld [vmem:[#allocation10] sm:$0xff]  ;;  %598 = vst.msk [vmem:[#allocation10 + $0xa] sm:$0xff] %vm596_vm5, %v572_v12 }
  0xd6   : > { %482 = vst.msk [vmem:[#allocation10 + $0x14] sm:$0xff] %vm479_vm13, %v457_v11  ;;  %3655 = vmatprep.mubr.msk.f32.mxu0 %vm624_vm6, %v606_v13 }
  0xd8   : > { %v344_v15 = vpop.permute.xlu1 %343 }
  0xd9   : > { %v298_v14 = vpop.permute.xlu0 %297  ;;  %367 = vst.msk [vmem:[#allocation10 + $0x25] sm:$0xff] %vm362_vm7, %v344_v15 }
  0xda   : > { %320 = vst.msk [vmem:[#allocation10 + $0x2e] sm:$0xff] %vm314_vm4, %v298_v14 }
  0xdc   : > { %v496_v17 = vpop.permute.xlu1 %495  ;;  %v607_v18 = vld [vmem:[#allocation10 + $0x8] sm:$0xff] }
  0xdd   : > { %v459_v16 = vpop.permute.xlu0 %458  ;;  %521 = vst.msk [vmem:[#allocation10 + $0x13] sm:$0xff] %vm518_vm15, %v496_v17  ;;  %3656 = vmatmul.mubr.msk.f32.vlgmr.msra.gmra.mrb[0].mxu0 %vm624_vm6, %v607_v18 }
  0xde   : > { %483 = vst.msk [vmem:[#allocation10 + $0x1c] sm:$0xff] %vm479_vm13, %v459_v16 }
  0xe0   : > { %v383_v20 = vpop.permute.xlu1 %382 }
  0xe1   : > { %v346_v19 = vpop.permute.xlu0 %345  ;;  %406 = vst.msk [vmem:[#allocation10 + $0x25] sm:$0xff] %vm401_vm9, %v383_v20  ;;  %v1002_v20 = vld [vmem:[%s6200_s1 + $0x2c] sm:$0xff] }
  0xe2   : > { %368 = vst.msk [vmem:[#allocation10 + $0x2d] sm:$0xff] %vm362_vm7, %v346_v19  ;;  %v1001_v19 = vld [vmem:[%s6200_s1 + $0x24] sm:$0xff] }
  0xe4   : > { %v535_v22 = vpop.permute.xlu1 %534 }
  0xe5   : > { %v498_v21 = vpop.permute.xlu0 %497  ;;  %560 = vst.msk [vmem:[#allocation10 + $0x13] sm:$0xff] %vm557_vm1, %v535_v22  ;;  %v1003_v22 = vld [vmem:[%s6200_s1 + $0x34] sm:$0xff] }
  0xe6   : > { %522 = vst.msk [vmem:[#allocation10 + $0x1b] sm:$0xff] %vm518_vm15, %v498_v21  ;;  %v3832_v21 = vpack.c.bf16 %v1002_v20, %v1001_v19 }
  0xe8   : > { %v422_v24 = vpop.permute.xlu1 %421  ;;  %3833 = vmatprep.subr.bf16.mxu1 %v3832_v21 }
  0xe9   : > { %v385_v23 = vpop.permute.xlu0 %384  ;;  %445 = vst.msk [vmem:[#allocation10 + $0x24] sm:$0xff] %vm440_vm11, %v422_v24  ;;  %3835 = vmatpush3.bf16.msra.mxu1 %v3832_v21 }
  0xea   : > { %407 = vst.msk [vmem:[#allocation10 + $0x2d] sm:$0xff] %vm401_vm9, %v385_v23  ;;  %v1004_v23 = vld [vmem:[%s6200_s1 + $0x3c] sm:$0xff] }
  0xeb   : > { %v3836_v24 = vpack.c.bf16 %v1004_v23, %v1003_v22 }
  0xec   : > { %v574_v26 = vpop.permute.xlu1 %573 }
  0xed   : > { %v537_v25 = vpop.permute.xlu0 %536  ;;  %599 = vst.msk [vmem:[#allocation10 + $0x12] sm:$0xff] %vm596_vm5, %v574_v26  ;;  %3837 = vmatprep.subr.bf16.mxu1 %v3836_v24  ;;  %v1006_v26 = vld [vmem:[%s6200_s1 + $0x4c] sm:$0xff] }
  0xee   : > { %561 = vst.msk [vmem:[#allocation10 + $0x1b] sm:$0xff] %vm557_vm1, %v537_v25  ;;  %3839 = vmatpush3.bf16.msra.mxu1 %v3836_v24  ;;  %v1005_v25 = vld [vmem:[%s6200_s1 + $0x44] sm:$0xff] }
  0xf0   : > { %v424_v28 = vpop.permute.xlu1 %423 }
  0xf1   : > { %v300_v27 = vpop.permute.xlu0 %299  ;;  %446 = vst.msk [vmem:[#allocation10 + $0x2c] sm:$0xff] %vm440_vm11, %v424_v28 }
  0xf2   : > { %321 = vst.msk [vmem:[#allocation10 + $0x36] sm:$0xff] %vm314_vm4, %v300_v27  ;;  %vm370_vm4 = vcmask 92224  }
  0xf4   : > { %v576_v30 = vpop.permute.xlu1 %575  ;;  %v608_v31 = vld [vmem:[#allocation10 + $0x10] sm:$0xff] }
  0xf5   : > { %v461_v29 = vpop.permute.xlu0 %460  ;;  %600 = vst.msk [vmem:[#allocation10 + $0x1a] sm:$0xff] %vm596_vm5, %v576_v30  ;;  %3658 = vmatprep.mubr.msk.f32.mxu0 %vm624_vm6, %v608_v31  ;;  %v3840_v30 = vpack.c.bf16 %v1006_v26, %v1005_v25  ;;  %v1265_v25 = vld [vmem:[%s6200_s1 + $0x6c] sm:$0xff]  ;;  %v1266_v26 = vld [vmem:[%s6200_s1 + $0x74] sm:$0xff] }
  0xf6   : > { %484 = vst.msk [vmem:[#allocation10 + $0x24] sm:$0xff] %vm479_vm13, %v461_v29 }
  0xf7   : > { %3841 = vmatprep.subr.bf16.mxu1 %v3840_v30 }
  0xf8   : > { %v348_v33 = vpop.permute.xlu1 %347  ;;  %3843 = vmatpush3.bf16.msra.mxu1 %v3840_v30  ;;  %v1268_v30 = vld [vmem:[%s6200_s1 + $0x84] sm:$0xff] }
  0xf9   : > { %v302_v32 = vpop.permute.xlu0 %301  ;;  %369 = vst.msk [vmem:[#allocation10 + $0x35] sm:$0xff] %vm362_vm7, %v348_v33  ;;  %vm409_vm7 = vcmask 125024  }
  0xfa   : > { %323 = vst.msk [vmem:[#allocation10 + $0x3e] sm:$0x3] %vm322_vm8, %v302_v32  ;;  %vm920_vm8 = vcmask 392516  }
  0xfc   : > { %v500_v35 = vpop.permute.xlu1 %499  ;;  %v609_v36 = vld [vmem:[#allocation10 + $0x18] sm:$0xff] }
  0xfd   : > { %v463_v34 = vpop.permute.xlu0 %462  ;;  %523 = vst.msk [vmem:[#allocation10 + $0x23] sm:$0xff] %vm518_vm15, %v500_v35  ;;  %3659 = vmatmul.mubr.msk.f32.gmra.mrb[2].mxu0 %vm624_vm6, %v609_v36  ;;  %v1007_v35 = vld [vmem:[%s6200_s1 + $0x54] sm:$0xff]  ;;  %v1008_v36 = vld [vmem:[%s6200_s1 + $0x5c] sm:$0xff] }
  0xfe   : > { %485 = vst.msk [vmem:[#allocation10 + $0x2c] sm:$0xff] %vm479_vm13, %v463_v34 }
 0x100   : > { %v387_v38 = vpop.permute.xlu1 %386 }
 0x101   : > { %v350_v37 = vpop.permute.xlu0 %349  ;;  %408 = vst.msk [vmem:[#allocation10 + $0x35] sm:$0xff] %vm401_vm9, %v387_v38  ;;  %vm487_vm9 = vcmask 191648   ;;  %v3844_v38 = vpack.c.bf16 %v1008_v36, %v1007_v35  ;;  %v3242_v35 = vld [vmem:[%s6201_s2 + $0x1] ss:$0 sm:$0xff] }
 0x102   : > { %371 = vst.msk [vmem:[#allocation10 + $0x3d] sm:$0x7] %vm370_vm4, %v350_v37  ;;  %vm943_vm4 = vcmask 458117  }
 0x103   : > { %3845 = vmatprep.subr.bf16.mxu1 %v3844_v38 }
 0x104   : > { %v539_v40 = vpop.permute.xlu1 %538  ;;  %3847 = vmatpush3.bf16.msra.mxu1 %v3844_v38 }
 0x105   : > { %v502_v39 = vpop.permute.xlu0 %501  ;;  %562 = vst.msk [vmem:[#allocation10 + $0x23] sm:$0xff] %vm557_vm1, %v539_v40 }
 0x106   : > { %524 = vst.msk [vmem:[#allocation10 + $0x2b] sm:$0xff] %vm518_vm15, %v502_v39  ;;  %v1009_v39 = vld [vmem:[%s6200_s1 + $0x64] sm:$0xff] }
 0x107   : > { %3683 = vmatprep.subr.mxu1 %v1009_v39 }
 0x108   : > { %v426_v42 = vpop.permute.xlu1 %425  ;;  %3684 = vmatpush3.msra.mxu1 %v1009_v39 }
 0x109   : > { %v389_v41 = vpop.permute.xlu0 %388  ;;  %447 = vst.msk [vmem:[#allocation10 + $0x34] sm:$0xff] %vm440_vm11, %v426_v42  ;;  %vm526_vm11 = vcmask 225472  }
 0x10a   : > { %410 = vst.msk [vmem:[#allocation10 + $0x3d] sm:$0x7] %vm409_vm7, %v389_v41  ;;  %vm966_vm7 = vcmask 523717  }
 0x10c   : > { %v578_v44 = vpop.permute.xlu1 %577 }
 0x10d   : > { %v541_v43 = vpop.permute.xlu0 %540  ;;  %601 = vst.msk [vmem:[#allocation10 + $0x22] sm:$0xff] %vm596_vm5, %v578_v44 }
 0x10e   : > { %563 = vst.msk [vmem:[#allocation10 + $0x2b] sm:$0xff] %vm557_vm1, %v541_v43 }
 0x110   : > { %v465_v46 = vpop.permute.xlu1 %464 }
 0x111   : > { %v428_v45 = vpop.permute.xlu0 %427  ;;  %486 = vst.msk [vmem:[#allocation10 + $0x34] sm:$0xff] %vm479_vm13, %v465_v46  ;;  %vm604_vm13 = vcmask 292096  }
 0x112   : > { %449 = vst.msk [vmem:[#allocation10 + $0x3c] sm:$0xf] %vm448_vm10, %v428_v45  ;;  %vm989_vm10 = vcmask 589318  }
 0x114   : > { %v467_v48 = vpop.permute.xlu1 %466  ;;  %v610_v49 = vld [vmem:[#allocation10 + $0x20] sm:$0xff] }
 0x115   : > { %v580_v47 = vpop.permute.xlu0 %579  ;;  %488 = vst.msk [vmem:[#allocation10 + $0x3c] sm:$0xf] %vm487_vm9, %v467_v48  ;;  %3661 = vmatprep.mubr.msk.f32.mxu0 %vm624_vm6, %v610_v49  ;;  %vm825_vm9 = vcmask 130112  }
 0x116   : > { %602 = vst.msk [vmem:[#allocation10 + $0x2a] sm:$0xff] %vm596_vm5, %v580_v47 }
 0x118   : > { %v506_v51 = vpop.permute.xlu1 %505 }
 0x119   : > { %v504_v50 = vpop.permute.xlu0 %503  ;;  %527 = vst.msk [vmem:[#allocation10 + $0x3b] sm:$0x1f] %vm526_vm11, %v506_v51  ;;  %vm853_vm11 = vcmask 195712  }
 0x11a   : > { %525 = vst.msk [vmem:[#allocation10 + $0x33] sm:$0xff] %vm518_vm15, %v504_v50  ;;  %vm796_vm15 = vcmask 64514  }
 0x11c   : > { %v545_v53 = vpop.permute.xlu1 %544 }
 0x11d   : > { %v543_v52 = vpop.permute.xlu0 %542  ;;  %v611_v54 = vld [vmem:[#allocation10 + $0x28] sm:$0xff]  ;;  %566 = vst.msk [vmem:[#allocation10 + $0x3b] sm:$0x1f] %vm565_vm12, %v545_v53  ;;  %vm876_vm12 = vcmask 261312  }
 0x11e   : > { %564 = vst.msk [vmem:[#allocation10 + $0x33] sm:$0xff] %vm557_vm1, %v543_v52  ;;  %3662 = vmatmul.mubr.msk.f32.gmra.mrb[4].mxu0 %vm624_vm6, %v611_v54  ;;  %vm823_vm1 = vcmask 130114  }
 0x120   : > { %v584_v56 = vpop.permute.xlu1 %583 }
 0x121   : > { %v582_v55 = vpop.permute.xlu0 %581  ;;  %605 = vst.msk [vmem:[#allocation10 + $0x3a] sm:$0x3f] %vm604_vm13, %v584_v56  ;;  %vm899_vm13 = vcmask 326912  }
 0x122   : > { %603 = vst.msk [vmem:[#allocation10 + $0x32] sm:$0xff] %vm596_vm5, %v582_v55  ;;  %vm874_vm5 = vcmask 261315  }
 0x129   : > { %v612_v57 = vld [vmem:[#allocation10 + $0x30] sm:$0xff]  ;;  %v613_v58 = vld [vmem:[#allocation10 + $0x38] sm:$0xff] }
 0x12a   : > { %3664 = vmatprep.mubr.msk.f32.mxu0 %vm624_vm6, %v612_v57 }
 0x12b   : > { %3665 = vmatmul.mubr.msk.f32.gmra.mrb[6].mxu0 %vm624_vm6, %v613_v58  ;;  %vm897_vm6 = vcmask 326916  }
 0x1b0   : > { %v3657_v60 = vpop.f32.mrb[0].mxu0 }
 0x1b1   : > { %v725_v61 = vadd.f32 %v3657_v60, %v4707_v59  ;;  %v719_v62 = vpop.f32.mrb[1].mxu0 }
 0x1b2   : > { %v720_v63 = vadd.f32 %v4707_v59, %v719_v62 }
 0x1b3   : > { %v759_v1 = vmax.f32 %v725_v61, 0.0 }
 0x1b4   : > { %v758_v2 = vmax.f32 %v720_v63, 0.0 }
 0x1b5   : > { %770 = vst.msk [vmem:[#allocation3 + $0x10] sm:$0xff] %vm766_vm14, %v759_v1 }
 0x1b6   : > { %769 = vst.msk [vmem:[#allocation3 + $0x8] sm:$0xff] %vm766_vm14, %v758_v2 }
 0x1bd   : > { %v787_v3 = vld [vmem:[#allocation3 + $0x1] ss:$2 sm:$0xff]  ;;  %v777_v4 = vld [vmem:[#allocation3] ss:$2 sm:$0xff] }
 0x1be   : > { %808 = vrot.lane.b32.xlu0 %v787_v3, %s4344_s7  ;;  %836 = vrot.lane.b32.xlu1 %v777_v4, %s4346_s9  ;;  %797 = vst.msk [vmem:[#allocation11 - $0x2] sm:$0xfc] %vm796_vm15, %v777_v4  ;;  %vm945_vm15 = vcmask 458112  }
 0x1c2   : > { %859 = vrot.lane.b32.xlu0 %v787_v3, %s4348_s11  ;;  %882 = vrot.lane.b32.xlu1 %v777_v4, %s4350_s13 }
 0x1c6   : > { %928 = vrot.lane.b32.xlu0 %v777_v4, %s4351_s10  ;;  %905 = vrot.lane.b32.xlu1 %v787_v3, %s4352_s12 }
 0x1ca   : > { %974 = vrot.lane.b32.xlu0 %v777_v4, %s4353_s14  ;;  %951 = vrot.lane.b32.xlu1 %v787_v3, %s4354_s20 }
 0x1d0   : > { %v3660_v5 = vpop.f32.mrb[2].mxu0 }
 0x1d1   : > { %v735_v6 = vadd.f32 %v3660_v5, %v4707_v59  ;;  %v729_v7 = vpop.f32.mrb[3].mxu0 }
 0x1d2   : > { %v730_v8 = vadd.f32 %v4707_v59, %v729_v7 }
 0x1d3   : > { %v761_v9 = vmax.f32 %v735_v6, 0.0 }
 0x1d4   : > { %v760_v10 = vmax.f32 %v730_v8, 0.0 }
 0x1d5   : > { %772 = vst.msk [vmem:[#allocation3 + $0x20] sm:$0xff] %vm766_vm14, %v761_v9 }
 0x1d6   : > { %771 = vst.msk [vmem:[#allocation3 + $0x18] sm:$0xff] %vm766_vm14, %v760_v10 }
 0x1dd   : > { %v779_v11 = vld [vmem:[#allocation3 + $0x10] ss:$2 sm:$0xff]  ;;  %v789_v12 = vld [vmem:[#allocation3 + $0x11] ss:$2 sm:$0xff] }
 0x1de   : > { %838 = vrot.lane.b32.xlu0 %v779_v11, %s4346_s9  ;;  %798 = vst.msk [vmem:[#allocation11 + $0x6] sm:$0xff] %vm766_vm14, %v779_v11  ;;  %810 = vrot.lane.b32.xlu1 %v789_v12, %s4344_s7 }
 0x1e2   : > { %884 = vrot.lane.b32.xlu0 %v779_v11, %s4350_s13  ;;  %861 = vrot.lane.b32.xlu1 %v789_v12, %s4348_s11 }
 0x1e6   : > { %907 = vrot.lane.b32.xlu0 %v789_v12, %s4352_s12  ;;  %930 = vrot.lane.b32.xlu1 %v779_v11, %s4351_s10 }
 0x1ea   : > { %953 = vrot.lane.b32.xlu0 %v789_v12, %s4354_s20  ;;  %976 = vrot.lane.b32.xlu1 %v779_v11, %s4353_s14 }
 0x1f1   : > { %v3663_v13 = vpop.f32.mrb[4].mxu0 }
 0x1f2   : > { %v745_v14 = vadd.f32 %v3663_v13, %v4707_v59  ;;  %v739_v15 = vpop.f32.mrb[5].mxu0 }
 0x1f3   : > { %v740_v16 = vadd.f32 %v4707_v59, %v739_v15 }
 0x1f4   : > { %v763_v17 = vmax.f32 %v745_v14, 0.0 }
 0x1f5   : > { %v762_v18 = vmax.f32 %v740_v16, 0.0 }
 0x1f6   : > { %774 = vst.msk [vmem:[#allocation3 + $0x30] sm:$0xff] %vm766_vm14, %v763_v17 }
 0x1f7   : > { %773 = vst.msk [vmem:[#allocation3 + $0x28] sm:$0xff] %vm766_vm14, %v762_v18 }
 0x1fe   : > { %v3666_v27 = vpop.f32.mrb[6].mxu0  ;;  %v791_v28 = vld [vmem:[#allocation3 + $0x21] ss:$2 sm:$0xff]  ;;  %v781_v29 = vld [vmem:[#allocation3 + $0x20] ss:$2 sm:$0xff] }
 0x1ff   : > { %v755_v31 = vadd.f32 %v3666_v27, %v4707_v59  ;;  %v749_v32 = vpop.f32.mrb[7].mxu0  ;;  %812 = vrot.lane.b32.xlu0 %v791_v28, %s4344_s7  ;;  %840 = vrot.lane.b32.xlu1 %v781_v29, %s4346_s9  ;;  %799 = vst.msk [vmem:[#allocation11 + $0xe] sm:$0xff] %vm766_vm14, %v781_v29  ;;  %v1267_v27 = vld [vmem:[%s6200_s1 + $0x7c] sm:$0xff] }
 0x200   : > { %v750_v33 = vadd.f32 %v4707_v59, %v749_v32  ;;  %v1269_v32 = vld [vmem:[%s6200_s1 + $0x8c] sm:$0xff] }
 0x201   : > { %v765_v34 = vmax.f32 %v755_v31, 0.0  ;;  %v3852_v31 = vpack.c.bf16 %v1268_v30, %v1267_v27 }
 0x202   : > { %v764_v37 = vmax.f32 %v750_v33, 0.0  ;;  %v1270_v33 = vld [vmem:[%s6200_s1 + $0x94] sm:$0xff] }
 0x203   : > { %776 = vst.msk [vmem:[#allocation3 + $0x40] sm:$0xff] %vm766_vm14, %v765_v34  ;;  %863 = vrot.lane.b32.xlu0 %v791_v28, %s4348_s11  ;;  %909 = vrot.lane.b32.xlu1 %v791_v28, %s4352_s12  ;;  %v3855_v34 = vpack.c.bf16 %v1270_v33, %v1269_v32 }
 0x204   : > { %775 = vst.msk [vmem:[#allocation3 + $0x38] sm:$0xff] %vm766_vm14, %v764_v37 }
 0x207   : > { %886 = vrot.lane.b32.xlu0 %v781_v29, %s4350_s13  ;;  %955 = vrot.lane.b32.xlu1 %v791_v28, %s4354_s20  ;;  %v4355_v28 = vmov 0.0|0.0  }
 0x208   : > { %3848 = vmatprep.subr.bf16.mxu0 %v4355_v28 }
 0x20a   : > { %v795_v40 = vld [vmem:[#allocation3 + $0x41] ss:$2 sm:$0xff]  ;;  %v785_v41 = vld [vmem:[#allocation3 + $0x40] ss:$2 sm:$0xff] }
 0x20b   : > { %932 = vrot.lane.b32.xlu0 %v781_v29, %s4351_s10  ;;  %816 = vrot.lane.b32.xlu1 %v795_v40, %s4344_s7  ;;  %v783_v42 = vld [vmem:[#allocation3 + $0x30] ss:$2 sm:$0xff]  ;;  %802 = vst.msk [vmem:[#allocation11 + $0x1e] sm:$0x3] %vm801_vm0, %v785_v41  ;;  %v793_v43 = vld [vmem:[#allocation3 + $0x31] ss:$2 sm:$0xff] }
 0x20c   : > { %800 = vst.msk [vmem:[#allocation11 + $0x16] sm:$0xff] %vm766_vm14, %v783_v42  ;;  %vm922_vm14 = vcmask 392512   ;;  %vm968_vm0 = vcmask 523712  }
 0x20f   : > { %978 = vrot.lane.b32.xlu0 %v781_v29, %s4353_s14  ;;  %867 = vrot.lane.b32.xlu1 %v795_v40, %s4348_s11  ;;  %v3849_v29 = vpack.c.bf16 %v1266_v26, %v1265_v25 }
 0x211   : > { %3850 = vmatpush1.bf16.msra.mxu0 %v3849_v29 }
 0x212   : > { %3851 = vmatprep.subr.bf16.mxu0 %v4355_v28 }
 0x213   : > { %844 = vrot.lane.b32.xlu0 %v785_v41, %s4346_s9  ;;  %913 = vrot.lane.b32.xlu1 %v795_v40, %s4352_s12 }
 0x215   : > { %3853 = vmatpush1.bf16.msra.mxu0 %v3852_v31 }
 0x216   : > { %3854 = vmatprep.subr.bf16.mxu0 %v4355_v28 }
 0x217   : > { %890 = vrot.lane.b32.xlu0 %v785_v41, %s4350_s13  ;;  %936 = vrot.lane.b32.xlu1 %v785_v41, %s4351_s10 }
 0x219   : > { %3856 = vmatpush1.bf16.msra.mxu0 %v3855_v34  ;;  %v1279_v34 = vld [vmem:[%s6200_s1 + $0xdc] sm:$0xff] }
 0x21a   : > { %3857 = vmatprep.subr.bf16.mxu0 %v4355_v28 }
 0x21b   : > { %842 = vrot.lane.b32.xlu0 %v783_v42, %s4346_s9  ;;  %959 = vrot.lane.b32.xlu1 %v795_v40, %s4354_s20 }
 0x21f   : > { %888 = vrot.lane.b32.xlu0 %v783_v42, %s4350_s13  ;;  %814 = vrot.lane.b32.xlu1 %v793_v43, %s4344_s7  ;;  %s4358_s7 = smov 112  }
 0x223   : > { %934 = vrot.lane.b32.xlu0 %v783_v42, %s4351_s10  ;;  %865 = vrot.lane.b32.xlu1 %v793_v43, %s4348_s11  ;;  %s189_s11 = scalar_lea.vmem [#allocation18], %s188_s6 }
 0x227   : > { %957 = vrot.lane.b32.xlu0 %v793_v43, %s4354_s20  ;;  %911 = vrot.lane.b32.xlu1 %v793_v43, %s4352_s12  ;;  %s3171_s12 = sshll.u32 %s189_s11, 4  ;;  %s6159_s12 = int_to_ptr.vmem [resolvable:$true] %s3171_s12 }
 0x228   : > { %s4278_s27 = scalar_lea.vmem %s6159_s12, 16 }
 0x229   : > { %p4279_p11 = scmp.ne.s32.totalorder %s6159_s12, %s4278_s27 }
 0x22b   : > { %980 = vrot.lane.b32.xlu0 %v783_v42, %s4353_s14  ;;  %982 = vrot.lane.b32.xlu1 %v785_v41, %s4353_s14  ;;  %p4280_p12 = pnand %p4279_p11, %p4424_p5 }
 0x22d   : > { %p4281_p13 = pneg %p4280_p12 }
 0x230   : > { %v809_v44 = vpop.permute.xlu0 %808  ;;  %v837_v45 = vpop.permute.xlu1 %836 }
 0x231   : > { %824 = vst.msk [vmem:[#allocation11 - $0x2] sm:$0xfc] %vm823_vm1, %v809_v44  ;;  %vm991_vm1 = vcmask 589312  }
 0x232   : > { %852 = vst.msk [vmem:[#allocation11 - $0x3] sm:$0xf8] %vm851_vm3, %v837_v45  ;;  %vm1015_vm3 = vcmask 588800  }
 0x234   : > { %v860_v46 = vpop.permute.xlu0 %859  ;;  %v883_v47 = vpop.permute.xlu1 %882 }
 0x235   : > { %875 = vst.msk [vmem:[#allocation11 - $0x3] sm:$0xf8] %vm874_vm5, %v860_v46  ;;  %vm829_vm5 = vcmask 123968  }
 0x236   : > { %898 = vst.msk [vmem:[#allocation11 - $0x4] sm:$0xf0] %vm897_vm6, %v883_v47  ;;  %vm857_vm6 = vcmask 190592  }
 0x238   : > { %v929_v48 = vpop.permute.xlu0 %928  ;;  %v906_v49 = vpop.permute.xlu1 %905 }
 0x239   : > { %921 = vst.msk [vmem:[#allocation11 - $0x4] sm:$0xf0] %vm920_vm8, %v906_v49  ;;  %vm880_vm8 = vcmask 256192   ;;  %v1272_v49 = vld [vmem:[%s6200_s1 + $0xa4] sm:$0xff] }
 0x23a   : > { %944 = vst.msk [vmem:[#allocation11 - $0x5] sm:$0xe0] %vm943_vm4, %v929_v48  ;;  %vm903_vm4 = vcmask 322816   ;;  %v1271_v48 = vld [vmem:[%s6200_s1 + $0x9c] sm:$0xff] }
 0x23c   : > { %v975_v50 = vpop.permute.xlu0 %974  ;;  %v952_v51 = vpop.permute.xlu1 %951 }
 0x23d   : > { %967 = vst.msk [vmem:[#allocation11 - $0x5] sm:$0xe0] %vm966_vm7, %v952_v51  ;;  %vm926_vm7 = vcmask 388416   ;;  %v1273_v51 = vld [vmem:[%s6200_s1 + $0xac] sm:$0xff] }
 0x23e   : > { %990 = vst.msk [vmem:[#allocation11 - $0x6] sm:$0xc0] %vm989_vm10, %v975_v50  ;;  %vm949_vm10 = vcmask 455040   ;;  %v3858_v50 = vpack.c.bf16 %v1272_v49, %v1271_v48 }
 0x240   : > { %3859 = vmatpush1.bf16.msra.mxu0 %v3858_v50 }
 0x241   : > { %3860 = vmatprep.subr.bf16.mxu0 %v4355_v28 }
 0x250   : > { %v839_v52 = vpop.permute.xlu0 %838  ;;  %v811_v53 = vpop.permute.xlu1 %810 }
 0x251   : > { %826 = vst.msk [vmem:[#allocation11 + $0x6] sm:$0xff] %vm825_vm9, %v811_v53 }
 0x252   : > { %854 = vst.msk [vmem:[#allocation11 + $0x5] sm:$0xff] %vm853_vm11, %v839_v52  ;;  %v1274_v52 = vld [vmem:[%s6200_s1 + $0xb4] sm:$0xff] }
 0x254   : > { %v885_v54 = vpop.permute.xlu0 %884  ;;  %v862_v55 = vpop.permute.xlu1 %861 }
 0x255   : > { %877 = vst.msk [vmem:[#allocation11 + $0x5] sm:$0xff] %vm876_vm12, %v862_v55  ;;  %v3861_v55 = vpack.c.bf16 %v1274_v52, %v1273_v51 }
 0x256   : > { %900 = vst.msk [vmem:[#allocation11 + $0x4] sm:$0xff] %vm899_vm13, %v885_v54 }
 0x257   : > { %3862 = vmatpush1.bf16.msra.mxu0 %v3861_v55 }
 0x258   : > { %v908_v56 = vpop.permute.xlu0 %907  ;;  %v931_v57 = vpop.permute.xlu1 %930  ;;  %3863 = vmatprep.subr.bf16.mxu0 %v4355_v28 }
 0x259   : > { %923 = vst.msk [vmem:[#allocation11 + $0x4] sm:$0xff] %vm922_vm14, %v908_v56 }
 0x25a   : > { %946 = vst.msk [vmem:[#allocation11 + $0x3] sm:$0xff] %vm945_vm15, %v931_v57 }
 0x25c   : > { %v954_v58 = vpop.permute.xlu0 %953  ;;  %v977_v59 = vpop.permute.xlu1 %976 }
 0x25d   : > { %969 = vst.msk [vmem:[#allocation11 + $0x3] sm:$0xff] %vm968_vm0, %v954_v58 }
 0x25e   : > { %992 = vst.msk [vmem:[#allocation11 + $0x2] sm:$0xff] %vm991_vm1, %v977_v59 }
 0x265   : > { %v997_v60 = vld [vmem:[#allocation11] sm:$0xff] }
 0x266   : > { %3685 = vmatprep.mubr.msk.f32.mxu1 %vm1015_vm3, %v997_v60 }
 0x271   : > { %v813_v61 = vpop.permute.xlu0 %812  ;;  %v841_v62 = vpop.permute.xlu1 %840 }
 0x272   : > { %827 = vst.msk [vmem:[#allocation11 + $0xe] sm:$0xff] %vm825_vm9, %v813_v61 }
 0x273   : > { %855 = vst.msk [vmem:[#allocation11 + $0xd] sm:$0xff] %vm853_vm11, %v841_v62 }
 0x275   : > { %v864_v63 = vpop.permute.xlu0 %863  ;;  %v910_v1 = vpop.permute.xlu1 %909 }
 0x276   : > { %878 = vst.msk [vmem:[#allocation11 + $0xd] sm:$0xff] %vm876_vm12, %v864_v63 }
 0x279   : > { %v887_v2 = vpop.permute.xlu0 %886  ;;  %v956_v3 = vpop.permute.xlu1 %955 }
 0x27a   : > { %901 = vst.msk [vmem:[#allocation11 + $0xc] sm:$0xff] %vm899_vm13, %v887_v2 }
 0x27b   : > { %924 = vst.msk [vmem:[#allocation11 + $0xc] sm:$0xff] %vm922_vm14, %v910_v1 }
 0x27d   : > { %v933_v4 = vpop.permute.xlu0 %932  ;;  %v817_v5 = vpop.permute.xlu1 %816 }
 0x27e   : > { %947 = vst.msk [vmem:[#allocation11 + $0xb] sm:$0xff] %vm945_vm15, %v933_v4 }
 0x27f   : > { %830 = vst.msk [vmem:[#allocation11 + $0x1e] sm:$0x3] %vm829_vm5, %v817_v5  ;;  %vm972_vm5 = vcmask 520640  }
 0x280   : > { %970 = vst.msk [vmem:[#allocation11 + $0xb] sm:$0xff] %vm968_vm0, %v956_v3 }
 0x281   : > { %v979_v6 = vpop.permute.xlu0 %978  ;;  %v868_v7 = vpop.permute.xlu1 %867 }
 0x282   : > { %993 = vst.msk [vmem:[#allocation11 + $0xa] sm:$0xff] %vm991_vm1, %v979_v6 }
 0x285   : > { %v845_v8 = vpop.permute.xlu0 %844  ;;  %v914_v9 = vpop.permute.xlu1 %913 }
 0x289   : > { %v891_v10 = vpop.permute.xlu0 %890  ;;  %v937_v11 = vpop.permute.xlu1 %936  ;;  %v998_v12 = vld [vmem:[#allocation11 + $0x8] sm:$0xff] }
 0x28a   : > { %3686 = vmatmul.mubr.msk.f32.vlgmr.msra.gmra.mrb[0].mxu1 %vm1015_vm3, %v998_v12 }
 0x28d   : > { %v843_v13 = vpop.permute.xlu0 %842  ;;  %v960_v14 = vpop.permute.xlu1 %959 }
 0x291   : > { %v889_v15 = vpop.permute.xlu0 %888  ;;  %v815_v16 = vpop.permute.xlu1 %814 }
 0x292   : > { %828 = vst.msk [vmem:[#allocation11 + $0x16] sm:$0xff] %vm825_vm9, %v815_v16  ;;  %vm995_vm9 = vcmask 587264  }
 0x293   : > { %858 = vst.msk [vmem:[#allocation11 + $0x1d] sm:$0x7] %vm857_vm6, %v845_v8  ;;  %vm1205_vm6 = vcmask 654848  }
 0x294   : > { %856 = vst.msk [vmem:[#allocation11 + $0x15] sm:$0xff] %vm853_vm11, %v843_v13  ;;  %vm1117_vm11 = vcmask 130048  }
 0x295   : > { %881 = vst.msk [vmem:[#allocation11 + $0x1d] sm:$0x7] %vm880_vm8, %v868_v7  ;;  %v935_v17 = vpop.permute.xlu0 %934  ;;  %v866_v18 = vpop.permute.xlu1 %865  ;;  %vm1219_vm8 = vcmask 786048  }
 0x296   : > { %879 = vst.msk [vmem:[#allocation11 + $0x15] sm:$0xff] %vm876_vm12, %v866_v18  ;;  %vm1138_vm12 = vcmask 1045504  }
 0x297   : > { %904 = vst.msk [vmem:[#allocation11 + $0x1c] sm:$0xf] %vm903_vm4, %v891_v10  ;;  %vm1234_vm4 = vcmask 917248  }
 0x298   : > { %902 = vst.msk [vmem:[#allocation11 + $0x14] sm:$0xff] %vm899_vm13, %v889_v15  ;;  %vm1165_vm13 = vcmask 1044480   ;;  %v1276_v15 = vld [vmem:[%s6200_s1 + $0xc4] sm:$0xff] }
 0x299   : > { %927 = vst.msk [vmem:[#allocation11 + $0x1c] sm:$0xf] %vm926_vm7, %v914_v9  ;;  %v958_v19 = vpop.permute.xlu0 %957  ;;  %v912_v20 = vpop.permute.xlu1 %911  ;;  %vm1248_vm7 = vcmask 1048448  }
 0x29a   : > { %925 = vst.msk [vmem:[#allocation11 + $0x14] sm:$0xff] %vm922_vm14, %v912_v20  ;;  %vm1251_vm14 = vcmask 1041408  }
 0x29b   : > { %948 = vst.msk [vmem:[#allocation11 + $0x13] sm:$0xff] %vm945_vm15, %v935_v17  ;;  %vm1222_vm15 = vcmask 1042432  }
 0x29c   : > { %950 = vst.msk [vmem:[#allocation11 + $0x1b] sm:$0x1f] %vm949_vm10, %v937_v11  ;;  %vm1371_vm10 = vcmask 261120  }
 0x29d   : > { %971 = vst.msk [vmem:[#allocation11 + $0x13] sm:$0xff] %vm968_vm0, %v958_v19  ;;  %v981_v21 = vpop.permute.xlu0 %980  ;;  %v983_v22 = vpop.permute.xlu1 %982  ;;  %vm1162_vm0 = vcmask 261248  }
 0x29e   : > { %973 = vst.msk [vmem:[#allocation11 + $0x1b] sm:$0x1f] %vm972_vm5, %v960_v14  ;;  %v1275_v14 = vld [vmem:[%s6200_s1 + $0xbc] sm:$0xff]  ;;  %vm1390_vm5 = vcmask 523520  }
 0x29f   : > { %994 = vst.msk [vmem:[#allocation11 + $0x12] sm:$0xff] %vm991_vm1, %v981_v21  ;;  %v1277_v21 = vld [vmem:[%s6200_s1 + $0xcc] sm:$0xff]  ;;  %v3864_v25 = vpack.c.bf16 %v1276_v15, %v1275_v14  ;;  %vm1177_vm1 = vcmask 392448   ;;  %v1470_v14 = vld [vmem:[%s6200_s1 + $0x104] sm:$0xff] }
 0x2a0   : > { %996 = vst.msk [vmem:[#allocation11 + $0x1a] sm:$0x3f] %vm995_vm9, %v983_v22  ;;  %v1278_v22 = vld [vmem:[%s6200_s1 + $0xd4] sm:$0xff]  ;;  %v1487_v15 = vld [vmem:[%s6200_s1 + $0x18c] sm:$0xff]  ;;  %vm1403_vm9 = vcmask 785920  }
 0x2a1   : > { %1118 = vst.msk [vmem:[#allocation4] sm:$0xff] %vm1117_vm11, %v4342_v0  ;;  %1119 = vst.msk [vmem:[#allocation4 + $0x28] sm:$0xff] %vm1117_vm11, %v4342_v0  ;;  %3865 = vmatpush1.bf16.msra.mxu0 %v3864_v25  ;;  %v3867_v31 = vpack.c.bf16 %v1278_v22, %v1277_v21  ;;  %v3247_v22 = vld [vmem:[%s6201_s2 + $0x2] ss:$0 sm:$0xff]  ;;  %v1490_v25 = vld [vmem:[%s6200_s1 + $0x1a4] sm:$0xff] }
 0x2a2   : > { %3866 = vmatprep.subr.bf16.mxu0 %v4355_v28  ;;  %1372 = vst.msk [vmem:[#allocation5] sm:$0xff] %vm1371_vm10, %v4342_v0  ;;  %1373 = vst.msk [vmem:[#allocation5 + $0x18] sm:$0xff] %vm1371_vm10, %v4342_v0 }
 0x2a3   : > { %1668 = vst.msk [vmem:[#allocation6] sm:$0xff] %vm1371_vm10, %v4342_v0  ;;  %1669 = vst.msk [vmem:[#allocation6 + $0x18] sm:$0xff] %vm1371_vm10, %v4342_v0 }
 0x2a5   : > { %3868 = vmatpush1.bf16.msra.mxu0 %v3867_v31  ;;  %v1474_v31 = vld [vmem:[%s6200_s1 + $0x124] sm:$0xff] }
 0x2a6   : > { %v999_v23 = vld [vmem:[#allocation11 + $0x10] sm:$0xff]  ;;  %3869 = vmatprep.subr.bf16.mxu0 %v4355_v28 }
 0x2a7   : > { %v1000_v24 = vld [vmem:[#allocation11 + $0x18] sm:$0xff]  ;;  %3688 = vmatprep.mubr.msk.f32.mxu1 %vm1015_vm3, %v999_v23 }
 0x2a8   : > { %3689 = vmatmul.mubr.msk.f32.gmra.mrb[2].mxu1 %vm1015_vm3, %v1000_v24  ;;  %vm1191_vm3 = vcmask 523648  }
 0x35d   : > { %v3687_v36 = vpop.f32.mrb[0].mxu1 }
 0x35e   : > { %v1100_v37 = vadd.f32 %v3687_v36, %v3242_v35  ;;  %v1094_v38 = vpop.f32.mrb[1].mxu1 }
 0x35f   : > { %v1095_v39 = vadd.f32 %v3242_v35, %v1094_v38 }
 0x360   : > { %v1114_v40 = vmax.f32 %v1100_v37, 0.0 }
 0x361   : > { %v1113_v41 = vmax.f32 %v1095_v39, 0.0 }
 0x362   : > { %1121 = vst.msk [vmem:[#allocation4 + $0x10] sm:$0xff] %vm1117_vm11, %v1114_v40 }
 0x363   : > { %1120 = vst.msk [vmem:[#allocation4 + $0x8] sm:$0xff] %vm1117_vm11, %v1113_v41 }
 0x36a   : > { %v4869_v53 = vld [vmem:[#allocation4 + $0x1] ss:$2 sm:$0xff]  ;;  %v4871_v54 = vld [vmem:[#allocation4] ss:$2 sm:$0xff] }
 0x36b   : > { %v1151_v58 = vrot.slane %v4869_v53, 2  ;;  %v1166_v60 = vrot.slane %v4871_v54, 3  ;;  %v1252_v63 = vrot.slane %v4871_v54, 6  ;;  %v1180_v9 = vrot.slane %v4869_v53, 3 }
 0x36c   : > { %v1194_v10 = vrot.slane %v4871_v54, 4  ;;  %v1139_v13 = vrot.slane %v4871_v54, 2  ;;  %v1208_v26 = vrot.slane %v4869_v53, 4  ;;  %v1223_v36 = vrot.slane %v4871_v54, 5 }
 0x37b   : > { %v3690_v42 = vpop.f32.mrb[2].mxu1 }
 0x37c   : > { %v1110_v43 = vadd.f32 %v3690_v42, %v3242_v35  ;;  %v1104_v44 = vpop.f32.mrb[3].mxu1  ;;  %v1281_v42 = vld [vmem:[%s6200_s1 + $0xec] sm:$0xff] }
 0x37d   : > { %v1105_v45 = vadd.f32 %v3242_v35, %v1104_v44  ;;  %v1280_v35 = vld [vmem:[%s6200_s1 + $0xe4] sm:$0xff]  ;;  %v1237_v44 = vrot.slane %v4869_v53, 5 }
 0x37e   : > { %v1116_v46 = vmax.f32 %v1110_v43, 0.0  ;;  %v3870_v39 = vpack.c.bf16 %v1280_v35, %v1279_v34  ;;  %v1282_v43 = vld [vmem:[%s6200_s1 + $0xf4] sm:$0xff]  ;;  %v1491_v34 = vld [vmem:[%s6200_s1 + $0x1ac] sm:$0xff] }
 0x37f   : > { %v1115_v47 = vmax.f32 %v1105_v45, 0.0  ;;  %v1492_v35 = vld [vmem:[%s6200_s1 + $0x1b4] sm:$0xff] }
 0x380   : > { %1123 = vst.msk [vmem:[#allocation4 + $0x20] sm:$0xff] %vm1117_vm11, %v1116_v46  ;;  %3871 = vmatpush1.bf16.msra.mxu0 %v3870_v39 }
 0x381   : > { %1122 = vst.msk [vmem:[#allocation4 + $0x18] sm:$0xff] %vm1117_vm11, %v1115_v47  ;;  %v3873_v47 = vpack.c.bf16 %v1282_v43, %v1281_v42  ;;  %3872 = vmatprep.subr.bf16.mxu0 %v4355_v28  ;;  %v1494_v42 = vld [vmem:[%s6200_s1 + $0x1c4] sm:$0xff]  ;;  %v1477_v43 = vld [vmem:[%s6200_s1 + $0x13c] sm:$0xff] }
 0x384   : > { %3874 = vmatpush1.bf16.msra.mxu0 %v3873_v47  ;;  %v1478_v47 = vld [vmem:[%s6200_s1 + $0x144] sm:$0xff] }
 0x385   : > { %3947 = vmatprep.subr.bf16.mxu0 %v4355_v28 }
 0x387   : > { %v4873_v56 = vld [vmem:[#allocation4 + $0x20] ss:$2 sm:$0xff]  ;;  %v4892_v8 = vld [vmem:[#allocation4 + $0x21] ss:$2 sm:$0xff] }
 0x388   : > { %v4875_v57 = vld [vmem:[#allocation4 + $0x11] ss:$2 sm:$0xff]  ;;  %v4878_v59 = vld [vmem:[#allocation4 + $0x10] ss:$2 sm:$0xff]  ;;  %v1255_v3 = vrot.slane %v4873_v56, 6  ;;  %v1154_v12 = vrot.slane %v4892_v8, 2 }
 0x389   : > { %v1152_v61 = vrot.slane %v4875_v57, 2  ;;  %v1167_v62 = vrot.slane %v4878_v59, 3  ;;  %v1253_v1 = vrot.slane %v4878_v59, 6  ;;  %v1181_v2 = vrot.slane %v4875_v57, 3 }
 0x38a   : > { %v1195_v7 = vrot.slane %v4878_v59, 4  ;;  %v1140_v18 = vrot.slane %v4878_v59, 2  ;;  %v1142_v19 = vrot.slane %v4873_v56, 2  ;;  %v1209_v20 = vrot.slane %v4875_v57, 4 }
 0x38b   : > { %v1153_v4 = vsel %vm1138_vm12, %v1151_v58, %v1152_v61  ;;  %v1168_v5 = vsel %vm1165_vm13, %v1166_v60, %v1167_v62  ;;  %v1254_v6 = vsel %vm1251_vm14, %v1252_v63, %v1253_v1  ;;  %v1256_v11 = vsel %vm1251_vm14, %v1253_v1, %v1255_v3 }
 0x38c   : > { %1156 = vrot.lane.b32.xlu0 %v1153_v4, %s4346_s9  ;;  %1259 = vst.msk [vmem:[#allocation12 + $0x8] sm:$0xff] %vm1117_vm11, %v1254_v6  ;;  %1171 = vrot.lane.b32.xlu1 %v1168_v5, %s4350_s13  ;;  %1260 = vst.msk [vmem:[#allocation12 + $0x18] sm:$0xff] %vm1117_vm11, %v1256_v11  ;;  %v1182_v16 = vsel %vm1165_vm13, %v1180_v9, %v1181_v2  ;;  %v1196_v17 = vsel %vm649_vm2, %v1194_v10, %v1195_v7  ;;  %v1169_v30 = vrot.slane %v4873_v56, 3  ;;  %v1485_v10 = vld [vmem:[%s6200_s1 + $0x17c] sm:$0xff]  ;;  %v1486_v11 = vld [vmem:[%s6200_s1 + $0x184] sm:$0xff] }
 0x38d   : > { %v1141_v23 = vsel %vm1138_vm12, %v1139_v13, %v1140_v18  ;;  %v1143_v24 = vsel %vm1138_vm12, %v1140_v18, %v1142_v19  ;;  %v1155_v27 = vsel %vm1138_vm12, %v1152_v61, %v1154_v12  ;;  %v1210_v32 = vsel %vm649_vm2, %v1208_v26, %v1209_v20  ;;  %v1469_v12 = vld [vmem:[%s6200_s1 + $0xfc] sm:$0xff]  ;;  %v1471_v19 = vld [vmem:[%s6200_s1 + $0x10c] sm:$0xff] }
 0x38e   : > { %1146 = vst.msk [vmem:[#allocation12] sm:$0xff] %vm1117_vm11, %v1141_v23  ;;  %1147 = vst.msk [vmem:[#allocation12 + $0x10] sm:$0xff] %vm1117_vm11, %v1143_v24  ;;  %v1224_v33 = vrot.slane %v4878_v59, 5  ;;  %v1170_v37 = vsel %vm1165_vm13, %v1167_v62, %v1169_v30  ;;  %v1183_v38 = vrot.slane %v4892_v8, 3  ;;  %v1238_v41 = vrot.slane %v4875_v57, 5  ;;  %v1489_v24 = vld [vmem:[%s6200_s1 + $0x19c] sm:$0xff] }
 0x38f   : > { %v1197_v46 = vrot.slane %v4873_v56, 4  ;;  %v1211_v49 = vrot.slane %v4892_v8, 4  ;;  %v1226_v51 = vrot.slane %v4873_v56, 5  ;;  %v1240_v53 = vrot.slane %v4892_v8, 5  ;;  %v1473_v26 = vld [vmem:[%s6200_s1 + $0x11c] sm:$0xff] }
 0x390   : > { %1185 = vrot.lane.b32.xlu0 %v1182_v16, %s4351_s10  ;;  %1199 = vrot.lane.b32.xlu1 %v1196_v17, %s4353_s14  ;;  %v1225_v40 = vsel %vm1222_vm15, %v1223_v36, %v1224_v33  ;;  %v1184_v45 = vsel %vm1165_vm13, %v1181_v2, %v1183_v38  ;;  %v1239_v48 = vsel %vm1222_vm15, %v1237_v44, %v1238_v41  ;;  %v1488_v16 = vld [vmem:[%s6200_s1 + $0x194] sm:$0xff]  ;;  %v1475_v36 = vld [vmem:[%s6200_s1 + $0x12c] sm:$0xff] }
 0x391   : > { %v1198_v50 = vsel %vm649_vm2, %v1195_v7, %v1197_v46  ;;  %v1212_v52 = vsel %vm649_vm2, %v1209_v20, %v1211_v49  ;;  %v1227_v54 = vsel %vm1222_vm15, %v1224_v33, %v1226_v51  ;;  %v1241_v55 = vsel %vm1222_vm15, %v1238_v41, %v1240_v53  ;;  %v1472_v20 = vld [vmem:[%s6200_s1 + $0x114] sm:$0xff]  ;;  %v1493_v41 = vld [vmem:[%s6200_s1 + $0x1bc] sm:$0xff]  ;;  %v1495_v53 = vld [vmem:[%s6200_s1 + $0x1cc] sm:$0xff] }
 0x392   : > { %v3875_v13 = vpack.c.bf16 %v1486_v11, %v1485_v10  ;;  %v3877_v17 = vpack.c.bf16 %v1470_v14, %v1469_v12  ;;  %v3879_v18 = vpack.c.bf16 %v1488_v16, %v1487_v15  ;;  %v3881_v21 = vpack.c.bf16 %v1472_v20, %v1471_v19  ;;  %v1476_v38 = vld [vmem:[%s6200_s1 + $0x134] sm:$0xff]  ;;  %v1499_v10 = vld [vmem:[%s6200_s1 + $0x1ec] sm:$0xff]  ;;  %v1502_v19 = vld [vmem:[%s6200_s1 + $0x204] sm:$0xff] }
 0x393   : > { %v1262_v29 = vld [vmem:[#allocation12 + $0x8] sm:$0xff]  ;;  %v1264_v8 = vld [vmem:[#allocation12 + $0x18] sm:$0xff]  ;;  %v3883_v30 = vpack.c.bf16 %v1490_v25, %v1489_v24  ;;  %v3889_v39 = vpack.c.bf16 %v1476_v38, %v1475_v36  ;;  %v3891_v46 = vpack.c.bf16 %v1494_v42, %v1493_v41 }
 0x394   : > { %1158 = vrot.lane.b32.xlu0 %v1155_v27, %s4346_s9  ;;  %3248 = vmatprep.mubr.msk.f32.mxu0 %vm1117_vm11, %v1262_v29  ;;  %v1500_v11 = vld [vmem:[%s6200_s1 + $0x1f4] sm:$0xff]  ;;  %v1483_v12 = vld [vmem:[%s6200_s1 + $0x16c] sm:$0xff] }
 0x395   : > { %1213 = vrot.lane.b32.xlu1 %v1210_v32, %s4356_s29  ;;  %3876 = vmatprep.subr.bf16.mxu1 %v3875_v13  ;;  %v3885_v32 = vpack.c.bf16 %v1474_v31, %v1473_v26  ;;  %v3903_v13 = vpack.c.bf16 %v1500_v11, %v1499_v10  ;;  %v1484_v14 = vld [vmem:[%s6200_s1 + $0x174] sm:$0xff]  ;;  %v1503_v36 = vld [vmem:[%s6200_s1 + $0x20c] sm:$0xff] }
 0x396   : > { %3878 = vmatpush3.bf16.msra.mxu1 %v3877_v17  ;;  %v3905_v15 = vpack.c.bf16 %v1484_v14, %v1483_v12  ;;  %v1749_v11 = vld [vmem:[%s6200_s1 + $0x24c] sm:$0xff]  ;;  %v1750_v12 = vld [vmem:[%s6200_s1 + $0x254] sm:$0xff] }
 0x397   : > { %3880 = vmatprep.subr.bf16.mxu1 %v3879_v18  ;;  %v1501_v18 = vld [vmem:[%s6200_s1 + $0x1fc] sm:$0xff] }
 0x398   : > { %1173 = vrot.lane.b32.xlu0 %v1170_v37, %s4350_s13  ;;  %v3887_v37 = vpack.c.bf16 %v1492_v35, %v1491_v34  ;;  %v3907_v20 = vpack.c.bf16 %v1502_v19, %v1501_v18  ;;  %v3250_v19 = vld [vmem:[%s6201_s2 + $0x3] ss:$0 sm:$0xff] }
 0x399   : > { %1228 = vrot.lane.b32.xlu1 %v1225_v40, %s4357_s8 }
 0x39a   : > { %3882 = vmatpush3.bf16.msra.mxu1 %v3881_v21 }
 0x39b   : > { %3884 = vmatprep.subr.bf16.mxu1 %v3883_v30 }
 0x39c   : > { %1187 = vrot.lane.b32.xlu0 %v1184_v45, %s4351_s10  ;;  %s3268_s10 = sshll.u32 %s4407_s19, 4  ;;  %s4360_s19 = smov [#allocation18]  }
 0x39d   : > { %1242 = vrot.lane.b32.xlu1 %v1239_v48, %s4358_s7  ;;  %v3893_v48 = vpack.c.bf16 %v1478_v47, %v1477_v43  ;;  %v1775_v47 = vld [vmem:[%s6200_s1 + $0x31c] sm:$0xff]  ;;  %s6157_s22 = scalar_lea.hbm %s6203_s4, %s3268_s10 }
 0x39e   : > { %3886 = vmatpush3.bf16.msra.mxu1 %v3885_v32 }
 0x39f   : > { %3888 = vmatprep.subr.bf16.mxu1 %v3887_v37  ;;  %v1504_v37 = vld [vmem:[%s6200_s1 + $0x214] sm:$0xff] }
 0x3a0   : > { %1201 = vrot.lane.b32.xlu0 %v1198_v50, %s4353_s14 }
 0x3a1   : > { %1215 = vrot.lane.b32.xlu1 %v1212_v52, %s4356_s29 }
 0x3a2   : > { %3890 = vmatpush3.bf16.msra.mxu1 %v3889_v39 }
 0x3a3   : > { %3892 = vmatprep.subr.bf16.mxu1 %v3891_v46 }
 0x3a4   : > { %1230 = vrot.lane.b32.xlu0 %v1227_v54, %s4357_s8  ;;  %v1496_v54 = vld [vmem:[%s6200_s1 + $0x1d4] sm:$0xff] }
 0x3a5   : > { %1244 = vrot.lane.b32.xlu1 %v1241_v55, %s4358_s7  ;;  %v1479_v55 = vld [vmem:[%s6200_s1 + $0x14c] sm:$0xff] }
 0x3a6   : > { %3894 = vmatpush3.bf16.msra.mxu1 %v3893_v48  ;;  %v1776_v48 = vld [vmem:[%s6200_s1 + $0x324] sm:$0xff] }
 0x3fe   : > { %v1157_v56 = vpop.permute.xlu0 %1156  ;;  %v1172_v57 = vpop.permute.xlu1 %1171 }
 0x3ff   : > { %1163 = vst.msk [vmem:[#allocation12] sm:$0xff] %vm1162_vm0, %v1157_v56  ;;  %v1480_v56 = vld [vmem:[%s6200_s1 + $0x154] sm:$0xff] }
 0x400   : > { %1178 = vst.msk [vmem:[#allocation12] sm:$0xff] %vm1177_vm1, %v1172_v57 }
 0x402   : > { %v1186_v58 = vpop.permute.xlu0 %1185  ;;  %v1200_v59 = vpop.permute.xlu1 %1199 }
 0x403   : > { %1192 = vst.msk [vmem:[#allocation12] sm:$0xff] %vm1191_vm3, %v1186_v58  ;;  %v3895_v58 = vpack.c.bf16 %v1496_v54, %v1495_v53  ;;  %v1759_v53 = vld [vmem:[%s6200_s1 + $0x29c] sm:$0xff]  ;;  %v1760_v54 = vld [vmem:[%s6200_s1 + $0x2a4] sm:$0xff] }
 0x404   : > { %1206 = vst.msk [vmem:[#allocation12] sm:$0xff] %vm1205_vm6, %v1200_v59  ;;  %v3897_v59 = vpack.c.bf16 %v1480_v56, %v1479_v55  ;;  %v1743_v55 = vld [vmem:[%s6200_s1 + $0x21c] sm:$0xff]  ;;  %v3915_v56 = vpack.c.bf16 %v1760_v54, %v1759_v53 }
 0x405   : > { %3896 = vmatprep.subr.bf16.mxu1 %v3895_v58  ;;  %v1761_v58 = vld [vmem:[%s6200_s1 + $0x2ac] sm:$0xff] }
 0x406   : > { %v1159_v60 = vpop.permute.xlu0 %1158  ;;  %3898 = vmatpush3.bf16.msra.mxu1 %v3897_v59  ;;  %v1762_v59 = vld [vmem:[%s6200_s1 + $0x2b4] sm:$0xff] }
 0x407   : > { %1164 = vst.msk [vmem:[#allocation12 + $0x10] sm:$0xff] %vm1162_vm0, %v1159_v60  ;;  %v1214_v61 = vpop.permute.xlu1 %1213  ;;  %v1497_v60 = vld [vmem:[%s6200_s1 + $0x1dc] sm:$0xff]  ;;  %vm4359_vm0 = vmmov 0  }
 0x408   : > { %1220 = vst.msk [vmem:[#allocation12] sm:$0xff] %vm1219_vm8, %v1214_v61  ;;  %v1498_v61 = vld [vmem:[%s6200_s1 + $0x1e4] sm:$0xff] }
 0x40a   : > { %v1174_v62 = vpop.permute.xlu0 %1173 }
 0x40b   : > { %1179 = vst.msk [vmem:[#allocation12 + $0x10] sm:$0xff] %vm1177_vm1, %v1174_v62  ;;  %v1229_v63 = vpop.permute.xlu1 %1228  ;;  %v1481_v62 = vld [vmem:[%s6200_s1 + $0x15c] sm:$0xff]  ;;  %vm2296_vm1 = vcmask 1044484  }
 0x40c   : > { %1235 = vst.msk [vmem:[#allocation12] sm:$0xff] %vm1234_vm4, %v1229_v63  ;;  %v3899_v63 = vpack.c.bf16 %v1498_v61, %v1497_v60  ;;  %v3919_v61 = vpack.c.bf16 %v1762_v59, %v1761_v58 }
 0x40e   : > { %v1188_v1 = vpop.permute.xlu0 %1187  ;;  %3900 = vmatprep.subr.bf16.mxu1 %v3899_v63  ;;  %v1746_v63 = vld [vmem:[%s6200_s1 + $0x234] sm:$0xff] }
 0x40f   : > { %1193 = vst.msk [vmem:[#allocation12 + $0x10] sm:$0xff] %vm1191_vm3, %v1188_v1  ;;  %v1243_v2 = vpop.permute.xlu1 %1242  ;;  %v1482_v1 = vld [vmem:[%s6200_s1 + $0x164] sm:$0xff]  ;;  %vm2275_vm3 = vcmask 1045508  }
 0x410   : > { %1249 = vst.msk [vmem:[#allocation12] sm:$0xff] %vm1248_vm7, %v1243_v2  ;;  %v3901_v2 = vpack.c.bf16 %v1482_v1, %v1481_v62  ;;  %v1745_v62 = vld [vmem:[%s6200_s1 + $0x22c] sm:$0xff]  ;;  %v1763_v1 = vld [vmem:[%s6200_s1 + $0x2bc] sm:$0xff] }
 0x412   : > { %v1202_v3 = vpop.permute.xlu0 %1201  ;;  %3902 = vmatpush3.bf16.msra.mxu1 %v3901_v2  ;;  %v1764_v2 = vld [vmem:[%s6200_s1 + $0x2c4] sm:$0xff] }
 0x413   : > { %1207 = vst.msk [vmem:[#allocation12 + $0x10] sm:$0xff] %vm1205_vm6, %v1202_v3  ;;  %v1216_v4 = vpop.permute.xlu1 %1215  ;;  %3904 = vmatprep.subr.bf16.mxu1 %v3903_v13  ;;  %v3929_v13 = vpack.c.bf16 %v1750_v12, %v1749_v11  ;;  %v1757_v11 = vld [vmem:[%s6200_s1 + $0x28c] sm:$0xff]  ;;  %v1758_v12 = vld [vmem:[%s6200_s1 + $0x294] sm:$0xff]  ;;  %vm2282_vm6 = vcmask 519168  }
 0x414   : > { %1221 = vst.msk [vmem:[#allocation12 + $0x10] sm:$0xff] %vm1219_vm8, %v1216_v4  ;;  %vm2319_vm8 = vcmask 1046532  }
 0x416   : > { %v1231_v5 = vpop.permute.xlu0 %1230  ;;  %3906 = vmatpush3.bf16.msra.mxu1 %v3905_v15 }
 0x417   : > { %1236 = vst.msk [vmem:[#allocation12 + $0x10] sm:$0xff] %vm1234_vm4, %v1231_v5  ;;  %v1245_v6 = vpop.permute.xlu1 %1244  ;;  %v1261_v7 = vld [vmem:[#allocation12] sm:$0xff]  ;;  %3908 = vmatprep.subr.bf16.mxu1 %v3907_v20 }
 0x418   : > { %1250 = vst.msk [vmem:[#allocation12 + $0x10] sm:$0xff] %vm1248_vm7, %v1245_v6  ;;  %1359 = vmatmul.mubr.f32.vlgmr.msra.gmra.mrb[8].mxu0 %v1261_v7  ;;  %vm5731_vm7 = vmor %vm1251_vm14, %vm2275_vm3 }
 0x419   : > { %3249 = vmatprep.mubr.msk.f32.mxu0 %vm1117_vm11, %v1264_v8  ;;  %vm1416_vm11 = vcmask 1048320  }
 0x41f   : > { %v1263_v9 = vld [vmem:[#allocation12 + $0x10] sm:$0xff] }
 0x420   : > { %1364 = vmatmul.mubr.f32.gmra.mrb[10].mxu0 %v1263_v9 }
 0x421   : > { %3710 = vmatprep.mubr.msk.f32.mxu0 %vm4359_vm0, %v4342_v0 }
 0x4eb   : > { %v1360_v23 = vpop.f32.mrb[8].mxu0 }
 0x4ec   : > { %v1361_v27 = vadd.f32 %v3247_v22, %v1360_v23  ;;  %v1362_v29 = vpop.f32.mrb[9].mxu0 }
 0x4ee   : > { %v1369_v33 = vmax.f32 %v1361_v27, 0.0 }
 0x4f0   : > { %1374 = vst.msk [vmem:[#allocation5 + $0x8] sm:$0xff] %vm1371_vm10, %v1369_v33 }
 0x4f3   : > { %v1365_v40 = vpop.f32.mrb[10].mxu0 }
 0x4f4   : > { %v1366_v44 = vadd.f32 %v3247_v22, %v1365_v40  ;;  %v1367_v45 = vpop.f32.mrb[11].mxu0  ;;  %v3911_v40 = vpack.c.bf16 %v1504_v37, %v1503_v36  ;;  %v1769_v36 = vld [vmem:[%s6200_s1 + $0x2ec] sm:$0xff]  ;;  %v1770_v37 = vld [vmem:[%s6200_s1 + $0x2f4] sm:$0xff] }
 0x4f6   : > { %v1370_v49 = vmax.f32 %v1366_v44, 0.0 }
 0x4f7   : > { %v1380_v50 = vld [vmem:[#allocation5 + $0x5] sm:$0xff] }
 0x4f8   : > { %1375 = vst.msk [vmem:[#allocation5 + $0x10] sm:$0xff] %vm1371_vm10, %v1370_v49  ;;  %1384 = vrot.lane.b32.xlu1 %v1380_v50, %s4350_s13  ;;  %v1376_v51 = vld [vmem:[#allocation5 + $0x4] sm:$0xff]  ;;  %v3948_v49 = vpack.c.bf16 %v1776_v48, %v1775_v47  ;;  %v1777_v50 = vld [vmem:[%s6200_s1 + $0x32c] sm:$0xff] }
 0x4f9   : > { %v1419_v52 = vld [vmem:[#allocation5 + $0x8] sm:$0xff]  ;;  %1378 = vst.msk [vmem:[#allocation13] sm:$0xff] %vm1371_vm10, %v1376_v51 }
 0x4fa   : > { %1421 = vst.msk [vmem:[#allocation13 + $0x8] sm:$0xff] %vm1371_vm10, %v1419_v52  ;;  %v1393_v57 = vld [vmem:[#allocation5 + $0x6] sm:$0xff]  ;;  %3949 = vmatpush3.bf16.msra.mxu0 %v3948_v49 }
 0x4fb   : > { %v1406_v3 = vld [vmem:[#allocation5 + $0x7] sm:$0xff]  ;;  %3950 = vmatprep.subr.bf16.mxu0 %v4355_v28 }
 0x4fc   : > { %1397 = vrot.lane.b32.xlu1 %v1393_v57, %s4353_s14  ;;  %v1778_v51 = vld [vmem:[%s6200_s1 + $0x334] sm:$0xff]  ;;  %v1744_v57 = vld [vmem:[%s6200_s1 + $0x224] sm:$0xff] }
 0x4fd   : > { %v3951_v52 = vpack.c.bf16 %v1778_v51, %v1777_v50  ;;  %v3917_v60 = vpack.c.bf16 %v1744_v57, %v1743_v55 }
 0x4ff   : > { %v1459_v4 = vld [vmem:[#allocation5 + $0xc] sm:$0xff]  ;;  %v1460_v5 = vld [vmem:[#allocation5 + $0x14] sm:$0xff]  ;;  %3952 = vmatpush3.bf16.msra.mxu0 %v3951_v52 }
 0x500   : > { %v1423_v6 = vld [vmem:[#allocation5 + $0x9] sm:$0xff]  ;;  %1462 = vst.msk [vmem:[#allocation13 + $0x28] sm:$0xff] %vm1371_vm10, %v1460_v5  ;;  %1461 = vst.msk [vmem:[#allocation13 + $0x10] sm:$0xff] %vm1371_vm10, %v1459_v4  ;;  %1410 = vrot.lane.b32.xlu1 %v1406_v3, %s4357_s8  ;;  %v1424_v22 = vld [vmem:[#allocation5 + $0x11] sm:$0xff]  ;;  %v3921_v3 = vpack.c.bf16 %v1746_v63, %v1745_v62 }
 0x501   : > { %1427 = vrot.lane.b32.xlu0 %v1423_v6, %s4350_s13  ;;  %1379 = vst.msk [vmem:[#allocation13 + $0x18] sm:$0xff] %vm1371_vm10, %v1459_v4  ;;  %v1381_v7 = vld [vmem:[#allocation5 + $0xd] sm:$0xff]  ;;  %v3923_v4 = vpack.c.bf16 %v1764_v2, %v1763_v1  ;;  %v1773_v1 = vld [vmem:[%s6200_s1 + $0x30c] sm:$0xff]  ;;  %v1774_v2 = vld [vmem:[%s6200_s1 + $0x314] sm:$0xff] }
 0x502   : > { %v1435_v8 = vld [vmem:[#allocation5 + $0xa] sm:$0xff]  ;;  %v1436_v23 = vld [vmem:[#allocation5 + $0x12] sm:$0xff] }
 0x503   : > { %v1420_v9 = vld [vmem:[#allocation5 + $0x10] sm:$0xff] }
 0x504   : > { %1422 = vst.msk [vmem:[#allocation13 + $0x20] sm:$0xff] %vm1371_vm10, %v1420_v9  ;;  %1386 = vrot.lane.b32.xlu1 %v1381_v7, %s4350_s13  ;;  %v1394_v16 = vld [vmem:[#allocation5 + $0xe] sm:$0xff]  ;;  %v1765_v7 = vld [vmem:[%s6200_s1 + $0x2cc] sm:$0xff] }
 0x505   : > { %1439 = vrot.lane.b32.xlu0 %v1435_v8, %s4353_s14  ;;  %v1447_v17 = vld [vmem:[#allocation5 + $0xb] sm:$0xff]  ;;  %v1448_v24 = vld [vmem:[#allocation5 + $0x13] sm:$0xff] }
 0x506   : > { %v1407_v21 = vld [vmem:[#allocation5 + $0xf] sm:$0xff]  ;;  %v1766_v8 = vld [vmem:[%s6200_s1 + $0x2d4] sm:$0xff] }
 0x507   : > { %v1465_v45 = vld [vmem:[#allocation13 + $0x10] sm:$0xff]  ;;  %v1468_v46 = vld [vmem:[#allocation13 + $0x28] sm:$0xff]  ;;  %v3927_v10 = vpack.c.bf16 %v1766_v8, %v1765_v7 }
 0x508   : > { %1399 = vrot.lane.b32.xlu1 %v1394_v16, %s4353_s14  ;;  %v1747_v5 = vld [vmem:[%s6200_s1 + $0x23c] sm:$0xff]  ;;  %v1748_v6 = vld [vmem:[%s6200_s1 + $0x244] sm:$0xff] }
 0x509   : > { %1451 = vrot.lane.b32.xlu0 %v1447_v17, %s4357_s8  ;;  %v3925_v9 = vpack.c.bf16 %v1748_v6, %v1747_v5  ;;  %v1756_v62 = vld [vmem:[%s6200_s1 + $0x284] sm:$0xff] }
 0x50c   : > { %1412 = vrot.lane.b32.xlu1 %v1407_v21, %s4357_s8 }
 0x50d   : > { %1429 = vrot.lane.b32.xlu0 %v1424_v22, %s4350_s13 }
 0x511   : > { %1441 = vrot.lane.b32.xlu0 %v1436_v23, %s4353_s14 }
 0x515   : > { %1453 = vrot.lane.b32.xlu0 %v1448_v24, %s4357_s8 }
 0x56a   : > { %v1385_v25 = vpop.permute.xlu1 %1384 }
 0x56b   : > { %1391 = vst.msk [vmem:[#allocation13] sm:$0xff] %vm1390_vm5, %v1385_v25 }
 0x56e   : > { %v1398_v26 = vpop.permute.xlu1 %1397 }
 0x56f   : > { %1404 = vst.msk [vmem:[#allocation13] sm:$0xff] %vm1403_vm9, %v1398_v26 }
 0x572   : > { %v1411_v27 = vpop.permute.xlu1 %1410 }
 0x573   : > { %v1428_v29 = vpop.permute.xlu0 %1427  ;;  %1417 = vst.msk [vmem:[#allocation13] sm:$0xff] %vm1416_vm11, %v1411_v27 }
 0x574   : > { %1433 = vst.msk [vmem:[#allocation13 + $0x8] sm:$0xff] %vm1390_vm5, %v1428_v29 }
 0x576   : > { %v1387_v30 = vpop.permute.xlu1 %1386 }
 0x577   : > { %v1440_v31 = vpop.permute.xlu0 %1439  ;;  %1392 = vst.msk [vmem:[#allocation13 + $0x18] sm:$0xff] %vm1390_vm5, %v1387_v30  ;;  %v1767_v30 = vld [vmem:[%s6200_s1 + $0x2dc] sm:$0xff] }
 0x578   : > { %1445 = vst.msk [vmem:[#allocation13 + $0x8] sm:$0xff] %vm1403_vm9, %v1440_v31  ;;  %v1768_v31 = vld [vmem:[%s6200_s1 + $0x2e4] sm:$0xff] }
 0x57a   : > { %v1400_v32 = vpop.permute.xlu1 %1399  ;;  %v1463_v41 = vld [vmem:[#allocation13] sm:$0xff] }
 0x57b   : > { %v1452_v33 = vpop.permute.xlu0 %1451  ;;  %1405 = vst.msk [vmem:[#allocation13 + $0x18] sm:$0xff] %vm1403_vm9, %v1400_v32  ;;  %v1751_v32 = vld [vmem:[%s6200_s1 + $0x25c] sm:$0xff] }
 0x57c   : > { %1457 = vst.msk [vmem:[#allocation13 + $0x8] sm:$0xff] %vm1416_vm11, %v1452_v33  ;;  %v3931_v33 = vpack.c.bf16 %v1768_v31, %v1767_v30 }
 0x57e   : > { %v1413_v34 = vpop.permute.xlu1 %1412 }
 0x57f   : > { %v1430_v35 = vpop.permute.xlu0 %1429  ;;  %1418 = vst.msk [vmem:[#allocation13 + $0x18] sm:$0xff] %vm1416_vm11, %v1413_v34  ;;  %v1752_v34 = vld [vmem:[%s6200_s1 + $0x264] sm:$0xff] }
 0x580   : > { %1434 = vst.msk [vmem:[#allocation13 + $0x20] sm:$0xff] %vm1390_vm5, %v1430_v35  ;;  %v3933_v35 = vpack.c.bf16 %v1752_v34, %v1751_v32  ;;  %v1988_v34 = vld [vmem:[%s6200_s1 + $0x3bc] sm:$0xff] }
 0x583   : > { %v1442_v38 = vpop.permute.xlu0 %1441  ;;  %v1464_v39 = vld [vmem:[#allocation13 + $0x8] sm:$0xff] }
 0x584   : > { %1446 = vst.msk [vmem:[#allocation13 + $0x20] sm:$0xff] %vm1403_vm9, %v1442_v38  ;;  %1580 = vmatprep.mubr.f32.mxu1 %v1464_v39  ;;  %v1753_v38 = vld [vmem:[%s6200_s1 + $0x26c] sm:$0xff]  ;;  %v3935_v39 = vpack.c.bf16 %v1770_v37, %v1769_v36  ;;  %v1972_v36 = vld [vmem:[%s6200_s1 + $0x33c] sm:$0xff] }
 0x585   : > { %1581 = vmatmul.mubr.f32.vlgmr.msra.gmra.mrb[4].mxu1 %v1463_v41 }
 0x586   : > { %3910 = vmatpush3.bf16.msra.mxu1 %v3907_v20  ;;  %v1466_v44 = vld [vmem:[#allocation13 + $0x18] sm:$0xff] }
 0x587   : > { %v1454_v42 = vpop.permute.xlu0 %1453  ;;  %3912 = vmatprep.subr.bf16.mxu1 %v3911_v40 }
 0x588   : > { %1458 = vst.msk [vmem:[#allocation13 + $0x20] sm:$0xff] %vm1416_vm11, %v1454_v42  ;;  %v1771_v42 = vld [vmem:[%s6200_s1 + $0x2fc] sm:$0xff] }
 0x58a   : > { %3914 = vmatpush3.bf16.msra.mxu1 %v3911_v40  ;;  %v1754_v40 = vld [vmem:[%s6200_s1 + $0x274] sm:$0xff] }
 0x58b   : > { %3916 = vmatprep.subr.bf16.mxu1 %v3915_v56  ;;  %v3937_v41 = vpack.c.bf16 %v1754_v40, %v1753_v38  ;;  %v1973_v38 = vld [vmem:[%s6200_s1 + $0x344] sm:$0xff]  ;;  %v1991_v40 = vld [vmem:[%s6200_s1 + $0x3d4] sm:$0xff] }
 0x58f   : > { %v1467_v43 = vld [vmem:[#allocation13 + $0x20] sm:$0xff] }
 0x590   : > { %1585 = vmatprep.mubr.f32.mxu1 %v1467_v43  ;;  %v1772_v43 = vld [vmem:[%s6200_s1 + $0x304] sm:$0xff] }
 0x591   : > { %1586 = vmatmul.mubr.f32.gmra.mrb[6].mxu1 %v1466_v44  ;;  %v3939_v47 = vpack.c.bf16 %v1772_v43, %v1771_v42  ;;  %v1974_v43 = vld [vmem:[%s6200_s1 + $0x34c] sm:$0xff] }
 0x592   : > { %3699 = vmatprep.mubr.msk.f32.mxu1 %vm1371_vm10, %v1465_v45 }
 0x595   : > { %3700 = vmatmul.mubr.msk.f32.vlgmr.msra.gmra.mrb[8].mxu1 %vm1371_vm10, %v1468_v46 }
 0x596   : > { %3918 = vmatpush3.bf16.msra.mxu1 %v3917_v60 }
 0x597   : > { %3920 = vmatprep.subr.bf16.mxu1 %v3919_v61  ;;  %v1755_v61 = vld [vmem:[%s6200_s1 + $0x27c] sm:$0xff] }
 0x59a   : > { %3922 = vmatpush3.bf16.msra.mxu1 %v3921_v3 }
 0x59b   : > { %3924 = vmatprep.subr.bf16.mxu1 %v3923_v4 }
 0x59e   : > { %3926 = vmatpush3.bf16.msra.mxu1 %v3925_v9 }
 0x59f   : > { %3928 = vmatprep.subr.bf16.mxu1 %v3927_v10 }
 0x5a2   : > { %3930 = vmatpush3.bf16.msra.mxu1 %v3929_v13 }
 0x5a3   : > { %3932 = vmatprep.subr.bf16.mxu1 %v3931_v33 }
 0x5a6   : > { %3934 = vmatpush3.bf16.msra.mxu1 %v3933_v35  ;;  %v1989_v35 = vld [vmem:[%s6200_s1 + $0x3c4] sm:$0xff] }
 0x5a7   : > { %3936 = vmatprep.subr.bf16.mxu1 %v3935_v39  ;;  %v3953_v37 = vpack.c.bf16 %v1989_v35, %v1988_v34  ;;  %v1990_v39 = vld [vmem:[%s6200_s1 + $0x3cc] sm:$0xff] }
 0x5a8   : > { %v3957_v42 = vpack.c.bf16 %v1991_v40, %v1990_v39  ;;  %v1982_v35 = vld [vmem:[%s6200_s1 + $0x38c] sm:$0xff]  ;;  %v3253_v40 = vld [vmem:[%s6201_s2 + $0x4] ss:$0 sm:$0xff] }
 0x5a9   : > { %3954 = vmatprep.subr.bf16.mxu0 %v3953_v37 }
 0x5aa   : > { %3938 = vmatpush3.bf16.msra.mxu1 %v3937_v41  ;;  %v3955_v41 = vpack.c.bf16 %v1973_v38, %v1972_v36  ;;  %v1983_v36 = vld [vmem:[%s6200_s1 + $0x394] sm:$0xff] }
 0x5ab   : > { %3940 = vmatprep.subr.bf16.mxu1 %v3939_v47  ;;  %v2004_v47 = vld [vmem:[%s6200_s1 + $0x43c] sm:$0xff]  ;;  %v3975_v38 = vpack.c.bf16 %v1983_v36, %v1982_v35 }
 0x5ac   : > { %v2040_v35 = vld [vmem:[%s6200_s1 + $0x55c] sm:$0xff] }
 0x658   : > { %v3330_v14 = vpop.f32.mrb[4].mxu1 }
 0x659   : > { %v3331_v15 = vpop.f32.mrb[5].mxu1 }
 0x65a   : > { %v3332_v16 = vadd.f32 %v3331_v15, %v3330_v14  ;;  %v3941_v15 = vpack.c.bf16 %v1756_v62, %v1755_v61  ;;  %v2007_v61 = vld [vmem:[%s6200_s1 + $0x454] sm:$0xff]  ;;  %v1994_v62 = vld [vmem:[%s6200_s1 + $0x3ec] sm:$0xff] }
 0x65c   : > { %v1583_v23 = vadd.f32 %v3332_v16, %v3250_v19  ;;  %v3943_v16 = vpack.c.bf16 %v1774_v2, %v1773_v1  ;;  %3942 = vmatpush3.bf16.msra.mxu1 %v3941_v15  ;;  %v1995_v1 = vld [vmem:[%s6200_s1 + $0x3f4] sm:$0xff] }
 0x65d   : > { %v2027_v15 = vld [vmem:[%s6200_s1 + $0x4f4] sm:$0xff] }
 0x65e   : > { %3944 = vmatprep.subr.bf16.mxu1 %v3943_v16 }
 0x664   : > { %v3333_v17 = vpop.f32.mrb[6].mxu1 }
 0x665   : > { %v3334_v18 = vpop.f32.mrb[7].mxu1 }
 0x666   : > { %v3335_v20 = vadd.f32 %v3334_v18, %v3333_v17 }
 0x668   : > { %v1588_v21 = vadd.f32 %v3335_v20, %v3250_v19  ;;  %v3701_v22 = vpop.f32.mrb[8].mxu1  ;;  %v3945_v19 = vpack.c.bf16 %v1758_v12, %v1757_v11  ;;  %v1996_v11 = vld [vmem:[%s6200_s1 + $0x3fc] sm:$0xff]  ;;  %v1997_v12 = vld [vmem:[%s6200_s1 + $0x404] sm:$0xff] }
 0x669   : > { %v1657_v24 = vpop.f32.mrb[9].mxu1 }
 0x66a   : > { %v1663_v25 = vadd.f32 %v3701_v22, %v1588_v21  ;;  %v1658_v26 = vadd.f32 %v1657_v24, %v1583_v23  ;;  %3946 = vmatpush3.bf16.msra.mxu1 %v3945_v19  ;;  %v2010_v19 = vld [vmem:[%s6200_s1 + $0x46c] sm:$0xff] }
 0x66c   : > { %v1667_v27 = vmax.f32 %v1663_v25, 0.0  ;;  %v1666_v29 = vmax.f32 %v1658_v26, 0.0 }
 0x66e   : > { %1671 = vst.msk [vmem:[#allocation6 + $0x10] sm:$0xff] %vm1371_vm10, %v1667_v27  ;;  %1670 = vst.msk [vmem:[#allocation6 + $0x8] sm:$0xff] %vm1371_vm10, %v1666_v29 }
 0x675   : > { %v1676_v44 = vld [vmem:[#allocation6 + $0x1] ss:$2 sm:$0xff]  ;;  %v1678_v45 = vld [vmem:[#allocation6 + $0x11] ss:$2 sm:$0xff]  ;;  %v1672_v46 = vld [vmem:[#allocation6] ss:$2 sm:$0xff] }
 0x676   : > { %v1714_v48 = vrot.slane %v1676_v44, 4  ;;  %v1715_v49 = vrot.slane %v1678_v45, 4  ;;  %v1688_v50 = vrot.slane %v1676_v44, 2  ;;  %v1689_v51 = vrot.slane %v1678_v45, 2  ;;  %v1674_v52 = vld [vmem:[#allocation6 + $0x10] ss:$2 sm:$0xff] }
 0x677   : > { %v1721_v53 = vrot.slane %v1672_v46, 5  ;;  %v1722_v54 = vrot.slane %v1674_v52, 5  ;;  %v1735_v55 = vrot.slane %v1672_v46, 6  ;;  %v1736_v56 = vrot.slane %v1674_v52, 6 }
 0x678   : > { %v1716_v57 = vsel %vm649_vm2, %v1714_v48, %v1715_v49  ;;  %v1690_v58 = vsel %vm1138_vm12, %v1688_v50, %v1689_v51  ;;  %v1695_v59 = vrot.slane %v1672_v46, 3  ;;  %v1696_v60 = vrot.slane %v1674_v52, 3  ;;  %v2005_v48 = vld [vmem:[%s6200_s1 + $0x444] sm:$0xff] }
 0x679   : > { %1717 = vrot.lane.b32.xlu0 %v1716_v57, %s4350_s13  ;;  %1691 = vrot.lane.b32.xlu1 %v1690_v58, %s4350_s13  ;;  %v1737_v63 = vsel %vm1251_vm14, %v1735_v55, %v1736_v56  ;;  %v1723_v3 = vsel %vm1222_vm15, %v1721_v53, %v1722_v54  ;;  %v1728_v4 = vrot.slane %v1676_v44, 5  ;;  %v1729_v5 = vrot.slane %v1678_v45, 5  ;;  %v1993_v53 = vld [vmem:[%s6200_s1 + $0x3e4] sm:$0xff]  ;;  %v1976_v54 = vld [vmem:[%s6200_s1 + $0x35c] sm:$0xff] }
 0x67a   : > { %1739 = vst.msk [vmem:[#allocation14 + $0x10] sm:$0xff] %vm1371_vm10, %v1737_v63  ;;  %v1710_v6 = vrot.slane %v1674_v52, 4  ;;  %v1697_v7 = vsel %vm1165_vm13, %v1695_v59, %v1696_v60  ;;  %v1709_v8 = vrot.slane %v1672_v46, 4  ;;  %v1682_v9 = vrot.slane %v1674_v52, 2  ;;  %v1992_v52 = vld [vmem:[%s6200_s1 + $0x3dc] sm:$0xff]  ;;  %v1977_v56 = vld [vmem:[%s6200_s1 + $0x364] sm:$0xff] }
 0x67b   : > { %v1681_v10 = vrot.slane %v1672_v46, 2  ;;  %v1702_v13 = vrot.slane %v1676_v44, 3  ;;  %v1703_v14 = vrot.slane %v1678_v45, 3  ;;  %v1730_v20 = vsel %vm1222_vm15, %v1728_v4, %v1729_v5  ;;  %v1975_v44 = vld [vmem:[%s6200_s1 + $0x354] sm:$0xff]  ;;  %v2020_v45 = vld [vmem:[%s6200_s1 + $0x4bc] sm:$0xff]  ;;  %v2021_v46 = vld [vmem:[%s6200_s1 + $0x4c4] sm:$0xff] }
 0x67c   : > { %v1711_v17 = vsel %vm649_vm2, %v1709_v8, %v1710_v6  ;;  %vm1928_vm2 = vcmask 523264   ;;  %v3959_v49 = vpack.c.bf16 %v1975_v44, %v1974_v43  ;;  %v3985_v50 = vpack.c.bf16 %v2021_v46, %v2020_v45  ;;  %v2022_v57 = vld [vmem:[%s6200_s1 + $0x4cc] sm:$0xff]  ;;  %v2023_v58 = vld [vmem:[%s6200_s1 + $0x4d4] sm:$0xff]  ;;  %v2025_v4 = vld [vmem:[%s6200_s1 + $0x4e4] sm:$0xff] }
 0x67d   : > { %1724 = vrot.lane.b32.xlu0 %v1723_v3, %s4353_s14  ;;  %1698 = vrot.lane.b32.xlu1 %v1697_v7, %s4353_s14  ;;  %v1683_v18 = vsel %vm1138_vm12, %v1681_v10, %v1682_v9  ;;  %1713 = vst.msk [vmem:[#allocation14 + $0x8] sm:$0xff] %vm1371_vm10, %v1711_v17  ;;  %v1704_v21 = vsel %vm1165_vm13, %v1702_v13, %v1703_v14  ;;  %v2006_v60 = vld [vmem:[%s6200_s1 + $0x44c] sm:$0xff]  ;;  %v2024_v3 = vld [vmem:[%s6200_s1 + $0x4dc] sm:$0xff]  ;;  %vm1939_vm12 = vcmask 1048064   ;;  %vm2295_vm13 = vcmask 1040384  }
 0x67e   : > { %1685 = vst.msk [vmem:[#allocation14] sm:$0xff] %vm1371_vm10, %v1683_v18  ;;  %v3987_v51 = vpack.c.bf16 %v2005_v48, %v2004_v47  ;;  %v3961_v55 = vpack.c.bf16 %v1993_v53, %v1992_v52  ;;  %3986 = vmatprep.subr.bf16.mxu1 %v3985_v50  ;;  %v3989_v59 = vpack.c.bf16 %v2023_v58, %v2022_v57  ;;  %v2008_v5 = vld [vmem:[%s6200_s1 + $0x45c] sm:$0xff]  ;;  %v1978_v7 = vld [vmem:[%s6200_s1 + $0x36c] sm:$0xff]  ;;  %v1979_v8 = vld [vmem:[%s6200_s1 + $0x374] sm:$0xff]  ;;  %vm2293_vm14 = vcmask 1043968  }
 0x67f   : > { %1929 = vst.msk [vmem:[#allocation7] sm:$0xff] %vm1928_vm2, %v4342_v0  ;;  %1930 = vst.msk [vmem:[#allocation7 + $0x10] sm:$0xff] %vm1928_vm2, %v4342_v0  ;;  %v3991_v63 = vpack.c.bf16 %v2007_v61, %v2006_v60  ;;  %v3963_v2 = vpack.c.bf16 %v1977_v56, %v1976_v54  ;;  %v3965_v6 = vpack.c.bf16 %v1995_v1, %v1994_v62  ;;  %v2009_v10 = vld [vmem:[%s6200_s1 + $0x464] sm:$0xff]  ;;  %v2026_v13 = vld [vmem:[%s6200_s1 + $0x4ec] sm:$0xff] }
 0x680   : > { %2263 = vst.msk [vmem:[#allocation8] sm:$0xff] %vm1928_vm2, %v4342_v0  ;;  %2264 = vst.msk [vmem:[#allocation8 + $0x10] sm:$0xff] %vm1928_vm2, %v4342_v0  ;;  %v3993_v9 = vpack.c.bf16 %v2025_v4, %v2024_v3  ;;  %v3995_v14 = vpack.c.bf16 %v2009_v10, %v2008_v5  ;;  %v3967_v16 = vpack.c.bf16 %v1979_v8, %v1978_v7  ;;  %v1980_v17 = vld [vmem:[%s6200_s1 + $0x37c] sm:$0xff]  ;;  %v2001_v45 = vld [vmem:[%s6200_s1 + $0x424] sm:$0xff] }
 0x681   : > { %v1742_v22 = vld [vmem:[#allocation14 + $0x10] sm:$0xff]  ;;  %1731 = vrot.lane.b32.xlu0 %v1730_v20, %s4357_s8  ;;  %1705 = vrot.lane.b32.xlu1 %v1704_v21, %s4357_s8  ;;  %2641 = vst.msk [vmem:[#allocation9] sm:$0xff] %vm1928_vm2, %v4342_v0  ;;  %2642 = vst.msk [vmem:[#allocation9 + $0xc] sm:$0xff] %vm1928_vm2, %v4342_v0  ;;  %v3997_v18 = vpack.c.bf16 %v2027_v15, %v2026_v13  ;;  %v3969_v21 = vpack.c.bf16 %v1997_v12, %v1996_v11  ;;  %v2030_v50 = vld [vmem:[%s6200_s1 + $0x50c] sm:$0xff]  ;;  %s4282_s8 = sshll.u32 %s4360_s19, 4  ;;  %s4283_s8 = int_to_ptr.vmem [resolvable:$false] %s4282_s8 }
 0x682   : > { %3711 = vmatmul.mubr.msk.f32.vlgmr.msra.gmra.mrb[12].mxu0 %vm1371_vm10, %v1742_v22  ;;  %v2011_v20 = vld [vmem:[%s6200_s1 + $0x474] sm:$0xff]  ;;  %v1981_v22 = vld [vmem:[%s6200_s1 + $0x384] sm:$0xff]  ;;  %v2000_v44 = vld [vmem:[%s6200_s1 + $0x41c] sm:$0xff]  ;;  %s4284_s28 = scalar_lea.vmem %s4283_s8, 32  ;;  %p4285_p0 = scmp.lt.s32.totalorder %s6159_s12, %s4283_s8 }
 0x683   : > { %3956 = vmatpush3.bf16.msra.mxu0 %v3955_v41  ;;  %v1984_v46 = vld [vmem:[%s6200_s1 + $0x39c] sm:$0xff]  ;;  %v3977_v48 = vpack.c.bf16 %v2001_v45, %v2000_v44  ;;  %v2014_v54 = vld [vmem:[%s6200_s1 + $0x48c] sm:$0xff]  ;;  %v2003_v58 = vld [vmem:[%s6200_s1 + $0x434] sm:$0xff]  ;;  %p4286_p1 = scmp.lt.s32.totalorder %s4284_s28, %s4278_s27 }
 0x684   : > { %3958 = vmatprep.subr.bf16.mxu0 %v3957_v42  ;;  %v2002_v57 = vld [vmem:[%s6200_s1 + $0x42c] sm:$0xff]  ;;  %v1987_v61 = vld [vmem:[%s6200_s1 + $0x3b4] sm:$0xff]  ;;  %v2032_v62 = vld [vmem:[%s6200_s1 + $0x51c] sm:$0xff] }
 0x685   : > { %v3981_v60 = vpack.c.bf16 %v2003_v58, %v2002_v57  ;;  %v2016_v3 = vld [vmem:[%s6200_s1 + $0x49c] sm:$0xff]  ;;  %v2017_v4 = vld [vmem:[%s6200_s1 + $0x4a4] sm:$0xff]  ;;  %v2035_v7 = vld [vmem:[%s6200_s1 + $0x534] sm:$0xff]  ;;  %p4287_p2 = por %p4286_p1, %p4285_p0 }
 0x686   : > { %v4011_v5 = vpack.c.bf16 %v2017_v4, %v2016_v3  ;;  %v2019_v10 = vld [vmem:[%s6200_s1 + $0x4b4] sm:$0xff]  ;;  %v2360_v44 = vld [vmem:[%s6200_s1 + $0x5fc] sm:$0xff]  ;;  %v2361_v45 = vld [vmem:[%s6200_s1 + $0x604] sm:$0xff] }
 0x687   : > { %3960 = vmatpush3.bf16.msra.mxu0 %v3959_v49  ;;  %v1985_v49 = vld [vmem:[%s6200_s1 + $0x3a4] sm:$0xff]  ;;  %v2394_v3 = vld [vmem:[%s6200_s1 + $0x70c] sm:$0xff]  ;;  %v2395_v4 = vld [vmem:[%s6200_s1 + $0x714] sm:$0xff]  ;;  %p4288_p3 = pnand %p4287_p2, %p4281_p13 }
 0x688   : > { %3962 = vmatprep.subr.bf16.mxu0 %v3961_v55  ;;  %v3979_v52 = vpack.c.bf16 %v1985_v49, %v1984_v46  ;;  %v2344_v46 = vld [vmem:[%s6200_s1 + $0x57c] sm:$0xff]  ;;  %v2362_v49 = vld [vmem:[%s6200_s1 + $0x60c] sm:$0xff]  ;;  %v2377_v57 = vld [vmem:[%s6200_s1 + $0x684] sm:$0xff] }
 0x689   : > { %vm5724_vm4 = vmor %vm2295_vm13, %vm2296_vm1 }
 0x68a   : > { %vm5740_vm10 = vmor %vm1222_vm15, %vm2319_vm8 }
 0x68b   : > { %3964 = vmatpush3.bf16.msra.mxu0 %v3963_v2 }
 0x68c   : > { %3966 = vmatprep.subr.bf16.mxu0 %v3965_v6  ;;  %v2034_v6 = vld [vmem:[%s6200_s1 + $0x52c] sm:$0xff] }
 0x68d   : > { %v4013_v8 = vpack.c.bf16 %v2035_v7, %v2034_v6  ;;  %v2378_v6 = vld [vmem:[%s6200_s1 + $0x68c] sm:$0xff]  ;;  %v2379_v7 = vld [vmem:[%s6200_s1 + $0x694] sm:$0xff] }
 0x68f   : > { %3968 = vmatpush3.bf16.msra.mxu0 %v3967_v16 }
 0x690   : > { %3970 = vmatprep.subr.bf16.mxu0 %v3969_v21 }
 0x6eb   : > { %v1718_v23 = vpop.permute.xlu0 %1717  ;;  %v1692_v24 = vpop.permute.xlu1 %1691 }
 0x6ec   : > { %1720 = vst.msk [vmem:[#allocation14 + $0x8] sm:$0xff] %vm1390_vm5, %v1718_v23  ;;  %1694 = vst.msk [vmem:[#allocation14] sm:$0xff] %vm1390_vm5, %v1692_v24  ;;  %v2028_v23 = vld [vmem:[%s6200_s1 + $0x4fc] sm:$0xff]  ;;  %v2029_v24 = vld [vmem:[%s6200_s1 + $0x504] sm:$0xff] }
 0x6ef   : > { %v1725_v25 = vpop.permute.xlu0 %1724  ;;  %v1699_v26 = vpop.permute.xlu1 %1698 }
 0x6f0   : > { %1727 = vst.msk [vmem:[#allocation14 + $0x8] sm:$0xff] %vm1403_vm9, %v1725_v25  ;;  %1701 = vst.msk [vmem:[#allocation14] sm:$0xff] %vm1403_vm9, %v1699_v26  ;;  %v1998_v25 = vld [vmem:[%s6200_s1 + $0x40c] sm:$0xff]  ;;  %v1999_v26 = vld [vmem:[%s6200_s1 + $0x414] sm:$0xff] }
 0x6f1   : > { %v3973_v34 = vpack.c.bf16 %v1999_v26, %v1998_v25  ;;  %v2036_v25 = vld [vmem:[%s6200_s1 + $0x53c] sm:$0xff]  ;;  %v2037_v26 = vld [vmem:[%s6200_s1 + $0x544] sm:$0xff] }
 0x6f3   : > { %v1732_v27 = vpop.permute.xlu0 %1731  ;;  %v1706_v29 = vpop.permute.xlu1 %1705 }
 0x6f4   : > { %1734 = vst.msk [vmem:[#allocation14 + $0x8] sm:$0xff] %vm1416_vm11, %v1732_v27  ;;  %1708 = vst.msk [vmem:[#allocation14] sm:$0xff] %vm1416_vm11, %v1706_v29  ;;  %v3999_v27 = vpack.c.bf16 %v2011_v20, %v2010_v19  ;;  %v3971_v29 = vpack.c.bf16 %v1981_v22, %v1980_v17 }
 0x6f6   : > { %3972 = vmatpush3.bf16.msra.mxu0 %v3971_v29  ;;  %v2038_v29 = vld [vmem:[%s6200_s1 + $0x54c] sm:$0xff] }
 0x6f7   : > { %3974 = vmatprep.subr.bf16.mxu0 %v3973_v34 }
 0x6fa   : > { %3976 = vmatpush3.bf16.msra.mxu0 %v3975_v38  ;;  %v2041_v38 = vld [vmem:[%s6200_s1 + $0x564] sm:$0xff] }
 0x6fb   : > { %v1741_v30 = vld [vmem:[#allocation14 + $0x8] sm:$0xff]  ;;  %v1740_v31 = vld [vmem:[#allocation14] sm:$0xff]  ;;  %3978 = vmatprep.subr.bf16.mxu0 %v3977_v48 }
 0x6fc   : > { %1851 = vmatprep.mubr.f32.mxu1 %v1741_v30  ;;  %v4001_v30 = vpack.c.bf16 %v2029_v24, %v2028_v23  ;;  %v2345_v48 = vld [vmem:[%s6200_s1 + $0x584] sm:$0xff] }
 0x6fd   : > { %1852 = vmatmul.mubr.f32.vlgmr.msra.gmra.mrb[10].mxu1 %v1740_v31  ;;  %v2012_v31 = vld [vmem:[%s6200_s1 + $0x47c] sm:$0xff] }
 0x6fe   : > { %3988 = vmatpush3.bf16.msra.mxu1 %v3987_v51  ;;  %v2031_v51 = vld [vmem:[%s6200_s1 + $0x514] sm:$0xff]  ;;  %3980 = vmatpush3.bf16.msra.mxu0 %v3979_v52 }
 0x6ff   : > { %3990 = vmatprep.subr.bf16.mxu1 %v3989_v59  ;;  %v4005_v53 = vpack.c.bf16 %v2031_v51, %v2030_v50  ;;  %v1986_v59 = vld [vmem:[%s6200_s1 + $0x3ac] sm:$0xff]  ;;  %3982 = vmatprep.subr.bf16.mxu0 %v3981_v60  ;;  %v2363_v50 = vld [vmem:[%s6200_s1 + $0x614] sm:$0xff]  ;;  %v4031_v51 = vpack.c.bf16 %v2345_v48, %v2344_v46  ;;  %v3255_v48 = vld [vmem:[%s6201_s2 + $0x5] ss:$0 sm:$0xff] }
 0x700   : > { %v3983_v1 = vpack.c.bf16 %v1987_v61, %v1986_v59  ;;  %v4033_v52 = vpack.c.bf16 %v2363_v50, %v2362_v49  ;;  %v2364_v61 = vld [vmem:[%s6200_s1 + $0x61c] sm:$0xff] }
 0x702   : > { %3992 = vmatpush3.bf16.msra.mxu1 %v3991_v63  ;;  %v2033_v63 = vld [vmem:[%s6200_s1 + $0x524] sm:$0xff]  ;;  %3984 = vmatpush3.bf16.msra.mxu0 %v3983_v1 }
 0x703   : > { %3994 = vmatprep.subr.bf16.mxu1 %v3993_v9  ;;  %v4009_v2 = vpack.c.bf16 %v2033_v63, %v2032_v62  ;;  %4017 = vmatprep.subr.bf16.mxu0 %v4355_v28  ;;  %v2018_v9 = vld [vmem:[%s6200_s1 + $0x4ac] sm:$0xff]  ;;  %v2365_v62 = vld [vmem:[%s6200_s1 + $0x624] sm:$0xff]  ;;  %v2348_v63 = vld [vmem:[%s6200_s1 + $0x59c] sm:$0xff] }
 0x704   : > { %v4015_v11 = vpack.c.bf16 %v2019_v10, %v2018_v9  ;;  %v4037_v1 = vpack.c.bf16 %v2365_v62, %v2364_v61  ;;  %v4067_v9 = vpack.c.bf16 %v2379_v7, %v2378_v6  ;;  %v2367_v10 = vld [vmem:[%s6200_s1 + $0x634] sm:$0xff]  ;;  %v2373_v61 = vld [vmem:[%s6200_s1 + $0x664] sm:$0xff]  ;;  %v2356_v62 = vld [vmem:[%s6200_s1 + $0x5dc] sm:$0xff] }
 0x705   : > { %v5688_v6 = vld [vmem:[#allocation8 + $0x10] ss:$2 sm:$0xf]  ;;  %v5690_v7 = vld [vmem:[#allocation8 + $0x11] ss:$2 sm:$0xf] }
 0x706   : > { %3996 = vmatpush3.bf16.msra.mxu1 %v3995_v14 }
 0x707   : > { %3998 = vmatprep.subr.bf16.mxu1 %v3997_v18 }
 0x70a   : > { %4000 = vmatpush3.bf16.msra.mxu1 %v3999_v27  ;;  %v4018_v27 = vpack.c.bf16 %v2037_v26, %v2036_v25  ;;  %v2352_v26 = vld [vmem:[%s6200_s1 + $0x5bc] sm:$0xff] }
 0x70b   : > { %4002 = vmatprep.subr.bf16.mxu1 %v4001_v30 }
 0x755   : > { %v5283_v32 = vpop.f32.mrb[12].mxu0 }
 0x756   : > { %v3712_v33 = vpop.f32.mrb[13].mxu0 }
 0x757   : > { %v2013_v33 = vld [vmem:[%s6200_s1 + $0x484] sm:$0xff] }
 0x758   : > { %v4003_v37 = vpack.c.bf16 %v2013_v33, %v2012_v31  ;;  %v2039_v33 = vld [vmem:[%s6200_s1 + $0x554] sm:$0xff] }
 0x759   : > { %v4021_v34 = vpack.c.bf16 %v2039_v33, %v2038_v29  ;;  %v2382_v29 = vld [vmem:[%s6200_s1 + $0x6ac] sm:$0xff]  ;;  %v2353_v33 = vld [vmem:[%s6200_s1 + $0x5c4] sm:$0xff] }
 0x75a   : > { %4004 = vmatpush3.bf16.msra.mxu1 %v4003_v37 }
 0x75b   : > { %4006 = vmatprep.subr.bf16.mxu1 %v4005_v53  ;;  %v2346_v53 = vld [vmem:[%s6200_s1 + $0x58c] sm:$0xff] }
 0x7d0   : > { %v3374_v39 = vpop.f32.mrb[10].mxu1 }
 0x7d1   : > { %v3375_v41 = vpop.f32.mrb[11].mxu1 }
 0x7d2   : > { %v3376_v42 = vadd.f32 %v3375_v41, %v3374_v39  ;;  %v4024_v39 = vpack.c.bf16 %v2041_v38, %v2040_v35  ;;  %v2043_v41 = vld [vmem:[%s6200_s1 + $0x574] sm:$0xff]  ;;  %v2401_v35 = vld [vmem:[%s6200_s1 + $0x744] sm:$0xff] }
 0x7d4   : > { %v1854_v43 = vadd.f32 %v3376_v42, %v3253_v40  ;;  %v2042_v40 = vld [vmem:[%s6200_s1 + $0x56c] sm:$0xff] }
 0x7d5   : > { %v4027_v42 = vpack.c.bf16 %v2043_v41, %v2042_v40 }
 0x7d6   : > { %v1924_v47 = vadd.f32 %v5283_v32, %v1854_v43  ;;  %v2015_v32 = vld [vmem:[%s6200_s1 + $0x494] sm:$0xff] }
 0x7d7   : > { %v4007_v56 = vpack.c.bf16 %v2015_v32, %v2014_v54  ;;  %v2347_v54 = vld [vmem:[%s6200_s1 + $0x594] sm:$0xff]  ;;  %v2392_v32 = vld [vmem:[%s6200_s1 + $0x6fc] sm:$0xff] }
 0x7d8   : > { %v1927_v55 = vmax.f32 %v1924_v47, 0.0  ;;  %v4029_v47 = vpack.c.bf16 %v2361_v45, %v2360_v44  ;;  %v4035_v58 = vpack.c.bf16 %v2347_v54, %v2346_v53 }
 0x7d9   : > { %4008 = vmatpush3.bf16.msra.mxu1 %v4007_v56  ;;  %v2376_v56 = vld [vmem:[%s6200_s1 + $0x67c] sm:$0xff] }
 0x7da   : > { %1931 = vst.msk [vmem:[#allocation7 + $0x8] sm:$0xff] %vm1928_vm2, %v1927_v55  ;;  %4010 = vmatprep.subr.bf16.mxu1 %v4009_v2  ;;  %v2393_v55 = vld [vmem:[%s6200_s1 + $0x704] sm:$0xff]  ;;  %v4063_v60 = vpack.c.bf16 %v2377_v57, %v2376_v56  ;;  %v2384_v57 = vld [vmem:[%s6200_s1 + $0x6bc] sm:$0xff] }
 0x7db   : > { %v4061_v59 = vpack.c.bf16 %v2393_v55, %v2392_v32  ;;  %v2349_v2 = vld [vmem:[%s6200_s1 + $0x5a4] sm:$0xff] }
 0x7dd   : > { %4012 = vmatpush3.bf16.msra.mxu1 %v4011_v5  ;;  %v4065_v5 = vpack.c.bf16 %v2395_v4, %v2394_v3  ;;  %v2402_v3 = vld [vmem:[%s6200_s1 + $0x74c] sm:$0xff]  ;;  %v2403_v4 = vld [vmem:[%s6200_s1 + $0x754] sm:$0xff] }
 0x7de   : > { %4014 = vmatprep.subr.bf16.mxu1 %v4013_v8  ;;  %v2366_v8 = vld [vmem:[%s6200_s1 + $0x62c] sm:$0xff] }
 0x7e1   : > { %v1943_v12 = vld [vmem:[#allocation7 + $0x7] sm:$0xff]  ;;  %4016 = vmatpush3.bf16.msra.mxu1 %v4015_v11  ;;  %v4039_v11 = vpack.c.bf16 %v2349_v2, %v2348_v63  ;;  %v2357_v63 = vld [vmem:[%s6200_s1 + $0x5e4] sm:$0xff] }
 0x7e2   : > { %v1934_v13 = vld [vmem:[#allocation7 + $0x5] sm:$0xff]  ;;  %1945 = vrot.lane.b32.xlu0 %v1943_v12, %s4353_s14  ;;  %4062 = vmatprep.subr.bf16.mxu1 %v4061_v59  ;;  %v4055_v2 = vpack.c.bf16 %v2357_v63, %v2356_v62  ;;  %v2409_v63 = vld [vmem:[%s6200_s1 + $0x784] sm:$0xff] }
 0x7e3   : > { %1936 = vrot.lane.b32.xlu1 %v1934_v13, %s4353_s14  ;;  %v1941_v14 = vld [vmem:[#allocation7 + $0x6] sm:$0xff]  ;;  %v2397_v13 = vld [vmem:[%s6200_s1 + $0x724] sm:$0xff] }
 0x7e4   : > { %v1932_v15 = vld [vmem:[#allocation7 + $0x4] sm:$0xff]  ;;  %1942 = vst.msk [vmem:[#allocation15 + $0x8] sm:$0xff] %vm1928_vm2, %v1941_v14  ;;  %v1965_v20 = vld [vmem:[#allocation7 + $0xc] sm:$0xff] }
 0x7e5   : > { %1933 = vst.msk [vmem:[#allocation15] sm:$0xff] %vm1928_vm2, %v1932_v15  ;;  %v1957_v16 = vld [vmem:[#allocation7 + $0xa] sm:$0xff]  ;;  %1966 = vst.msk [vmem:[#allocation15 + $0x20] sm:$0xff] %vm1928_vm2, %v1965_v20  ;;  %v4041_v15 = vpack.c.bf16 %v2367_v10, %v2366_v8  ;;  %v2386_v8 = vld [vmem:[%s6200_s1 + $0x6cc] sm:$0xff] }
 0x7e6   : > { %v1949_v17 = vld [vmem:[#allocation7 + $0x8] sm:$0xff]  ;;  %1958 = vst.msk [vmem:[#allocation15 + $0x18] sm:$0xff] %vm1928_vm2, %v1957_v16  ;;  %v2350_v16 = vld [vmem:[%s6200_s1 + $0x5ac] sm:$0xff] }
 0x7e7   : > { %1950 = vst.msk [vmem:[#allocation15 + $0x10] sm:$0xff] %vm1928_vm2, %v1949_v17  ;;  %v1959_v18 = vld [vmem:[#allocation7 + $0xb] sm:$0xff]  ;;  %v2374_v10 = vld [vmem:[%s6200_s1 + $0x66c] sm:$0xff] }
 0x7e8   : > { %v1951_v19 = vld [vmem:[#allocation7 + $0x9] sm:$0xff]  ;;  %1961 = vrot.lane.b32.xlu0 %v1959_v18, %s4353_s14 }
 0x7e9   : > { %1953 = vrot.lane.b32.xlu1 %v1951_v19, %s4353_s14  ;;  %v2396_v12 = vld [vmem:[%s6200_s1 + $0x71c] sm:$0xff]  ;;  %v2351_v17 = vld [vmem:[%s6200_s1 + $0x5b4] sm:$0xff]  ;;  %v2381_v19 = vld [vmem:[%s6200_s1 + $0x6a4] sm:$0xff] }
 0x7ea   : > { %v2380_v14 = vld [vmem:[%s6200_s1 + $0x69c] sm:$0xff]  ;;  %v4069_v18 = vpack.c.bf16 %v2397_v13, %v2396_v12  ;;  %v4043_v25 = vpack.c.bf16 %v2351_v17, %v2350_v16  ;;  %v2375_v12 = vld [vmem:[%s6200_s1 + $0x674] sm:$0xff]  ;;  %v2358_v13 = vld [vmem:[%s6200_s1 + $0x5ec] sm:$0xff] }
 0x7eb   : > { %v2368_v20 = vld [vmem:[%s6200_s1 + $0x63c] sm:$0xff] }
 0x7ec   : > { %v1971_v43 = vld [vmem:[#allocation15 + $0x20] sm:$0xff] }
 0x7ed   : > { %v2372_v59 = vld [vmem:[%s6200_s1 + $0x65c] sm:$0xff] }
 0x7ee   : > { %v2404_v17 = vld [vmem:[%s6200_s1 + $0x75c] sm:$0xff] }
 0x7ef   : > { %v2408_v62 = vld [vmem:[%s6200_s1 + $0x77c] sm:$0xff] }
 0x854   : > { %v1946_v21 = vpop.permute.xlu0 %1945 }
 0x855   : > { %v1937_v22 = vpop.permute.xlu1 %1936  ;;  %1948 = vst.msk [vmem:[#allocation15 + $0x8] sm:$0xff] %vm1939_vm12, %v1946_v21  ;;  %v2369_v21 = vld [vmem:[%s6200_s1 + $0x644] sm:$0xff] }
 0x856   : > { %1940 = vst.msk [vmem:[#allocation15] sm:$0xff] %vm1939_vm12, %v1937_v22  ;;  %v2398_v22 = vld [vmem:[%s6200_s1 + $0x72c] sm:$0xff] }
 0x85a   : > { %v1962_v23 = vpop.permute.xlu0 %1961 }
 0x85b   : > { %v1954_v24 = vpop.permute.xlu1 %1953  ;;  %1964 = vst.msk [vmem:[#allocation15 + $0x18] sm:$0xff] %vm1939_vm12, %v1962_v23  ;;  %v4071_v23 = vpack.c.bf16 %v2381_v19, %v2380_v14  ;;  %v2359_v14 = vld [vmem:[%s6200_s1 + $0x5f4] sm:$0xff]  ;;  %v2388_v19 = vld [vmem:[%s6200_s1 + $0x6dc] sm:$0xff] }
 0x85c   : > { %1956 = vst.msk [vmem:[#allocation15 + $0x10] sm:$0xff] %vm1939_vm12, %v1954_v24  ;;  %v1968_v30 = vld [vmem:[#allocation15 + $0x8] sm:$0xff]  ;;  %v2399_v24 = vld [vmem:[%s6200_s1 + $0x734] sm:$0xff]  ;;  %v4059_v16 = vpack.c.bf16 %v2359_v14, %v2358_v13 }
 0x85d   : > { %v1967_v31 = vld [vmem:[#allocation15] sm:$0xff]  ;;  %2116 = vmatprep.mubr.f32.mxu0 %v1968_v30  ;;  %v2383_v30 = vld [vmem:[%s6200_s1 + $0x6b4] sm:$0xff] }
 0x85e   : > { %2117 = vmatmul.mubr.f32.vlgmr.msra.gmra.mrb[14].mxu0 %v1967_v31  ;;  %v4045_v31 = vpack.c.bf16 %v2369_v21, %v2368_v20  ;;  %v4075_v38 = vpack.c.bf16 %v2383_v30, %v2382_v29  ;;  %v2415_v13 = vld [vmem:[%s6200_s1 + $0x7b4] sm:$0xff] }
 0x85f   : > { %4019 = vmatpush3.bf16.msra.mxu0 %v4018_v27  ;;  %3729 = vmatprep.mubr.msk.f32.mxu0 %vm4359_vm0, %v4342_v0  ;;  %v4073_v27 = vpack.c.bf16 %v2399_v24, %v2398_v22  ;;  %v2716_v30 = vld [vmem:[%s6200_s1 + $0x8d4] sm:$0xff] }
 0x860   : > { %4020 = vmatprep.subr.bf16.mxu0 %v4355_v28 }
 0x862   : > { %v1970_v36 = vld [vmem:[#allocation15 + $0x18] sm:$0xff] }
 0x863   : > { %v1969_v37 = vld [vmem:[#allocation15 + $0x10] sm:$0xff]  ;;  %2186 = vmatprep.mubr.f32.mxu1 %v1970_v36  ;;  %4022 = vmatpush3.bf16.msra.mxu0 %v4021_v34  ;;  %v2400_v34 = vld [vmem:[%s6200_s1 + $0x73c] sm:$0xff] }
 0x864   : > { %2187 = vmatmul.mubr.f32.vlgmr.msra.gmra.mrb[12].mxu1 %v1969_v37  ;;  %4023 = vmatprep.subr.bf16.mxu0 %v4355_v28  ;;  %v2370_v36 = vld [vmem:[%s6200_s1 + $0x64c] sm:$0xff]  ;;  %v2371_v37 = vld [vmem:[%s6200_s1 + $0x654] sm:$0xff]  ;;  %v4077_v40 = vpack.c.bf16 %v2401_v35, %v2400_v34 }
 0x865   : > { %4064 = vmatpush3.bf16.msra.mxu1 %v4063_v60  ;;  %v4049_v41 = vpack.c.bf16 %v2371_v37, %v2370_v36 }
 0x866   : > { %4066 = vmatprep.subr.bf16.mxu1 %v4065_v5  ;;  %v4081_v5 = vpack.c.bf16 %v2403_v4, %v2402_v3  ;;  %v4094_v3 = vpack.c.bf16 %v2409_v63, %v2408_v62  ;;  %v2410_v4 = vld [vmem:[%s6200_s1 + $0x78c] sm:$0xff] }
 0x867   : > { %4025 = vmatpush3.bf16.msra.mxu0 %v4024_v39  ;;  %v4047_v39 = vpack.c.bf16 %v2353_v33, %v2352_v26  ;;  %v2337_v26 = vrot.slane %v5688_v6, 6  ;;  %v2323_v33 = vrot.slane %v5688_v6, 5  ;;  %v2687_v63 = vld [vmem:[%s6200_s1 + $0x7ec] sm:$0xff] }
 0x868   : > { %4026 = vmatprep.subr.bf16.mxu0 %v4355_v28 }
 0x869   : > { %4068 = vmatpush3.bf16.msra.mxu1 %v4067_v9  ;;  %v2387_v9 = vld [vmem:[%s6200_s1 + $0x6d4] sm:$0xff] }
 0x86a   : > { %4070 = vmatprep.subr.bf16.mxu1 %v4069_v18  ;;  %v2405_v18 = vld [vmem:[%s6200_s1 + $0x764] sm:$0xff] }
 0x86b   : > { %4028 = vmatpush3.bf16.msra.mxu0 %v4027_v42  ;;  %v2354_v42 = vld [vmem:[%s6200_s1 + $0x5cc] sm:$0xff]  ;;  %v4085_v22 = vpack.c.bf16 %v2405_v18, %v2404_v17  ;;  %v2730_v17 = vld [vmem:[%s6200_s1 + $0x944] sm:$0xff]  ;;  %v2713_v18 = vld [vmem:[%s6200_s1 + $0x8bc] sm:$0xff] }
 0x86c   : > { %4030 = vmatprep.subr.bf16.mxu0 %v4029_v47 }
 0x86d   : > { %4072 = vmatpush3.bf16.msra.mxu1 %v4071_v23  ;;  %v2389_v23 = vld [vmem:[%s6200_s1 + $0x6e4] sm:$0xff] }
 0x86e   : > { %3730 = vmatmul.mubr.msk.f32.vlgmr.msra.gmra.mrb[16].mxu0 %vm1928_vm2, %v1971_v43  ;;  %4074 = vmatprep.subr.bf16.mxu1 %v4073_v27  ;;  %v2355_v43 = vld [vmem:[%s6200_s1 + $0x5d4] sm:$0xff]  ;;  %v4087_v34 = vpack.c.bf16 %v2389_v23, %v2388_v19 }
 0x86f   : > { %4032 = vmatpush3.bf16.msra.mxu0 %v4031_v51  ;;  %v4051_v44 = vpack.c.bf16 %v2355_v43, %v2354_v42 }
 0x870   : > { %4034 = vmatprep.subr.bf16.mxu0 %v4033_v52 }
 0x871   : > { %4076 = vmatpush3.bf16.msra.mxu1 %v4075_v38 }
 0x872   : > { %4078 = vmatprep.subr.bf16.mxu1 %v4077_v40 }
 0x873   : > { %4036 = vmatpush3.bf16.msra.mxu0 %v4035_v58  ;;  %v2385_v58 = vld [vmem:[%s6200_s1 + $0x6c4] sm:$0xff] }
 0x874   : > { %4038 = vmatprep.subr.bf16.mxu0 %v4037_v1  ;;  %v4079_v60 = vpack.c.bf16 %v2385_v58, %v2384_v57  ;;  %v4053_v1 = vpack.c.bf16 %v2373_v61, %v2372_v59 }
 0x876   : > { %4080 = vmatpush3.bf16.msra.mxu1 %v4079_v60 }
 0x877   : > { %4040 = vmatpush3.bf16.msra.mxu0 %v4039_v11  ;;  %4082 = vmatprep.subr.bf16.mxu1 %v4081_v5  ;;  %v4083_v11 = vpack.c.bf16 %v2387_v9, %v2386_v8  ;;  %v2411_v5 = vld [vmem:[%s6200_s1 + $0x794] sm:$0xff]  ;;  %v2412_v9 = vld [vmem:[%s6200_s1 + $0x79c] sm:$0xff] }
 0x878   : > { %4042 = vmatprep.subr.bf16.mxu0 %v4041_v15  ;;  %v4057_v15 = vpack.c.bf16 %v2375_v12, %v2374_v10  ;;  %v4097_v8 = vpack.c.bf16 %v2411_v5, %v2410_v4  ;;  %v2413_v10 = vld [vmem:[%s6200_s1 + $0x7a4] sm:$0xff]  ;;  %v2414_v12 = vld [vmem:[%s6200_s1 + $0x7ac] sm:$0xff]  ;;  %v2721_v5 = vld [vmem:[%s6200_s1 + $0x8fc] sm:$0xff] }
 0x879   : > { %v4103_v14 = vpack.c.bf16 %v2415_v13, %v2414_v12 }
 0x87a   : > { %4084 = vmatpush3.bf16.msra.mxu1 %v4083_v11  ;;  %v4100_v11 = vpack.c.bf16 %v2413_v10, %v2412_v9  ;;  %v2739_v9 = vld [vmem:[%s6200_s1 + $0x98c] sm:$0xff]  ;;  %v2740_v10 = vld [vmem:[%s6200_s1 + $0x994] sm:$0xff] }
 0x87b   : > { %4044 = vmatpush3.bf16.msra.mxu0 %v4043_v25  ;;  %4086 = vmatprep.subr.bf16.mxu1 %v4085_v22  ;;  %v2732_v22 = vld [vmem:[%s6200_s1 + $0x954] sm:$0xff]  ;;  %v2697_v25 = vld [vmem:[%s6200_s1 + $0x83c] sm:$0xff]  ;;  %v4157_v13 = vpack.c.bf16 %v2740_v10, %v2739_v9  ;;  %v2676_v9 = vld [vmem:[#allocation9 + $0xc] sm:$0xf] }
 0x87c   : > { %4046 = vmatprep.subr.bf16.mxu0 %v4045_v31  ;;  %v2330_v31 = vrot.slane %v5690_v7, 5  ;;  %2677 = vst.msk [vmem:[#allocation17 + $0x10] sm:$0xf] %vm2282_vm6, %v2676_v9 }
 0x87e   : > { %4088 = vmatpush3.bf16.msra.mxu1 %v4087_v34 }
 0x87f   : > { %4048 = vmatpush3.bf16.msra.mxu0 %v4047_v39 }
 0x880   : > { %4050 = vmatprep.subr.bf16.mxu0 %v4049_v41 }
 0x883   : > { %4052 = vmatpush3.bf16.msra.mxu0 %v4051_v44  ;;  %v2406_v44 = vld [vmem:[%s6200_s1 + $0x76c] sm:$0xff] }
 0x884   : > { %4054 = vmatprep.subr.bf16.mxu0 %v4053_v1 }
 0x887   : > { %4056 = vmatpush3.bf16.msra.mxu0 %v4055_v2 }
 0x888   : > { %4058 = vmatprep.subr.bf16.mxu0 %v4057_v15 }
 0x88b   : > { %4060 = vmatpush3.bf16.msra.mxu0 %v4059_v16  ;;  %v2729_v16 = vld [vmem:[%s6200_s1 + $0x93c] sm:$0xff] }
 0x88c   : > { %4093 = vmatprep.subr.bf16.mxu0 %v4355_v28  ;;  %v4137_v19 = vpack.c.bf16 %v2730_v17, %v2729_v16 }
 0x931   : > { %v3414_v45 = vpop.f32.mrb[14].mxu0 }
 0x932   : > { %v3415_v46 = vpop.f32.mrb[15].mxu0 }
 0x933   : > { %v3416_v47 = vadd.f32 %v3415_v46, %v3414_v45  ;;  %v2407_v45 = vld [vmem:[%s6200_s1 + $0x774] sm:$0xff] }
 0x935   : > { %v2119_v51 = vadd.f32 %v3416_v47, %v3255_v48 }
 0x937   : > { %v3449_v49 = vpop.f32.mrb[12].mxu1 }
 0x938   : > { %v3450_v50 = vpop.f32.mrb[13].mxu1 }
 0x939   : > { %v3451_v52 = vadd.f32 %v3450_v50, %v3449_v49  ;;  %v2390_v50 = vld [vmem:[%s6200_s1 + $0x6ec] sm:$0xff] }
 0x93b   : > { %v2189_v53 = vadd.f32 %v3451_v52, %v2119_v51  ;;  %v2391_v51 = vld [vmem:[%s6200_s1 + $0x6f4] sm:$0xff] }
 0x941   : > { %v2258_v54 = vpop.f32.mrb[16].mxu0 }
 0x942   : > { %v2259_v32 = vadd.f32 %v2258_v54, %v2189_v53  ;;  %v3731_v55 = vpop.f32.mrb[17].mxu0 }
 0x943   : > { %v4089_v55 = vpack.c.bf16 %v2407_v45, %v2406_v44  ;;  %v2683_v44 = vld [vmem:[%s6200_s1 + $0x7cc] sm:$0xff]  ;;  %v2684_v45 = vld [vmem:[%s6200_s1 + $0x7d4] sm:$0xff] }
 0x944   : > { %v2262_v56 = vmax.f32 %v2259_v32, 0.0 }
 0x945   : > { %4090 = vmatprep.subr.bf16.mxu1 %v4089_v55  ;;  %v2720_v55 = vld [vmem:[%s6200_s1 + $0x8f4] sm:$0xff] }
 0x946   : > { %2265 = vst.msk [vmem:[#allocation8 + $0x8] sm:$0xff] %vm1928_vm2, %v2262_v56  ;;  %v4091_v56 = vpack.c.bf16 %v2391_v51, %v2390_v50  ;;  %v2702_v50 = vld [vmem:[%s6200_s1 + $0x864] sm:$0xff] }
 0x948   : > { %4092 = vmatpush3.bf16.msra.mxu1 %v4091_v56  ;;  %v2686_v56 = vld [vmem:[%s6200_s1 + $0x7e4] sm:$0xff] }
 0x94d   : > { %v2270_v20 = vld [vmem:[#allocation8 + $0x1] ss:$2 sm:$0xff]  ;;  %v2266_v21 = vld [vmem:[#allocation8] ss:$2 sm:$0xff] }
 0x94e   : > { %v2285_v24 = vcombine.high %v2270_v20, %v2270_v20  ;;  %v2274_v27 = vcombine.high %v2266_v21, %v2266_v21  ;;  %v3260_v29 = vrot.slane %v2270_v20, 11  ;;  %v3258_v36 = vrot.slane %v2270_v20, 10  ;;  %v2714_v20 = vld [vmem:[%s6200_s1 + $0x8c4] sm:$0xff] }
 0x94f   : > { %v3259_v40 = vrot.slane %v2266_v21, 11  ;;  %v3257_v42 = vrot.slane %v2266_v21, 10  ;;  %v2731_v21 = vld [vmem:[%s6200_s1 + $0x94c] sm:$0xff]  ;;  %v4139_v23 = vpack.c.bf16 %v2714_v20, %v2713_v18  ;;  %v3263_v20 = vld [vmem:[%s6201_s2 + $0x6] ss:$0 sm:$0xff] }
 0x950   : > { %v2306_v35 = vrot.slane %v2285_v24, 7  ;;  %v2288_v37 = vrot.slane %v2285_v24, 6  ;;  %v2279_v38 = vrot.slane %v2274_v27, 6  ;;  %2313 = vst.msk [vmem:[#allocation16 + $0x8] sm:$0xf] %vm2282_vm6, %v2274_v27  ;;  %v2300_v41 = vrot.slane %v2274_v27, 7 }
 0x951   : > { %v3261_v43 = vrot.slane %v2274_v27, 9  ;;  %v3262_v49 = vrot.slane %v2285_v24, 9  ;;  %v2715_v27 = vld [vmem:[%s6200_s1 + $0x8cc] sm:$0xff] }
 0x952   : > { %v2307_v46 = vsel %vm5724_vm4, %v3260_v29, %v2306_v35  ;;  %v2289_v47 = vsel %vm5731_vm7, %v3258_v36, %v2288_v37  ;;  %v2336_v48 = vrot.slane %v2279_v38, 4  ;;  %v2301_v52 = vsel %vm5724_vm4, %v3259_v40, %v2300_v41  ;;  %v2733_v36 = vld [vmem:[%s6200_s1 + $0x95c] sm:$0xff]  ;;  %v2734_v37 = vld [vmem:[%s6200_s1 + $0x964] sm:$0xff]  ;;  %v2700_v40 = vld [vmem:[%s6200_s1 + $0x854] sm:$0xff] }
 0x953   : > { %2308 = vrot.lane.b32.xlu1 %v2307_v46, %s4353_s14  ;;  %2290 = vrot.lane.b32.xlu0 %v2289_v47, %s4353_s14  ;;  %v2280_v53 = vsel %vm5731_vm7, %v3257_v42, %v2279_v38  ;;  %v2324_v54 = vsel %vm5740_vm10, %v3261_v43, %v2323_v33  ;;  %2303 = vst.msk [vmem:[#allocation16 + $0x4] sm:$0xf] %vm2282_vm6, %v2301_v52  ;;  %v2682_v33 = vld [vmem:[%s6200_s1 + $0x7c4] sm:$0xff]  ;;  %v2699_v38 = vld [vmem:[%s6200_s1 + $0x84c] sm:$0xff] }
 0x954   : > { %v2338_v32 = vsel %vm5731_vm7, %v2336_v48, %v2337_v26  ;;  %2283 = vst.msk [vmem:[#allocation16] sm:$0xf] %vm2282_vm6, %v2280_v53  ;;  %2326 = vst.msk [vmem:[#allocation16 + $0xc] sm:$0xf] %vm2282_vm6, %v2324_v54  ;;  %v2331_v57 = vsel %vm5740_vm10, %v3262_v49, %v2330_v31  ;;  %v2698_v26 = vld [vmem:[%s6200_s1 + $0x844] sm:$0xff]  ;;  %v2681_v31 = vld [vmem:[%s6200_s1 + $0x7bc] sm:$0xff]  ;;  %v4143_v34 = vpack.c.bf16 %v2716_v30, %v2715_v27 }
 0x955   : > { %2340 = vst.msk [vmem:[#allocation16 + $0x10] sm:$0xf] %vm2282_vm6, %v2338_v32  ;;  %v4105_v29 = vpack.c.bf16 %v2698_v26, %v2697_v25  ;;  %v4107_v35 = vpack.c.bf16 %v2682_v33, %v2681_v31  ;;  %v4145_v39 = vpack.c.bf16 %v2734_v37, %v2733_v36  ;;  %v2717_v41 = vld [vmem:[%s6200_s1 + $0x8dc] sm:$0xff]  ;;  %v2718_v42 = vld [vmem:[%s6200_s1 + $0x8e4] sm:$0xff]  ;;  %v4109_v43 = vpack.c.bf16 %v2700_v40, %v2699_v38  ;;  %v2735_v46 = vld [vmem:[%s6200_s1 + $0x96c] sm:$0xff] }
 0x956   : > { %v4111_v47 = vpack.c.bf16 %v2684_v45, %v2683_v44  ;;  %v2736_v48 = vld [vmem:[%s6200_s1 + $0x974] sm:$0xff]  ;;  %v2701_v49 = vld [vmem:[%s6200_s1 + $0x85c] sm:$0xff]  ;;  %v4147_v51 = vpack.c.bf16 %v2718_v42, %v2717_v41  ;;  %v2719_v53 = vld [vmem:[%s6200_s1 + $0x8ec] sm:$0xff] }
 0x957   : > { %2332 = vrot.lane.b32.xlu1 %v2331_v57, %s4353_s14  ;;  %2314 = vrot.lane.b32.xlu0 %v2285_v24, %s4353_s14  ;;  %v4141_v24 = vpack.c.bf16 %v2732_v22, %v2731_v21  ;;  %v4113_v52 = vpack.c.bf16 %v2702_v50, %v2701_v49  ;;  %v2685_v54 = vld [vmem:[%s6200_s1 + $0x7dc] sm:$0xff]  ;;  %v4149_v32 = vpack.c.bf16 %v2736_v48, %v2735_v46  ;;  %v2707_v36 = vld [vmem:[%s6200_s1 + $0x88c] sm:$0xff]  ;;  %v2644_v44 = vld [vmem:[#allocation9 + $0x4] sm:$0xf] }
 0x958   : > { %4106 = vmatprep.subr.bf16.mxu1 %v4105_v29  ;;  %v2737_v57 = vld [vmem:[%s6200_s1 + $0x97c] sm:$0xff]  ;;  %v2690_v29 = vld [vmem:[%s6200_s1 + $0x804] sm:$0xff]  ;;  %v2708_v37 = vld [vmem:[%s6200_s1 + $0x894] sm:$0xff]  ;;  %2645 = vst.msk [vmem:[#allocation17] sm:$0xf] %vm2282_vm6, %v2644_v44 }
 0x959   : > { %v2689_v27 = vld [vmem:[%s6200_s1 + $0x7fc] sm:$0xff]  ;;  %v2726_v41 = vld [vmem:[%s6200_s1 + $0x924] sm:$0xff]  ;;  %v2691_v45 = vld [vmem:[%s6200_s1 + $0x80c] sm:$0xff] }
 0x95a   : > { %v2741_v30 = vld [vmem:[%s6200_s1 + $0x99c] sm:$0xff]  ;;  %v2692_v46 = vld [vmem:[%s6200_s1 + $0x814] sm:$0xff]  ;;  %v2743_v48 = vld [vmem:[%s6200_s1 + $0x9ac] sm:$0xff] }
 0x95b   : > { %v2725_v40 = vld [vmem:[%s6200_s1 + $0x91c] sm:$0xff]  ;;  %v2744_v49 = vld [vmem:[%s6200_s1 + $0x9b4] sm:$0xff] }
 0x95c   : > { %v2343_v15 = vld [vmem:[#allocation16 + $0x10] sm:$0xf]  ;;  %v2709_v50 = vld [vmem:[%s6200_s1 + $0x89c] sm:$0xff] }
 0x95d   : > { %v3070_v44 = vld [vmem:[%s6202_s3 + $0x41] sm:$0xff] }
 0x9c5   : > { %v2309_v58 = vpop.permute.xlu1 %2308  ;;  %v2291_v59 = vpop.permute.xlu0 %2290 }
 0x9c6   : > { %2311 = vst.msk [vmem:[#allocation16 + $0x4] sm:$0xf] %vm2293_vm14, %v2309_v58  ;;  %2294 = vst.msk [vmem:[#allocation16] sm:$0xf] %vm2293_vm14, %v2291_v59  ;;  %v4115_v58 = vpack.c.bf16 %v2686_v56, %v2685_v54  ;;  %v2738_v59 = vld [vmem:[%s6200_s1 + $0x984] sm:$0xff]  ;;  %v2728_v54 = vld [vmem:[%s6200_s1 + $0x934] sm:$0xff] }
 0x9c7   : > { %v4153_v4 = vpack.c.bf16 %v2738_v59, %v2737_v57  ;;  %v2693_v56 = vld [vmem:[%s6200_s1 + $0x81c] sm:$0xff]  ;;  %v2694_v57 = vld [vmem:[%s6200_s1 + $0x824] sm:$0xff]  ;;  %v2711_v59 = vld [vmem:[%s6200_s1 + $0x8ac] sm:$0xff] }
 0x9c9   : > { %v2333_v60 = vpop.permute.xlu1 %2332  ;;  %v2315_v61 = vpop.permute.xlu0 %2314 }
 0x9ca   : > { %2335 = vst.msk [vmem:[#allocation16 + $0xc] sm:$0xf] %vm2293_vm14, %v2333_v60  ;;  %2317 = vst.msk [vmem:[#allocation16 + $0x8] sm:$0xf] %vm2293_vm14, %v2315_v61  ;;  %v2703_v60 = vld [vmem:[%s6200_s1 + $0x86c] sm:$0xff]  ;;  %v2704_v61 = vld [vmem:[%s6200_s1 + $0x874] sm:$0xff] }
 0x9cb   : > { %v4117_v62 = vpack.c.bf16 %v2704_v61, %v2703_v60  ;;  %v2712_v60 = vld [vmem:[%s6200_s1 + $0x8b4] sm:$0xff] }
 0x9cc   : > { %v4133_v61 = vpack.c.bf16 %v2712_v60, %v2711_v59  ;;  %v3081_v59 = vld [vmem:[%s6202_s3 + $0x99] sm:$0xff] }
 0x9cd   : > { %v2341_v1 = vld [vmem:[#allocation16] sm:$0xff] }
 0x9ce   : > { %v2424_v2 = vcombine.high %v2341_v1, %v2341_v1 }
 0x9d0   : > { %2494 = vmatprep.mubr.f32.mxu0 %v2424_v2  ;;  %v4151_v2 = vpack.c.bf16 %v2720_v55, %v2719_v53  ;;  %v2727_v53 = vld [vmem:[%s6200_s1 + $0x92c] sm:$0xff] }
 0x9d1   : > { %2495 = vmatmul.mubr.f32.vlgmr.msra.gmra.mrb[18].mxu0 %v2341_v1  ;;  %v2342_v6 = vld [vmem:[#allocation16 + $0x8] sm:$0xff]  ;;  %v4167_v55 = vpack.c.bf16 %v2728_v54, %v2727_v53  ;;  %v3077_v54 = vld [vmem:[%s6202_s3 + $0x79] sm:$0xff] }
 0x9d2   : > { %4095 = vmatpush3.bf16.msra.mxu0 %v4094_v3  ;;  %v2425_v7 = vcombine.high %v2342_v6, %v2342_v6  ;;  %3748 = vmatprep.mubr.msk.f32.mxu0 %vm4359_vm0, %v4342_v0  ;;  %v2688_v1 = vld [vmem:[%s6200_s1 + $0x7f4] sm:$0xff]  ;;  %v2705_v3 = vld [vmem:[%s6200_s1 + $0x87c] sm:$0xff] }
 0x9d3   : > { %4096 = vmatprep.subr.bf16.mxu0 %v4355_v28  ;;  %v3076_v53 = vld [vmem:[%s6202_s3 + $0x71] sm:$0xff] }
 0x9d4   : > { %2564 = vmatprep.mubr.f32.mxu1 %v2425_v7  ;;  %v2706_v7 = vld [vmem:[%s6200_s1 + $0x884] sm:$0xff] }
 0x9d5   : > { %2565 = vmatmul.mubr.f32.vlgmr.msra.gmra.mrb[14].mxu1 %v2342_v6  ;;  %v2722_v6 = vld [vmem:[%s6200_s1 + $0x904] sm:$0xff] }
 0x9d6   : > { %4098 = vmatpush3.bf16.msra.mxu0 %v4097_v8  ;;  %4108 = vmatpush3.bf16.msra.mxu1 %v4107_v35  ;;  %v4119_v8 = vpack.c.bf16 %v2688_v1, %v2687_v63  ;;  %v4155_v12 = vpack.c.bf16 %v2722_v6, %v2721_v5  ;;  %v2742_v35 = vld [vmem:[%s6200_s1 + $0x9a4] sm:$0xff]  ;;  %v2696_v5 = vld [vmem:[%s6200_s1 + $0x834] sm:$0xff] }
 0x9d7   : > { %4099 = vmatprep.subr.bf16.mxu0 %v4355_v28  ;;  %4110 = vmatprep.subr.bf16.mxu1 %v4109_v43  ;;  %v4161_v38 = vpack.c.bf16 %v2742_v35, %v2741_v30  ;;  %v4163_v43 = vpack.c.bf16 %v2726_v41, %v2725_v40  ;;  %v2993_v41 = vld [vmem:[%s6202_s3 + $0x30] sm:$0xff] }
 0x9da   : > { %4101 = vmatpush3.bf16.msra.mxu0 %v4100_v11  ;;  %4112 = vmatpush3.bf16.msra.mxu1 %v4111_v47  ;;  %v4121_v11 = vpack.c.bf16 %v2706_v7, %v2705_v3  ;;  %v4127_v47 = vpack.c.bf16 %v2692_v46, %v2691_v45  ;;  %v3071_v45 = vld [vmem:[%s6202_s3 + $0x49] sm:$0xff]  ;;  %v3072_v46 = vld [vmem:[%s6202_s3 + $0x51] sm:$0xff] }
 0x9db   : > { %4102 = vmatprep.subr.bf16.mxu0 %v4355_v28  ;;  %4114 = vmatprep.subr.bf16.mxu1 %v4113_v52  ;;  %v2710_v52 = vld [vmem:[%s6200_s1 + $0x8a4] sm:$0xff] }
 0x9de   : > { %4104 = vmatpush3.bf16.msra.mxu0 %v4103_v14  ;;  %4116 = vmatpush3.bf16.msra.mxu1 %v4115_v58  ;;  %v2723_v14 = vld [vmem:[%s6200_s1 + $0x90c] sm:$0xff]  ;;  %v4131_v58 = vpack.c.bf16 %v2694_v57, %v2693_v56 }
 0x9df   : > { %4138 = vmatprep.subr.bf16.mxu0 %v4137_v19  ;;  %4118 = vmatprep.subr.bf16.mxu1 %v4117_v62  ;;  %v3079_v56 = vld [vmem:[%s6202_s3 + $0x89] sm:$0xff] }
 0x9e1   : > { %3749 = vmatmul.mubr.msk.f32.vlgmr.msra.gmra.mrb[20].mxu0 %vm1928_vm2, %v2343_v15  ;;  %v2724_v15 = vld [vmem:[%s6200_s1 + $0x914] sm:$0xff] }
 0x9e2   : > { %4140 = vmatpush3.bf16.msra.mxu0 %v4139_v23  ;;  %4120 = vmatpush3.bf16.msra.mxu1 %v4119_v8  ;;  %v4159_v16 = vpack.c.bf16 %v2724_v15, %v2723_v14  ;;  %v2745_v14 = vld [vmem:[%s6200_s1 + $0x9bc] sm:$0xff]  ;;  %v2746_v15 = vld [vmem:[%s6200_s1 + $0x9c4] sm:$0xff] }
 0x9e3   : > { %4142 = vmatprep.subr.bf16.mxu0 %v4141_v24  ;;  %4122 = vmatprep.subr.bf16.mxu1 %v4121_v11 }
 0x9e6   : > { %4144 = vmatpush3.bf16.msra.mxu0 %v4143_v34  ;;  %v4123_v34 = vpack.c.bf16 %v2690_v29, %v2689_v27  ;;  %v2751_v27 = vld [vmem:[%s6200_s1 + $0x9ec] sm:$0xff]  ;;  %v2752_v29 = vld [vmem:[%s6200_s1 + $0x9f4] sm:$0xff] }
 0x9e7   : > { %4146 = vmatprep.subr.bf16.mxu0 %v4145_v39  ;;  %v4125_v39 = vpack.c.bf16 %v2708_v37, %v2707_v36  ;;  %v4179_v30 = vpack.c.bf16 %v2752_v29, %v2751_v27  ;;  %v2989_v36 = vld [vmem:[%s6202_s3 + $0x10] sm:$0xff] }
 0x9e8   : > { %4124 = vmatpush3.bf16.msra.mxu1 %v4123_v34  ;;  %v2988_v34 = vld [vmem:[%s6202_s3 + $0x8] sm:$0xff] }
 0x9e9   : > { %4126 = vmatprep.subr.bf16.mxu1 %v4125_v39  ;;  %v2992_v39 = vld [vmem:[%s6202_s3 + $0x28] sm:$0xff] }
 0x9ea   : > { %4148 = vmatpush3.bf16.msra.mxu0 %v4147_v51  ;;  %v4165_v51 = vpack.c.bf16 %v2744_v49, %v2743_v48  ;;  %v3073_v48 = vld [vmem:[%s6202_s3 + $0x59] sm:$0xff] }
 0x9eb   : > { %4150 = vmatprep.subr.bf16.mxu0 %v4149_v32  ;;  %v4129_v32 = vpack.c.bf16 %v2710_v52, %v2709_v50  ;;  %v4197_v49 = vpack.c.bf16 %v3073_v48, %v3072_v46  ;;  %v3074_v50 = vld [vmem:[%s6202_s3 + $0x61] sm:$0xff] }
 0x9ec   : > { %4128 = vmatpush3.bf16.msra.mxu1 %v4127_v47  ;;  %v4194_v47 = vpack.c.bf16 %v3071_v45, %v3070_v44 }
 0x9ed   : > { %4130 = vmatprep.subr.bf16.mxu1 %v4129_v32  ;;  %v4203_v32 = vpack.c.bf16 %v3077_v54, %v3076_v53 }
 0x9ee   : > { %4152 = vmatpush3.bf16.msra.mxu0 %v4151_v2 }
 0x9ef   : > { %4154 = vmatprep.subr.bf16.mxu0 %v4153_v4  ;;  %v2695_v4 = vld [vmem:[%s6200_s1 + $0x82c] sm:$0xff] }
 0x9f0   : > { %4132 = vmatpush3.bf16.msra.mxu1 %v4131_v58  ;;  %v4135_v6 = vpack.c.bf16 %v2696_v5, %v2695_v4  ;;  %v3080_v58 = vld [vmem:[%s6202_s3 + $0x91] sm:$0xff]  ;;  %v3265_v5 = vld [vmem:[%s6201_s2 + $0x7] ss:$0 sm:$0xff] }
 0x9f1   : > { %4134 = vmatprep.subr.bf16.mxu1 %v4133_v61  ;;  %v4209_v60 = vpack.c.bf16 %v3081_v59, %v3080_v58  ;;  %v3082_v61 = vld [vmem:[%s6202_s3 + $0xa1] sm:$0xff] }
 0x9f2   : > { %4156 = vmatpush3.bf16.msra.mxu0 %v4155_v12 }
 0x9f3   : > { %4158 = vmatprep.subr.bf16.mxu0 %v4157_v13 }
 0x9f4   : > { %4136 = vmatpush3.bf16.msra.mxu1 %v4135_v6 }
 0x9f5   : > { %4193 = vmatprep.subr.bf16.mxu1 %v4355_v28 }
 0x9f6   : > { %4160 = vmatpush3.bf16.msra.mxu0 %v4159_v16 }
 0x9f7   : > { %4162 = vmatprep.subr.bf16.mxu0 %v4161_v38  ;;  %v2991_v38 = vld [vmem:[%s6202_s3 + $0x20] sm:$0xff] }
 0x9f8   : > { %v4188_v40 = vpack.c.bf16 %v2992_v39, %v2991_v38 }
 0x9fa   : > { %4164 = vmatpush3.bf16.msra.mxu0 %v4163_v43 }
 0x9fb   : > { %4166 = vmatprep.subr.bf16.mxu0 %v4165_v51  ;;  %v3075_v51 = vld [vmem:[%s6202_s3 + $0x69] sm:$0xff] }
 0x9fc   : > { %v4200_v52 = vpack.c.bf16 %v3075_v51, %v3074_v50 }
 0x9fe   : > { %4168 = vmatpush3.bf16.msra.mxu0 %v4167_v55  ;;  %v3078_v55 = vld [vmem:[%s6202_s3 + $0x81] sm:$0xff] }
 0x9ff   : > { %4169 = vmatprep.subr.bf16.mxu0 %v4355_v28  ;;  %v4206_v57 = vpack.c.bf16 %v3079_v56, %v3078_v55 }
 0xaa4   : > { %v3493_v17 = vpop.f32.mrb[18].mxu0 }
 0xaa5   : > { %v3494_v18 = vpop.f32.mrb[19].mxu0 }
 0xaa6   : > { %v3495_v19 = vadd.f32 %v3494_v18, %v3493_v17  ;;  %v4170_v18 = vpack.c.bf16 %v2746_v15, %v2745_v14 }
 0xaa8   : > { %v3528_v21 = vpop.f32.mrb[14].mxu1  ;;  %v2497_v23 = vadd.f32 %v3495_v19, %v3263_v20  ;;  %v2747_v19 = vld [vmem:[%s6200_s1 + $0x9cc] sm:$0xff]  ;;  %v2748_v20 = vld [vmem:[%s6200_s1 + $0x9d4] sm:$0xff] }
 0xaa9   : > { %v3529_v22 = vpop.f32.mrb[15].mxu1 }
 0xaaa   : > { %v3530_v24 = vadd.f32 %v3529_v22, %v3528_v21 }
 0xaac   : > { %v2567_v25 = vadd.f32 %v3530_v24, %v2497_v23  ;;  %v4173_v23 = vpack.c.bf16 %v2748_v20, %v2747_v19  ;;  %v2749_v24 = vld [vmem:[%s6200_s1 + $0x9dc] sm:$0xff] }
 0xab4   : > { %v2636_v26 = vpop.f32.mrb[20].mxu0 }
 0xab5   : > { %v2637_v31 = vadd.f32 %v2636_v26, %v2567_v25  ;;  %v3750_v33 = vpop.f32.mrb[21].mxu0  ;;  %v2750_v25 = vld [vmem:[%s6200_s1 + $0x9e4] sm:$0xff] }
 0xab6   : > { %v4176_v26 = vpack.c.bf16 %v2750_v25, %v2749_v24  ;;  %v2987_v33 = vld [vmem:[%s6202_s3] sm:$0xff] }
 0xab7   : > { %v2640_v42 = vmax.f32 %v2637_v31, 0.0  ;;  %v2680_v31 = vld [vmem:[#allocation17 + $0x10] sm:$0xf]  ;;  %v4182_v35 = vpack.c.bf16 %v2988_v34, %v2987_v33  ;;  %v2995_v24 = vld [vmem:[%s6202_s3 + $0x40] sm:$0x1] }
 0xab9   : > { %2643 = vst.msk [vmem:[#allocation9 + $0x8] sm:$0xf] %vm2282_vm6, %v2640_v42  ;;  %v2994_v42 = vld [vmem:[%s6202_s3 + $0x38] sm:$0xff] }
 0xaba   : > { %v4191_v43 = vpack.c.bf16 %v2994_v42, %v2993_v41 }
 0xac0   : > { %v2670_v62 = vld [vmem:[#allocation9 + $0xb] sm:$0xf]  ;;  %v2652_v3 = vld [vmem:[#allocation9 + $0x6] sm:$0xf] }
 0xac1   : > { %v2662_v63 = vld [vmem:[#allocation9 + $0x9] sm:$0xf]  ;;  %2672 = vrot.lane.b32.xlu1 %v2670_v62, %s4353_s14  ;;  %2653 = vst.msk [vmem:[#allocation17 + $0x4] sm:$0xf] %vm2282_vm6, %v2652_v3  ;;  %v2646_v8 = vld [vmem:[#allocation9 + $0x5] sm:$0xf] }
 0xac2   : > { %2664 = vrot.lane.b32.xlu0 %v2662_v63, %s4353_s14  ;;  %v2668_v1 = vld [vmem:[#allocation9 + $0xa] sm:$0xf] }
 0xac3   : > { %v2660_v2 = vld [vmem:[#allocation9 + $0x8] sm:$0xf]  ;;  %2669 = vst.msk [vmem:[#allocation17 + $0xc] sm:$0xf] %vm2282_vm6, %v2668_v1 }
 0xac4   : > { %2661 = vst.msk [vmem:[#allocation17 + $0x8] sm:$0xf] %vm2282_vm6, %v2660_v2  ;;  %v2654_v7 = vld [vmem:[#allocation9 + $0x7] sm:$0xf] }
 0xac5   : > { %2656 = vrot.lane.b32.xlu1 %v2654_v7, %s4353_s14  ;;  %v3083_v62 = vld [vmem:[%s6202_s3 + $0xa9] sm:$0xff] }
 0xac6   : > { %2648 = vrot.lane.b32.xlu0 %v2646_v8, %s4353_s14  ;;  %v4212_v63 = vpack.c.bf16 %v3083_v62, %v3082_v61 }
 0xb33   : > { %v2673_v10 = vpop.permute.xlu1 %2672 }
 0xb34   : > { %v2665_v11 = vpop.permute.xlu0 %2664  ;;  %2675 = vst.msk [vmem:[#allocation17 + $0xc] sm:$0xf] %vm2293_vm14, %v2673_v10 }
 0xb35   : > { %2667 = vst.msk [vmem:[#allocation17 + $0x8] sm:$0xf] %vm2293_vm14, %v2665_v11 }
 0xb37   : > { %v2657_v12 = vpop.permute.xlu1 %2656 }
 0xb38   : > { %v2649_v13 = vpop.permute.xlu0 %2648  ;;  %2659 = vst.msk [vmem:[#allocation17 + $0x4] sm:$0xf] %vm2293_vm14, %v2657_v12 }
 0xb39   : > { %2651 = vst.msk [vmem:[#allocation17] sm:$0xf] %vm2293_vm14, %v2649_v13 }
 0xb3c   : > { %v2679_v16 = vld [vmem:[#allocation17 + $0x8] sm:$0xff] }
 0xb3d   : > { %v2762_v17 = vcombine.high %v2679_v16, %v2679_v16 }
 0xb3f   : > { %2901 = vmatprep.mubr.f32.mxu0 %v2762_v17 }
 0xb40   : > { %2902 = vmatmul.mubr.f32.vlgmr.msra.gmra.mrb[22].mxu0 %v2679_v16  ;;  %v2678_v21 = vld [vmem:[#allocation17] sm:$0xff] }
 0xb41   : > { %4171 = vmatpush3.bf16.msra.mxu0 %v4170_v18  ;;  %v2761_v22 = vcombine.high %v2678_v21, %v2678_v21  ;;  %3767 = vmatprep.mubr.msk.f32.mxu0 %vm4359_vm0, %v4342_v0 }
 0xb42   : > { %4172 = vmatprep.subr.bf16.mxu0 %v4355_v28 }
 0xb43   : > { %2831 = vmatprep.mubr.f32.mxu1 %v2761_v22  ;;  %v3085_v22 = vld [vmem:[%s6202_s3 + $0xb9] sm:$0xff] }
 0xb44   : > { %2832 = vmatmul.mubr.f32.vlgmr.msra.gmra.mrb[16].mxu1 %v2678_v21  ;;  %v3084_v21 = vld [vmem:[%s6202_s3 + $0xb1] sm:$0xff] }
 0xb45   : > { %4174 = vmatpush3.bf16.msra.mxu0 %v4173_v23  ;;  %3821 = vmatprep.mubr.msk.f32.mxu1 %vm4359_vm0, %v4342_v0  ;;  %v4215_v23 = vpack.c.bf16 %v3085_v22, %v3084_v21 }
 0xb46   : > { %4175 = vmatprep.subr.bf16.mxu0 %v4355_v28  ;;  %4195 = vmatpush3.bf16.msra.mxu1 %v4194_v47 }
 0xb47   : > { %4196 = vmatprep.subr.bf16.mxu1 %v4355_v28 }
 0xb49   : > { %4177 = vmatpush3.bf16.msra.mxu0 %v4176_v26 }
 0xb4a   : > { %4178 = vmatprep.subr.bf16.mxu0 %v4355_v28  ;;  %4198 = vmatpush3.bf16.msra.mxu1 %v4197_v49 }
 0xb4b   : > { %4199 = vmatprep.subr.bf16.mxu1 %v4355_v28 }
 0xb4d   : > { %4180 = vmatpush3.bf16.msra.mxu0 %v4179_v30  ;;  %v3086_v30 = vld [vmem:[%s6202_s3 + $0xc1] sm:$0x1] }
 0xb4e   : > { %4181 = vmatprep.subr.bf16.mxu0 %v4355_v28  ;;  %4201 = vmatpush3.bf16.msra.mxu1 %v4200_v52 }
 0xb4f   : > { %4202 = vmatprep.subr.bf16.mxu1 %v4355_v28 }
 0xb50   : > { %3768 = vmatmul.mubr.msk.f32.vlgmr.msra.gmra.mrb[24].mxu0 %vm1928_vm2, %v2680_v31 }
 0xb51   : > { %3786 = vmatprep.mubr.msk.f32.mxu0 %vm4359_vm0, %v4342_v0  ;;  %4183 = vmatpush3.bf16.msra.mxu0 %v4182_v35  ;;  %v2990_v0 = vld [vmem:[%s6202_s3 + $0x18] sm:$0xff] }
 0xb52   : > { %4184 = vmatprep.subr.bf16.mxu0 %v4355_v28  ;;  %v4185_v37 = vpack.c.bf16 %v2990_v0, %v2989_v36  ;;  %4204 = vmatpush3.bf16.msra.mxu1 %v4203_v32 }
 0xb53   : > { %4205 = vmatprep.subr.bf16.mxu1 %v4355_v28 }
 0xb55   : > { %4186 = vmatpush3.bf16.msra.mxu0 %v4185_v37 }
 0xb56   : > { %4187 = vmatprep.subr.bf16.mxu0 %v4355_v28  ;;  %4207 = vmatpush3.bf16.msra.mxu1 %v4206_v57 }
 0xb57   : > { %4208 = vmatprep.subr.bf16.mxu1 %v4355_v28 }
 0xb59   : > { %4189 = vmatpush3.bf16.msra.mxu0 %v4188_v40 }
 0xb5a   : > { %4190 = vmatprep.subr.bf16.mxu0 %v4355_v28  ;;  %4210 = vmatpush3.bf16.msra.mxu1 %v4209_v60 }
 0xb5b   : > { %4211 = vmatprep.subr.bf16.mxu1 %v4355_v28 }
 0xb5d   : > { %4192 = vmatpush3.bf16.msra.mxu0 %v4191_v43 }
 0xb5e   : > { %4213 = vmatpush3.bf16.msra.mxu1 %v4212_v63 }
 0xb5f   : > { %4214 = vmatprep.subr.bf16.mxu1 %v4355_v28 }
 0xb62   : > { %4216 = vmatpush3.bf16.msra.mxu1 %v4215_v23 }
 0xc13   : > { %v3607_v1 = vpop.f32.mrb[22].mxu0 }
 0xc14   : > { %v3608_v2 = vpop.f32.mrb[23].mxu0 }
 0xc15   : > { %v3609_v3 = vadd.f32 %v3608_v2, %v3607_v1 }
 0xc17   : > { %v3572_v4 = vpop.f32.mrb[16].mxu1 }
 0xc18   : > { %v3573_v6 = vpop.f32.mrb[17].mxu1 }
 0xc19   : > { %v3574_v7 = vadd.f32 %v3573_v6, %v3572_v4 }
 0xc1b   : > { %v2834_v8 = vadd.f32 %v3574_v7, %v3265_v5 }
 0xc1d   : > { %v2904_v9 = vadd.f32 %v3609_v3, %v2834_v8 }
 0xc23   : > { %v2973_v10 = vpop.f32.mrb[24].mxu0 }
 0xc24   : > { %v2974_v11 = vadd.f32 %v2973_v10, %v2904_v9  ;;  %v3769_v12 = vpop.f32.mrb[25].mxu0 }
 0xc26   : > { %v2977_v13 = vmax.f32 %v2974_v11, 0.0 }
 0xc28   : > { %v2978_v14 = vsel %vm2282_vm6, %v2977_v13, 0.0 }
 0xc29   : > { %v2979_v15 = vrot.slane %v2978_v14, 4 }
 0xc2b   : > { %v2980_v28 = vadd.f32 %v2979_v15, %v2978_v14 }
 0xc2d   : > { %v2981_v16 = vrot.slane %v2980_v28, 2 }
 0xc2f   : > { %v2982_v17 = vadd.f32 %v2981_v16, %v2980_v28 }
 0xc31   : > { %v2983_v18 = vrot.slane %v2982_v17, 1 }
 0xc33   : > { %v2984_v19 = vadd.f32 %v2983_v18, %v2982_v17 }
 0xc35   : > { %v2986_v20 = vmul.f32 0.25, %v2984_v19 }
 0xc37   : > { %3787 = vmatmul.mubr.msk.f32.vlgmr.msra.gmra.mrb[26].mxu0 %vm1928_vm2, %v2986_v20 }
 0xd0a   : > { %v3065_v25 = vpop.f32.mrb[26].mxu0 }
 0xd0b   : > { %v3066_v26 = vadd.f32 %v3065_v25, %v2995_v24  ;;  %v3788_v27 = vpop.f32.mrb[27].mxu0 }
 0xd0d   : > { %v3069_v29 = vmax.f32 %v3066_v26, 0.0 }
 0xd0f   : > { %3822 = vmatmul.mubr.f32.vlgmr.msra.gmra.mrb[18].mxu1 %v3069_v29 }
 0xde2   : > { %v3153_v31 = vpop.f32.mrb[18].mxu1 }
 0xde3   : > { %v3154_v33 = vadd.f32 %v3153_v31, %v3086_v30  ;;  %v3823_v34 = vpop.f32.mrb[19].mxu1 }
 0xde5   : > { %3157 = vst [vmem:[%s189_s11] sm:$0x1] %v3154_v33 }
 0xde6   : > { %4291 = shalt.err (!%p4288_p3)
}
 0xde7   : > { %s4292_s29 = scalar_lea.hbm %s6157_s22, 16  ;;  %s4296_s5 = scalar_lea.hbm %s6203_s4, 32 }
 0xde8   : > { %p4293_p4 = scmp.ne.s32.totalorder %s6157_s22, %s4292_s29  ;;  %p4297_p9 = scmp.lt.u32.totalorder %s6157_s22, %s6203_s4 }
 0xde9   : > { %p4298_p10 = scmp.lt.u32.totalorder %s4296_s5, %s4292_s29  ;;  %p4300_p12 = scmp.lt.u32.totalorder %s4292_s29, %s6157_s22 }
 0xdea   : > { %p4294_p7 = pnand %p4293_p4, %p4424_p5 }
 0xdeb   : > { %p4299_p11 = por %p4298_p10, %p4297_p9 }
 0xdec   : > { %p4295_p8 = pneg %p4294_p7 }
 0xded   : > { %p4301_p13 = por %p4300_p12, %p4299_p11 }
 0xdef   : > { %p4302_p0 = pnand %p4301_p13, %p4295_p8 }
 0xdf1   : > { %4305 = shalt.err (!%p4302_p0)
}
 0xdf2   : > { %4217 = dma.vmem_to_hbm [thread:$0]  (%p4424_p5), %s6159_s12, 16, %s6157_s22, %s3159_s23  }
 0xdf3 PF: > { %p4223_p1 = scmp.ge.s32.totalorder %s4340_s18, 2  ;;  %s3183_s7 = sand.u32 1, %s4328_s15  }
 0xdf4   : > { %s3184_s10 = scalar_lea.sflag [#allocation19], %s3183_s7 }
 0xdf5   : > { %p4220_p2 = pnand %p4223_p1, %p4428_p6 }
 0xdf7   : > { %4323 = dma.done.wait (!%p4220_p2), %s3184_s10, 16  }
 0xdf8   : > { %4325 = vsyncadd (!%p4220_p2), %s3184_s10, 4294967280  ;;  %p14_p3 = scmp.ge.s32.totalorder %s4411_s21, 4   ;;  %s6212_s15 = smov %s4332_s16 }
 0xdf9   : > { %s6213_s16 = smov %s4336_s17  ;;  %s6214_s17 = smov %s4422_s24 }
 0xdfa   : > { %s6215_s18 = smov %s4411_s21  ;;  %16 = sbr.rel (!%p14_p3) target bundleno = 3 (0x3), region = 108 }
 0xe01   :  { %3188 = vsyncpa [#allocation19], 1 }
 0xe02   :  { %3190 = vsyncpa [#allocation19 + $0x1], 1 }

</bundles_post_ra>
